<compile_context>
chip_gen: v5e
topology: v5e:2x2
jax: 0.10.0
libtpu: 0.0.40
codegen_flags: <defaults>
</compile_context>

<pallas_src>
import jax
import jax.numpy as jnp
import numpy as np
from jax.experimental import pallas as pl
from jax.experimental.pallas import tpu as pltpu


# ----------------------------- static geometry --------------------------------
# fc1 = Linear(7680, 128) forces the spatial geometry:
# 98x104 -> conv1(3x3) 96x102 -> pool3 32x34 -> conv2(3x3) 30x32 -> pool2 15x16
# -> 32 * 15 * 16 = 7680 flat features.
H_IN, W_IN = 98, 104
CIN = 3
C1, C2 = 16, 32
P1H, P1W = 32, 34                 # pooled conv1 grid
P2H, P2W = 15, 16                 # pooled conv2 grid
NPOS1 = P1H * P1W                 # 1088 lanes (stage 1)
NPOS2 = P2H * P2W                 # 240 positions (stage 2)
NPOS2_PAD = 256                   # padded to a lane-aligned 256
K1 = 5 * 5 * CIN                  # widened conv1 window (stride 3) = 75
K1_PAD = 128                      # zero-padded K for a fully aligned matmul
K2 = 4 * 4 * C1                   # widened conv2 window (stride 2) = 256
M1 = 9 * C1                       # 9 pool offsets x 16 out chans = 144
M2 = 4 * C2                       # 4 pool offsets x 32 out chans = 128
FC_H = 128


# ------------------------------ Pallas kernels --------------------------------

def _conv1_pool_kernel(xp_ref, w_ref, b_ref, o_ref):
    """conv1 + bias + ReLU + 3x3 max-pool: one matmul + sublane-group max.

    xp_ref : (1, K1_PAD, NPOS1) bf16  widened-window im2col^T of the input
    w_ref  : (M1, K1_PAD)       bf16  conv1 weight embedded at the 9 pool offsets
    b_ref  : (M1, 1)            f32
    o_ref  : (1, C1, NPOS1)     bf16  pooled activations, (channel, h*P1W + w)
    """
    z = jnp.dot(w_ref[...], xp_ref[0], preferred_element_type=jnp.float32)
    z = jnp.maximum(z + b_ref[...], 0.0)          # bias + ReLU, f32
    y = z[0:C1]
    for g in range(1, 9):                         # max over the 9 pool offsets
        y = jnp.maximum(y, z[g * C1:(g + 1) * C1])
    o_ref[0] = y.astype(o_ref.dtype)


def _conv2_pool_fc_kernel(p2_ref, w2_ref, b2_ref, w1_ref, bfc1_ref,
                          wfc2_ref, bfc2_ref, o_ref):
    """conv2 + bias + ReLU + 2x2 max-pool + fc1 + ReLU + fc2, fused per image.

    p2_ref  : (1, K2, NPOS2_PAD)       bf16  im2col^T of pooled conv1 output
    w2_ref  : (M2, K2)                 bf16  conv2 weight at the 4 pool offsets
    b2_ref  : (M2, 1)                  f32
    w1_ref  : (C2, NPOS2_PAD, FC_H)    bf16  fc1 weight (chan, pos, out); padded
                                             position rows are zero
    bfc1_ref: (1, FC_H) f32 ; wfc2_ref: (FC_H, OUT) f32 ; bfc2_ref: (1, OUT) f32
    o_ref   : (1, 1, OUT) f32
    """
    z = jnp.dot(w2_ref[...], p2_ref[0], preferred_element_type=jnp.float32)
    z = jnp.maximum(z + b2_ref[...], 0.0)
    y = z[0:C2]
    for g in range(1, 4):                         # max over the 4 pool offsets
        y = jnp.maximum(y, z[g * C2:(g + 1) * C2])   # (C2, NPOS2_PAD) f32
    yb = y.astype(jnp.bfloat16)

    # fc1: contract over (channel, position). Loop over the 32 channels with
    # one small MXU dot each -- avoids any lane-merging reshape of the
    # flattened features. f32 accumulation.
    acc = jnp.dot(yb[0:1, :], w1_ref[0], preferred_element_type=jnp.float32)
    for c in range(1, C2):
        acc = acc + jnp.dot(yb[c:c + 1, :], w1_ref[c],
                            preferred_element_type=jnp.float32)
    h = jnp.maximum(acc + bfc1_ref[...], 0.0)     # (1, FC_H) f32
    out = jnp.dot(h, wfc2_ref[...], preferred_element_type=jnp.float32)
    o_ref[0] = out + bfc2_ref[...]


# -------------------------------- wrappers -------------------------------------

def conv1_pool(xp, w1e, b1col):
    n = xp.shape[0]
    return pl.pallas_call(
        _conv1_pool_kernel,
        out_shape=jax.ShapeDtypeStruct((n, C1, NPOS1), jnp.bfloat16),
        grid=(n,),
        in_specs=[
            pl.BlockSpec((1, K1_PAD, NPOS1), lambda i: (i, 0, 0)),
            pl.BlockSpec((M1, K1_PAD), lambda i: (0, 0)),
            pl.BlockSpec((M1, 1), lambda i: (0, 0)),
        ],
        out_specs=pl.BlockSpec((1, C1, NPOS1), lambda i: (i, 0, 0)),
        compiler_params=pltpu.CompilerParams(
            dimension_semantics=("parallel",),
            vmem_limit_bytes=16 * 1024 * 1024),
    )(xp, w1e, b1col)


def conv2_pool_fc(p2, w2e, b2col, w1r, bfc1, wfc2, bfc2):
    n = p2.shape[0]
    out = wfc2.shape[1]
    return pl.pallas_call(
        _conv2_pool_fc_kernel,
        out_shape=jax.ShapeDtypeStruct((n, 1, out), jnp.float32),
        grid=(n,),
        in_specs=[
            pl.BlockSpec((1, K2, NPOS2_PAD), lambda i: (i, 0, 0)),
            pl.BlockSpec((M2, K2), lambda i: (0, 0)),
            pl.BlockSpec((M2, 1), lambda i: (0, 0)),
            pl.BlockSpec((C2, NPOS2_PAD, FC_H), lambda i: (0, 0, 0)),
            pl.BlockSpec((1, FC_H), lambda i: (0, 0)),
            pl.BlockSpec((FC_H, out), lambda i: (0, 0)),
            pl.BlockSpec((1, out), lambda i: (0, 0)),
        ],
        out_specs=pl.BlockSpec((1, 1, out), lambda i: (i, 0, 0)),
        compiler_params=pltpu.CompilerParams(
            dimension_semantics=("parallel",),
            vmem_limit_bytes=16 * 1024 * 1024),
    )(p2, w2e, b2col, w1r, bfc1, wfc2, bfc2)


# ----------------------------- parameter prep ----------------------------------

def prepare_params(p):
    """One-time param prep for the Pallas path (offline in a real deployment)."""
    # conv1: embed the 3x3 weight at each of the 9 pool offsets of a 5x5 window.
    # rows = (pool_offset, out_chan) = 144 ; cols = (a, b, cin) = 75 -> pad 128.
    w1t = jnp.transpose(p["w1"], (3, 0, 1, 2))          # (co, ky, kx, ci)
    e1 = jnp.zeros((3, 3, C1, 5, 5, CIN), jnp.float32)
    for py in range(3):
        for px in range(3):
            e1 = e1.at[py, px, :, py:py + 3, px:px + 3, :].set(w1t)
    w1e = e1.reshape(M1, K1)
    w1e = jnp.pad(w1e, ((0, 0), (0, K1_PAD - K1))).astype(jnp.bfloat16)
    b1col = jnp.tile(p["b1"], 9).reshape(M1, 1)

    # conv2: embed the 3x3x16 weight at each of the 4 pool offsets of a 4x4 win.
    w2t = jnp.transpose(p["w2"], (3, 0, 1, 2))          # (co, ky, kx, ci)
    e2 = jnp.zeros((2, 2, C2, 4, 4, C1), jnp.float32)
    for py in range(2):
        for px in range(2):
            e2 = e2.at[py, px, :, py:py + 3, px:px + 3, :].set(w2t)
    w2e = e2.reshape(M2, K2).astype(jnp.bfloat16)
    b2col = jnp.tile(p["b2"], 4).reshape(M2, 1)

    # fc1: PyTorch flattens (C, H, W) -> row = c*240 + h*16 + w == (chan, pos).
    w1r = p["wfc1"].reshape(C2, NPOS2, FC_H)
    w1r = jnp.pad(w1r, ((0, 0), (0, NPOS2_PAD - NPOS2), (0, 0)))  # zero pad rows
    w1r = w1r.astype(jnp.bfloat16)

    return {"w1e": w1e, "b1col": b1col, "w2e": w2e, "b2col": b2col,
            "w1r": w1r, "bfc1": p["bfc1"].reshape(1, FC_H),
            "wfc2": p["wfc2"], "bfc2": p["bfc2"].reshape(1, -1)}


# ------------------------------- forward pass ----------------------------------

@jax.jit
def cnn_forward(x_nchw, kp):
    """Pallas implementation of Cnn.forward (inference; dropouts = identity)."""
    n = x_nchw.shape[0]

    # Stage-1 im2col^T: rows = (a, b, cin) of the widened 5x5 window at stride 3,
    # lanes = pooled conv1 position h*34 + w.  25 cheap strided slices, built
    # directly from NCHW (no input layout transpose needed).
    cols = []
    for a in range(5):
        for b in range(5):
            cols.append(x_nchw[:, :, a:a + 3 * P1H - 2:3, b:b + 3 * P1W - 2:3])
    xp = jnp.stack(cols, axis=1).reshape(n, K1, NPOS1)
    xp = jnp.pad(xp, ((0, 0), (0, K1_PAD - K1), (0, 0))).astype(jnp.bfloat16)

    y1 = conv1_pool(xp, kp["w1e"], kp["b1col"])          # (n, 16, 1088) bf16

    # Stage-2 im2col^T: rows = (dy, dx, cin) of the widened 4x4 window at
    # stride 2 over the pooled conv1 map, lanes = pooled conv2 position.
    y1r = y1.reshape(n, C1, P1H, P1W)
    cols2 = []
    for dy in range(4):
        for dx in range(4):
            cols2.append(y1r[:, :, dy:dy + 2 * P2H - 1:2, dx:dx + 2 * P2W - 1:2])
    p2 = jnp.stack(cols2, axis=1).reshape(n, K2, NPOS2)
    p2 = jnp.pad(p2, ((0, 0), (0, 0), (0, NPOS2_PAD - NPOS2)))   # zero lanes

    out = conv2_pool_fc(p2, kp["w2e"], kp["b2col"], kp["w1r"],
                        kp["bfc1"], kp["wfc2"], kp["bfc2"])      # (n, 1, OUT)
    return out.reshape(n, -1)


# --------------------------- pure-JAX reference ---------------------------------

def _conv_ref(x_nchw, w_hwio, b):
    out = jax.lax.conv_general_dilated(
        x_nchw, w_hwio, (1, 1), "VALID",
        dimension_numbers=("NCHW", "HWIO", "NCHW"))
    return out + b.reshape(1, -1, 1, 1)


def _pool_ref(x_nchw, k):
    return jax.lax.reduce_window(
        x_nchw, -jnp.inf, jax.lax.max, (1, 1, k, k), (1, 1, k, k), "VALID")


def cnn_reference(x, p):
    x = _conv_ref(x, p["w1"], p["b1"])
    x = _pool_ref(jax.nn.relu(x), 3)
    x = _conv_ref(x, p["w2"], p["b2"])
    x = jax.nn.relu(x)
    x = _pool_ref(x, 2)
    x = x.reshape(x.shape[0], -1)              # PyTorch (C,H,W) flatten order
    x = jax.nn.relu(x @ p["wfc1"] + p["bfc1"])
    x = x @ p["wfc2"] + p["bfc2"]
    return x


# ------------------------------------ main --------------------------------------

if __name__ == "__main__":
    channels, output_size = 3, 10
    N = 2

    key = jax.random.PRNGKey(0)
    ks = jax.random.split(key, 9)
    params = {
        "w1": jax.random.normal(ks[0], (3, 3, channels, 16), jnp.float32)
              / jnp.sqrt(9.0 * channels),
        "b1": jax.random.normal(ks[1], (16,), jnp.float32) * 0.01,
        "w2": jax.random.normal(ks[2], (3, 3, 16, 32), jnp.float32)
              / jnp.sqrt(9.0 * 16),
        "b2": jax.random.normal(ks[3], (32,), jnp.float32) * 0.01,
        "wfc1": jax.random.normal(ks[4], (7680, 128), jnp.float32)
                / jnp.sqrt(7680.0),
        "bfc1": jax.random.normal(ks[5], (128,), jnp.float32) * 0.01,
        "wfc2": jax.random.normal(ks[6], (128, output_size), jnp.float32)
                / jnp.sqrt(128.0),
        "bfc2": jax.random.normal(ks[7], (output_size,), jnp.float32) * 0.01,
    }
    x = jax.random.normal(ks[8], (N, channels, H_IN, W_IN), jnp.float32)

    kparams = prepare_params(params)
    out = jax.block_until_ready(cnn_forward(x, kparams))
    ref = jax.block_until_ready(cnn_reference(x, params))

    assert out.shape == (N, output_size), out.shape
    # bf16 matmul operands (f32 accumulation) -> expected ~1e-2 abs/rel error.
    np.testing.assert_allclose(np.asarray(out), np.asarray(ref),
                               rtol=2e-2, atol=2e-2)
    print("KERNEL_OK")
</pallas_src>

<mosaic_0001>
module attributes {stable_mosaic.version = 11 : i64} {
  func.func @_conv1_pool_kernel(%arg0: i32, %arg1: memref<1x128x1088xbf16, #tpu.memory_space<vmem>>, %arg2: memref<144x128xbf16, #tpu.memory_space<vmem>>, %arg3: memref<144x1xf32, #tpu.memory_space<vmem>>, %arg4: memref<1x16x1088xbf16, #tpu.memory_space<vmem>>) attributes {dimension_semantics = [#tpu.dimension_semantics<parallel>], iteration_bounds = array<i64: 2>, scalar_prefetch = 0 : i64, scratch_operands = 0 : i64, tpu.core_type = #tpu.core_type<tc>, window_params = [{transform_indices = @transform_0, window_bounds = array<i64: 1, 128, 1088>}, {pipeline_mode = #tpu.pipeline_mode<synchronous>, transform_indices = @transform_1, window_bounds = array<i64: 144, 128>}, {pipeline_mode = #tpu.pipeline_mode<synchronous>, transform_indices = @transform_2, window_bounds = array<i64: 144, 1>}, {transform_indices = @transform_3, window_bounds = array<i64: 1, 16, 1088>}]} {
    %c0 = arith.constant 0 : index
    %c0_0 = arith.constant 0 : index
    %0 = vector.load %arg2[%c0, %c0_0] : memref<144x128xbf16, #tpu.memory_space<vmem>>, vector<144x128xbf16>
    %c0_1 = arith.constant 0 : index
    %c0_2 = arith.constant 0 : index
    %c0_3 = arith.constant 0 : index
    %1 = vector.load %arg1[%c0_1, %c0_2, %c0_3] : memref<1x128x1088xbf16, #tpu.memory_space<vmem>>, vector<1x128x1088xbf16>
    %2 = vector.shape_cast %1 : vector<1x128x1088xbf16> to vector<128x1088xbf16>
    %cst = arith.constant dense<0.000000e+00> : vector<144x1088xf32>
    %3 = tpu.matmul %0, %2, %cst {dimension_numbers = #tpu.dot_dimension_numbers<[1], [0], [0], [1], [0, 0, 1, 1], [], []>} : vector<144x128xbf16>, vector<128x1088xbf16>, vector<144x1088xf32> -> vector<144x1088xf32>
    %c0_4 = arith.constant 0 : index
    %c0_5 = arith.constant 0 : index
    %4 = vector.load %arg3[%c0_4, %c0_5] : memref<144x1xf32, #tpu.memory_space<vmem>>, vector<144x1xf32>
    %5 = vector.broadcast %4 : vector<144x1xf32> to vector<144x1088xf32>
    %6 = arith.addf %3, %5 : vector<144x1088xf32>
    %cst_6 = arith.constant 0.000000e+00 : f32
    %7 = vector.broadcast %cst_6 : f32 to vector<144x1088xf32>
    %8 = arith.maximumf %6, %7 : vector<144x1088xf32>
    %9 = vector.extract_strided_slice %8 {offsets = [0, 0], sizes = [16, 1088], strides = [1, 1]} : vector<144x1088xf32> to vector<16x1088xf32>
    %10 = vector.extract_strided_slice %8 {offsets = [16, 0], sizes = [16, 1088], strides = [1, 1]} : vector<144x1088xf32> to vector<16x1088xf32>
    %11 = arith.maximumf %9, %10 : vector<16x1088xf32>
    %12 = vector.extract_strided_slice %8 {offsets = [32, 0], sizes = [16, 1088], strides = [1, 1]} : vector<144x1088xf32> to vector<16x1088xf32>
    %13 = arith.maximumf %11, %12 : vector<16x1088xf32>
    %14 = vector.extract_strided_slice %8 {offsets = [48, 0], sizes = [16, 1088], strides = [1, 1]} : vector<144x1088xf32> to vector<16x1088xf32>
    %15 = arith.maximumf %13, %14 : vector<16x1088xf32>
    %16 = vector.extract_strided_slice %8 {offsets = [64, 0], sizes = [16, 1088], strides = [1, 1]} : vector<144x1088xf32> to vector<16x1088xf32>
    %17 = arith.maximumf %15, %16 : vector<16x1088xf32>
    %18 = vector.extract_strided_slice %8 {offsets = [80, 0], sizes = [16, 1088], strides = [1, 1]} : vector<144x1088xf32> to vector<16x1088xf32>
    %19 = arith.maximumf %17, %18 : vector<16x1088xf32>
    %20 = vector.extract_strided_slice %8 {offsets = [96, 0], sizes = [16, 1088], strides = [1, 1]} : vector<144x1088xf32> to vector<16x1088xf32>
    %21 = arith.maximumf %19, %20 : vector<16x1088xf32>
    %22 = vector.extract_strided_slice %8 {offsets = [112, 0], sizes = [16, 1088], strides = [1, 1]} : vector<144x1088xf32> to vector<16x1088xf32>
    %23 = arith.maximumf %21, %22 : vector<16x1088xf32>
    %24 = vector.extract_strided_slice %8 {offsets = [128, 0], sizes = [16, 1088], strides = [1, 1]} : vector<144x1088xf32> to vector<16x1088xf32>
    %25 = arith.maximumf %23, %24 : vector<16x1088xf32>
    %26 = arith.truncf %25 : vector<16x1088xf32> to vector<16x1088xbf16>
    %c0_7 = arith.constant 0 : index
    %c0_8 = arith.constant 0 : index
    %c0_9 = arith.constant 0 : index
    %27 = vector.load %arg4[%c0_7, %c0_8, %c0_9] : memref<1x16x1088xbf16, #tpu.memory_space<vmem>>, vector<1x16x1088xbf16>
    %28 = vector.shape_cast %27 : vector<1x16x1088xbf16> to vector<16x1088xbf16>
    %29 = vector.shape_cast %26 : vector<16x1088xbf16> to vector<1x16x1088xbf16>
    tpu.vector_store %arg4[%c0_7, %c0_8, %c0_9], %29 {strides = array<i32>} : memref<1x16x1088xbf16, #tpu.memory_space<vmem>>, vector<1x16x1088xbf16>,
    return
  }
  func.func @transform_0(%arg0: i32) -> (i32, i32, i32) {
    %c0_i32 = arith.constant 0 : i32
    %c0_i32_0 = arith.constant 0 : i32
    %c0_i32_1 = arith.constant 0 : i32
    return %arg0, %c0_i32, %c0_i32_0 : i32, i32, i32
  }
  func.func @transform_1(%arg0: i32) -> (i32, i32) {
    %c0_i32 = arith.constant 0 : i32
    %c0_i32_0 = arith.constant 0 : i32
    %c0_i32_1 = arith.constant 0 : i32
    return %c0_i32, %c0_i32_0 : i32, i32
  }
  func.func @transform_2(%arg0: i32) -> (i32, i32) {
    %c0_i32 = arith.constant 0 : i32
    %c0_i32_0 = arith.constant 0 : i32
    %c0_i32_1 = arith.constant 0 : i32
    return %c0_i32, %c0_i32_0 : i32, i32
  }
  func.func @transform_3(%arg0: i32) -> (i32, i32, i32) {
    %c0_i32 = arith.constant 0 : i32
    %c0_i32_0 = arith.constant 0 : i32
    %c0_i32_1 = arith.constant 0 : i32
    return %arg0, %c0_i32, %c0_i32_0 : i32, i32, i32
  }
}

module attributes {stable_mosaic.version = 11 : i64} {
  func.func @_conv2_pool_fc_kernel(%arg0: i32, %arg1: memref<1x256x256xbf16, #tpu.memory_space<vmem>>, %arg2: memref<128x256xbf16, #tpu.memory_space<vmem>>, %arg3: memref<128x1xf32, #tpu.memory_space<vmem>>, %arg4: memref<32x256x128xbf16, #tpu.memory_space<vmem>>, %arg5: memref<1x128xf32, #tpu.memory_space<vmem>>, %arg6: memref<128x10xf32, #tpu.memory_space<vmem>>, %arg7: memref<1x10xf32, #tpu.memory_space<vmem>>, %arg8: memref<1x1x10xf32, #tpu.memory_space<vmem>>) attributes {dimension_semantics = [#tpu.dimension_semantics<parallel>], iteration_bounds = array<i64: 2>, scalar_prefetch = 0 : i64, scratch_operands = 0 : i64, tpu.core_type = #tpu.core_type<tc>, window_params = [{transform_indices = @transform_0, window_bounds = array<i64: 1, 256, 256>}, {pipeline_mode = #tpu.pipeline_mode<synchronous>, transform_indices = @transform_1, window_bounds = array<i64: 128, 256>}, {pipeline_mode = #tpu.pipeline_mode<synchronous>, transform_indices = @transform_2, window_bounds = array<i64: 128, 1>}, {pipeline_mode = #tpu.pipeline_mode<synchronous>, transform_indices = @transform_3, window_bounds = array<i64: 32, 256, 128>}, {pipeline_mode = #tpu.pipeline_mode<synchronous>, transform_indices = @transform_4, window_bounds = array<i64: 1, 128>}, {pipeline_mode = #tpu.pipeline_mode<synchronous>, transform_indices = @transform_5, window_bounds = array<i64: 128, 10>}, {pipeline_mode = #tpu.pipeline_mode<synchronous>, transform_indices = @transform_6, window_bounds = array<i64: 1, 10>}, {transform_indices = @transform_7, window_bounds = array<i64: 1, 1, 10>}]} {
    %c0 = arith.constant 0 : index
    %c0_0 = arith.constant 0 : index
    %0 = vector.load %arg2[%c0, %c0_0] : memref<128x256xbf16, #tpu.memory_space<vmem>>, vector<128x256xbf16>
    %c0_1 = arith.constant 0 : index
    %c0_2 = arith.constant 0 : index
    %c0_3 = arith.constant 0 : index
    %1 = vector.load %arg1[%c0_1, %c0_2, %c0_3] : memref<1x256x256xbf16, #tpu.memory_space<vmem>>, vector<1x256x256xbf16>
    %2 = vector.shape_cast %1 : vector<1x256x256xbf16> to vector<256x256xbf16>
    %cst = arith.constant dense<0.000000e+00> : vector<128x256xf32>
    %3 = tpu.matmul %0, %2, %cst {dimension_numbers = #tpu.dot_dimension_numbers<[1], [0], [0], [1], [0, 0, 1, 1], [], []>} : vector<128x256xbf16>, vector<256x256xbf16>, vector<128x256xf32> -> vector<128x256xf32>
    %c0_4 = arith.constant 0 : index
    %c0_5 = arith.constant 0 : index
    %4 = vector.load %arg3[%c0_4, %c0_5] : memref<128x1xf32, #tpu.memory_space<vmem>>, vector<128x1xf32>
    %5 = vector.broadcast %4 : vector<128x1xf32> to vector<128x256xf32>
    %6 = arith.addf %3, %5 : vector<128x256xf32>
    %cst_6 = arith.constant 0.000000e+00 : f32
    %7 = vector.broadcast %cst_6 : f32 to vector<128x256xf32>
    %8 = arith.maximumf %6, %7 : vector<128x256xf32>
    %9 = vector.extract_strided_slice %8 {offsets = [0, 0], sizes = [32, 256], strides = [1, 1]} : vector<128x256xf32> to vector<32x256xf32>
    %10 = vector.extract_strided_slice %8 {offsets = [32, 0], sizes = [32, 256], strides = [1, 1]} : vector<128x256xf32> to vector<32x256xf32>
    %11 = arith.maximumf %9, %10 : vector<32x256xf32>
    %12 = vector.extract_strided_slice %8 {offsets = [64, 0], sizes = [32, 256], strides = [1, 1]} : vector<128x256xf32> to vector<32x256xf32>
    %13 = arith.maximumf %11, %12 : vector<32x256xf32>
    %14 = vector.extract_strided_slice %8 {offsets = [96, 0], sizes = [32, 256], strides = [1, 1]} : vector<128x256xf32> to vector<32x256xf32>
    %15 = arith.maximumf %13, %14 : vector<32x256xf32>
    %16 = arith.truncf %15 : vector<32x256xf32> to vector<32x256xbf16>
    %17 = vector.extract_strided_slice %16 {offsets = [0, 0], sizes = [1, 256], strides = [1, 1]} : vector<32x256xbf16> to vector<1x256xbf16>
    %c0_7 = arith.constant 0 : index
    %c0_8 = arith.constant 0 : index
    %c0_9 = arith.constant 0 : index
    %18 = vector.load %arg4[%c0_7, %c0_8, %c0_9] : memref<32x256x128xbf16, #tpu.memory_space<vmem>>, vector<1x256x128xbf16>
    %19 = vector.shape_cast %18 : vector<1x256x128xbf16> to vector<256x128xbf16>
    %cst_10 = arith.constant dense<0.000000e+00> : vector<1x128xf32>
    %20 = tpu.matmul %17, %19, %cst_10 {dimension_numbers = #tpu.dot_dimension_numbers<[1], [0], [0], [1], [0, 0, 1, 1], [], []>} : vector<1x256xbf16>, vector<256x128xbf16>, vector<1x128xf32> -> vector<1x128xf32>
    %21 = vector.extract_strided_slice %16 {offsets = [1, 0], sizes = [1, 256], strides = [1, 1]} : vector<32x256xbf16> to vector<1x256xbf16>
    %c1 = arith.constant 1 : index
    %c0_11 = arith.constant 0 : index
    %c0_12 = arith.constant 0 : index
    %22 = vector.load %arg4[%c1, %c0_11, %c0_12] : memref<32x256x128xbf16, #tpu.memory_space<vmem>>, vector<1x256x128xbf16>
    %23 = vector.shape_cast %22 : vector<1x256x128xbf16> to vector<256x128xbf16>
    %cst_13 = arith.constant dense<0.000000e+00> : vector<1x128xf32>
    %24 = tpu.matmul %21, %23, %cst_13 {dimension_numbers = #tpu.dot_dimension_numbers<[1], [0], [0], [1], [0, 0, 1, 1], [], []>} : vector<1x256xbf16>, vector<256x128xbf16>, vector<1x128xf32> -> vector<1x128xf32>
    %25 = arith.addf %20, %24 : vector<1x128xf32>
    %26 = vector.extract_strided_slice %16 {offsets = [2, 0], sizes = [1, 256], strides = [1, 1]} : vector<32x256xbf16> to vector<1x256xbf16>
    %c2 = arith.constant 2 : index
    %c0_14 = arith.constant 0 : index
    %c0_15 = arith.constant 0 : index
    %27 = vector.load %arg4[%c2, %c0_14, %c0_15] : memref<32x256x128xbf16, #tpu.memory_space<vmem>>, vector<1x256x128xbf16>
    %28 = vector.shape_cast %27 : vector<1x256x128xbf16> to vector<256x128xbf16>
    %cst_16 = arith.constant dense<0.000000e+00> : vector<1x128xf32>
    %29 = tpu.matmul %26, %28, %cst_16 {dimension_numbers = #tpu.dot_dimension_numbers<[1], [0], [0], [1], [0, 0, 1, 1], [], []>} : vector<1x256xbf16>, vector<256x128xbf16>, vector<1x128xf32> -> vector<1x128xf32>
    %30 = arith.addf %25, %29 : vector<1x128xf32>
    %31 = vector.extract_strided_slice %16 {offsets = [3, 0], sizes = [1, 256], strides = [1, 1]} : vector<32x256xbf16> to vector<1x256xbf16>
    %c3 = arith.constant 3 : index
    %c0_17 = arith.constant 0 : index
    %c0_18 = arith.constant 0 : index
    %32 = vector.load %arg4[%c3, %c0_17, %c0_18] : memref<32x256x128xbf16, #tpu.memory_space<vmem>>, vector<1x256x128xbf16>
    %33 = vector.shape_cast %32 : vector<1x256x128xbf16> to vector<256x128xbf16>
    %cst_19 = arith.constant dense<0.000000e+00> : vector<1x128xf32>
    %34 = tpu.matmul %31, %33, %cst_19 {dimension_numbers = #tpu.dot_dimension_numbers<[1], [0], [0], [1], [0, 0, 1, 1], [], []>} : vector<1x256xbf16>, vector<256x128xbf16>, vector<1x128xf32> -> vector<1x128xf32>
    %35 = arith.addf %30, %34 : vector<1x128xf32>
    %36 = vector.extract_strided_slice %16 {offsets = [4, 0], sizes = [1, 256], strides = [1, 1]} : vector<32x256xbf16> to vector<1x256xbf16>
    %c4 = arith.constant 4 : index
    %c0_20 = arith.constant 0 : index
    %c0_21 = arith.constant 0 : index
    %37 = vector.load %arg4[%c4, %c0_20, %c0_21] : memref<32x256x128xbf16, #tpu.memory_space<vmem>>, vector<1x256x128xbf16>
    %38 = vector.shape_cast %37 : vector<1x256x128xbf16> to vector<256x128xbf16>
    %cst_22 = arith.constant dense<0.000000e+00> : vector<1x128xf32>
    %39 = tpu.matmul %36, %38, %cst_22 {dimension_numbers = #tpu.dot_dimension_numbers<[1], [0], [0], [1], [0, 0, 1, 1], [], []>} : vector<1x256xbf16>, vector<256x128xbf16>, vector<1x128xf32> -> vector<1x128xf32>
    %40 = arith.addf %35, %39 : vector<1x128xf32>
    %41 = vector.extract_strided_slice %16 {offsets = [5, 0], sizes = [1, 256], strides = [1, 1]} : vector<32x256xbf16> to vector<1x256xbf16>
    %c5 = arith.constant 5 : index
    %c0_23 = arith.constant 0 : index
    %c0_24 = arith.constant 0 : index
    %42 = vector.load %arg4[%c5, %c0_23, %c0_24] : memref<32x256x128xbf16, #tpu.memory_space<vmem>>, vector<1x256x128xbf16>
    %43 = vector.shape_cast %42 : vector<1x256x128xbf16> to vector<256x128xbf16>
    %cst_25 = arith.constant dense<0.000000e+00> : vector<1x128xf32>
    %44 = tpu.matmul %41, %43, %cst_25 {dimension_numbers = #tpu.dot_dimension_numbers<[1], [0], [0], [1], [0, 0, 1, 1], [], []>} : vector<1x256xbf16>, vector<256x128xbf16>, vector<1x128xf32> -> vector<1x128xf32>
    %45 = arith.addf %40, %44 : vector<1x128xf32>
    %46 = vector.extract_strided_slice %16 {offsets = [6, 0], sizes = [1, 256], strides = [1, 1]} : vector<32x256xbf16> to vector<1x256xbf16>
    %c6 = arith.constant 6 : index
    %c0_26 = arith.constant 0 : index
    %c0_27 = arith.constant 0 : index
    %47 = vector.load %arg4[%c6, %c0_26, %c0_27] : memref<32x256x128xbf16, #tpu.memory_space<vmem>>, vector<1x256x128xbf16>
    %48 = vector.shape_cast %47 : vector<1x256x128xbf16> to vector<256x128xbf16>
    %cst_28 = arith.constant dense<0.000000e+00> : vector<1x128xf32>
    %49 = tpu.matmul %46, %48, %cst_28 {dimension_numbers = #tpu.dot_dimension_numbers<[1], [0], [0], [1], [0, 0, 1, 1], [], []>} : vector<1x256xbf16>, vector<256x128xbf16>, vector<1x128xf32> -> vector<1x128xf32>
    %50 = arith.addf %45, %49 : vector<1x128xf32>
    %51 = vector.extract_strided_slice %16 {offsets = [7, 0], sizes = [1, 256], strides = [1, 1]} : vector<32x256xbf16> to vector<1x256xbf16>
    %c7 = arith.constant 7 : index
    %c0_29 = arith.constant 0 : index
    %c0_30 = arith.constant 0 : index
    %52 = vector.load %arg4[%c7, %c0_29, %c0_30] : memref<32x256x128xbf16, #tpu.memory_space<vmem>>, vector<1x256x128xbf16>
    %53 = vector.shape_cast %52 : vector<1x256x128xbf16> to vector<256x128xbf16>
    %cst_31 = arith.constant dense<0.000000e+00> : vector<1x128xf32>
    %54 = tpu.matmul %51, %53, %cst_31 {dimension_numbers = #tpu.dot_dimension_numbers<[1], [0], [0], [1], [0, 0, 1, 1], [], []>} : vector<1x256xbf16>, vector<256x128xbf16>, vector<1x128xf32> -> vector<1x128xf32>
    %55 = arith.addf %50, %54 : vector<1x128xf32>
    %56 = vector.extract_strided_slice %16 {offsets = [8, 0], sizes = [1, 256], strides = [1, 1]} : vector<32x256xbf16> to vector<1x256xbf16>
    %c8 = arith.constant 8 : index
    %c0_32 = arith.constant 0 : index
    %c0_33 = arith.constant 0 : index
    %57 = vector.load %arg4[%c8, %c0_32, %c0_33] : memref<32x256x128xbf16, #tpu.memory_space<vmem>>, vector<1x256x128xbf16>
    %58 = vector.shape_cast %57 : vector<1x256x128xbf16> to vector<256x128xbf16>
    %cst_34 = arith.constant dense<0.000000e+00> : vector<1x128xf32>
    %59 = tpu.matmul %56, %58, %cst_34 {dimension_numbers = #tpu.dot_dimension_numbers<[1], [0], [0], [1], [0, 0, 1, 1], [], []>} : vector<1x256xbf16>, vector<256x128xbf16>, vector<1x128xf32> -> vector<1x128xf32>
    %60 = arith.addf %55, %59 : vector<1x128xf32>
    %61 = vector.extract_strided_slice %16 {offsets = [9, 0], sizes = [1, 256], strides = [1, 1]} : vector<32x256xbf16> to vector<1x256xbf16>
    %c9 = arith.constant 9 : index
    %c0_35 = arith.constant 0 : index
    %c0_36 = arith.constant 0 : index
    %62 = vector.load %arg4[%c9, %c0_35, %c0_36] : memref<32x256x128xbf16, #tpu.memory_space<vmem>>, vector<1x256x128xbf16>
    %63 = vector.shape_cast %62 : vector<1x256x128xbf16> to vector<256x128xbf16>
    %cst_37 = arith.constant dense<0.000000e+00> : vector<1x128xf32>
    %64 = tpu.matmul %61, %63, %cst_37 {dimension_numbers = #tpu.dot_dimension_numbers<[1], [0], [0], [1], [0, 0, 1, 1], [], []>} : vector<1x256xbf16>, vector<256x128xbf16>, vector<1x128xf32> -> vector<1x128xf32>
    %65 = arith.addf %60, %64 : vector<1x128xf32>
    %66 = vector.extract_strided_slice %16 {offsets = [10, 0], sizes = [1, 256], strides = [1, 1]} : vector<32x256xbf16> to vector<1x256xbf16>
    %c10 = arith.constant 10 : index
    %c0_38 = arith.constant 0 : index
    %c0_39 = arith.constant 0 : index
    %67 = vector.load %arg4[%c10, %c0_38, %c0_39] : memref<32x256x128xbf16, #tpu.memory_space<vmem>>, vector<1x256x128xbf16>
    %68 = vector.shape_cast %67 : vector<1x256x128xbf16> to vector<256x128xbf16>
    %cst_40 = arith.constant dense<0.000000e+00> : vector<1x128xf32>
    %69 = tpu.matmul %66, %68, %cst_40 {dimension_numbers = #tpu.dot_dimension_numbers<[1], [0], [0], [1], [0, 0, 1, 1], [], []>} : vector<1x256xbf16>, vector<256x128xbf16>, vector<1x128xf32> -> vector<1x128xf32>
    %70 = arith.addf %65, %69 : vector<1x128xf32>
    %71 = vector.extract_strided_slice %16 {offsets = [11, 0], sizes = [1, 256], strides = [1, 1]} : vector<32x256xbf16> to vector<1x256xbf16>
    %c11 = arith.constant 11 : index
    %c0_41 = arith.constant 0 : index
    %c0_42 = arith.constant 0 : index
    %72 = vector.load %arg4[%c11, %c0_41, %c0_42] : memref<32x256x128xbf16, #tpu.memory_space<vmem>>, vector<1x256x128xbf16>
    %73 = vector.shape_cast %72 : vector<1x256x128xbf16> to vector<256x128xbf16>
    %cst_43 = arith.constant dense<0.000000e+00> : vector<1x128xf32>
    %74 = tpu.matmul %71, %73, %cst_43 {dimension_numbers = #tpu.dot_dimension_numbers<[1], [0], [0], [1], [0, 0, 1, 1], [], []>} : vector<1x256xbf16>, vector<256x128xbf16>, vector<1x128xf32> -> vector<1x128xf32>
    %75 = arith.addf %70, %74 : vector<1x128xf32>
    %76 = vector.extract_strided_slice %16 {offsets = [12, 0], sizes = [1, 256], strides = [1, 1]} : vector<32x256xbf16> to vector<1x256xbf16>
    %c12 = arith.constant 12 : index
    %c0_44 = arith.constant 0 : index
    %c0_45 = arith.constant 0 : index
    %77 = vector.load %arg4[%c12, %c0_44, %c0_45] : memref<32x256x128xbf16, #tpu.memory_space<vmem>>, vector<1x256x128xbf16>
    %78 = vector.shape_cast %77 : vector<1x256x128xbf16> to vector<256x128xbf16>
    %cst_46 = arith.constant dense<0.000000e+00> : vector<1x128xf32>
    %79 = tpu.matmul %76, %78, %cst_46 {dimension_numbers = #tpu.dot_dimension_numbers<[1], [0], [0], [1], [0, 0, 1, 1], [], []>} : vector<1x256xbf16>, vector<256x128xbf16>, vector<1x128xf32> -> vector<1x128xf32>
    %80 = arith.addf %75, %79 : vector<1x128xf32>
    %81 = vector.extract_strided_slice %16 {offsets = [13, 0], sizes = [1, 256], strides = [1, 1]} : vector<32x256xbf16> to vector<1x256xbf16>
    %c13 = arith.constant 13 : index
    %c0_47 = arith.constant 0 : index
    %c0_48 = arith.constant 0 : index
    %82 = vector.load %arg4[%c13, %c0_47, %c0_48] : memref<32x256x128xbf16, #tpu.memory_space<vmem>>, vector<1x256x128xbf16>
    %83 = vector.shape_cast %82 : vector<1x256x128xbf16> to vector<256x128xbf16>
    %cst_49 = arith.constant dense<0.000000e+00> : vector<1x128xf32>
    %84 = tpu.matmul %81, %83, %cst_49 {dimension_numbers = #tpu.dot_dimension_numbers<[1], [0], [0], [1], [0, 0, 1, 1], [], []>} : vector<1x256xbf16>, vector<256x128xbf16>, vector<1x128xf32> -> vector<1x128xf32>
    %85 = arith.addf %80, %84 : vector<1x128xf32>
    %86 = vector.extract_strided_slice %16 {offsets = [14, 0], sizes = [1, 256], strides = [1, 1]} : vector<32x256xbf16> to vector<1x256xbf16>
    %c14 = arith.constant 14 : index
    %c0_50 = arith.constant 0 : index
    %c0_51 = arith.constant 0 : index
    %87 = vector.load %arg4[%c14, %c0_50, %c0_51] : memref<32x256x128xbf16, #tpu.memory_space<vmem>>, vector<1x256x128xbf16>
    %88 = vector.shape_cast %87 : vector<1x256x128xbf16> to vector<256x128xbf16>
    %cst_52 = arith.constant dense<0.000000e+00> : vector<1x128xf32>
    %89 = tpu.matmul %86, %88, %cst_52 {dimension_numbers = #tpu.dot_dimension_numbers<[1], [0], [0], [1], [0, 0, 1, 1], [], []>} : vector<1x256xbf16>, vector<256x128xbf16>, vector<1x128xf32> -> vector<1x128xf32>
    %90 = arith.addf %85, %89 : vector<1x128xf32>
    %91 = vector.extract_strided_slice %16 {offsets = [15, 0], sizes = [1, 256], strides = [1, 1]} : vector<32x256xbf16> to vector<1x256xbf16>
    %c15 = arith.constant 15 : index
    %c0_53 = arith.constant 0 : index
    %c0_54 = arith.constant 0 : index
    %92 = vector.load %arg4[%c15, %c0_53, %c0_54] : memref<32x256x128xbf16, #tpu.memory_space<vmem>>, vector<1x256x128xbf16>
    %93 = vector.shape_cast %92 : vector<1x256x128xbf16> to vector<256x128xbf16>
    %cst_55 = arith.constant dense<0.000000e+00> : vector<1x128xf32>
    %94 = tpu.matmul %91, %93, %cst_55 {dimension_numbers = #tpu.dot_dimension_numbers<[1], [0], [0], [1], [0, 0, 1, 1], [], []>} : vector<1x256xbf16>, vector<256x128xbf16>, vector<1x128xf32> -> vector<1x128xf32>
    %95 = arith.addf %90, %94 : vector<1x128xf32>
    %96 = vector.extract_strided_slice %16 {offsets = [16, 0], sizes = [1, 256], strides = [1, 1]} : vector<32x256xbf16> to vector<1x256xbf16>
    %c16 = arith.constant 16 : index
    %c0_56 = arith.constant 0 : index
    %c0_57 = arith.constant 0 : index
    %97 = vector.load %arg4[%c16, %c0_56, %c0_57] : memref<32x256x128xbf16, #tpu.memory_space<vmem>>, vector<1x256x128xbf16>
    %98 = vector.shape_cast %97 : vector<1x256x128xbf16> to vector<256x128xbf16>
    %cst_58 = arith.constant dense<0.000000e+00> : vector<1x128xf32>
    %99 = tpu.matmul %96, %98, %cst_58 {dimension_numbers = #tpu.dot_dimension_numbers<[1], [0], [0], [1], [0, 0, 1, 1], [], []>} : vector<1x256xbf16>, vector<256x128xbf16>, vector<1x128xf32> -> vector<1x128xf32>
    %100 = arith.addf %95, %99 : vector<1x128xf32>
    %101 = vector.extract_strided_slice %16 {offsets = [17, 0], sizes = [1, 256], strides = [1, 1]} : vector<32x256xbf16> to vector<1x256xbf16>
    %c17 = arith.constant 17 : index
    %c0_59 = arith.constant 0 : index
    %c0_60 = arith.constant 0 : index
    %102 = vector.load %arg4[%c17, %c0_59, %c0_60] : memref<32x256x128xbf16, #tpu.memory_space<vmem>>, vector<1x256x128xbf16>
    %103 = vector.shape_cast %102 : vector<1x256x128xbf16> to vector<256x128xbf16>
    %cst_61 = arith.constant dense<0.000000e+00> : vector<1x128xf32>
    %104 = tpu.matmul %101, %103, %cst_61 {dimension_numbers = #tpu.dot_dimension_numbers<[1], [0], [0], [1], [0, 0, 1, 1], [], []>} : vector<1x256xbf16>, vector<256x128xbf16>, vector<1x128xf32> -> vector<1x128xf32>
    %105 = arith.addf %100, %104 : vector<1x128xf32>
    %106 = vector.extract_strided_slice %16 {offsets = [18, 0], sizes = [1, 256], strides = [1, 1]} : vector<32x256xbf16> to vector<1x256xbf16>
    %c18 = arith.constant 18 : index
    %c0_62 = arith.constant 0 : index
    %c0_63 = arith.constant 0 : index
    %107 = vector.load %arg4[%c18, %c0_62, %c0_63] : memref<32x256x128xbf16, #tpu.memory_space<vmem>>, vector<1x256x128xbf16>
    %108 = vector.shape_cast %107 : vector<1x256x128xbf16> to vector<256x128xbf16>
    %cst_64 = arith.constant dense<0.000000e+00> : vector<1x128xf32>
    %109 = tpu.matmul %106, %108, %cst_64 {dimension_numbers = #tpu.dot_dimension_numbers<[1], [0], [0], [1], [0, 0, 1, 1], [], []>} : vector<1x256xbf16>, vector<256x128xbf16>, vector<1x128xf32> -> vector<1x128xf32>
    %110 = arith.addf %105, %109 : vector<1x128xf32>
    %111 = vector.extract_strided_slice %16 {offsets = [19, 0], sizes = [1, 256], strides = [1, 1]} : vector<32x256xbf16> to vector<1x256xbf16>
    %c19 = arith.constant 19 : index
    %c0_65 = arith.constant 0 : index
    %c0_66 = arith.constant 0 : index
    %112 = vector.load %arg4[%c19, %c0_65, %c0_66] : memref<32x256x128xbf16, #tpu.memory_space<vmem>>, vector<1x256x128xbf16>
    %113 = vector.shape_cast %112 : vector<1x256x128xbf16> to vector<256x128xbf16>
    %cst_67 = arith.constant dense<0.000000e+00> : vector<1x128xf32>
    %114 = tpu.matmul %111, %113, %cst_67 {dimension_numbers = #tpu.dot_dimension_numbers<[1], [0], [0], [1], [0, 0, 1, 1], [], []>} : vector<1x256xbf16>, vector<256x128xbf16>, vector<1x128xf32> -> vector<1x128xf32>
    %115 = arith.addf %110, %114 : vector<1x128xf32>
    %116 = vector.extract_strided_slice %16 {offsets = [20, 0], sizes = [1, 256], strides = [1, 1]} : vector<32x256xbf16> to vector<1x256xbf16>
    %c20 = arith.constant 20 : index
    %c0_68 = arith.constant 0 : index
    %c0_69 = arith.constant 0 : index
    %117 = vector.load %arg4[%c20, %c0_68, %c0_69] : memref<32x256x128xbf16, #tpu.memory_space<vmem>>, vector<1x256x128xbf16>
    %118 = vector.shape_cast %117 : vector<1x256x128xbf16> to vector<256x128xbf16>
    %cst_70 = arith.constant dense<0.000000e+00> : vector<1x128xf32>
    %119 = tpu.matmul %116, %118, %cst_70 {dimension_numbers = #tpu.dot_dimension_numbers<[1], [0], [0], [1], [0, 0, 1, 1], [], []>} : vector<1x256xbf16>, vector<256x128xbf16>, vector<1x128xf32> -> vector<1x128xf32>
    %120 = arith.addf %115, %119 : vector<1x128xf32>
    %121 = vector.extract_strided_slice %16 {offsets = [21, 0], sizes = [1, 256], strides = [1, 1]} : vector<32x256xbf16> to vector<1x256xbf16>
    %c21 = arith.constant 21 : index
    %c0_71 = arith.constant 0 : index
    %c0_72 = arith.constant 0 : index
    %122 = vector.load %arg4[%c21, %c0_71, %c0_72] : memref<32x256x128xbf16, #tpu.memory_space<vmem>>, vector<1x256x128xbf16>
    %123 = vector.shape_cast %122 : vector<1x256x128xbf16> to vector<256x128xbf16>
    %cst_73 = arith.constant dense<0.000000e+00> : vector<1x128xf32>
    %124 = tpu.matmul %121, %123, %cst_73 {dimension_numbers = #tpu.dot_dimension_numbers<[1], [0], [0], [1], [0, 0, 1, 1], [], []>} : vector<1x256xbf16>, vector<256x128xbf16>, vector<1x128xf32> -> vector<1x128xf32>
    %125 = arith.addf %120, %124 : vector<1x128xf32>
    %126 = vector.extract_strided_slice %16 {offsets = [22, 0], sizes = [1, 256], strides = [1, 1]} : vector<32x256xbf16> to vector<1x256xbf16>
    %c22 = arith.constant 22 : index
    %c0_74 = arith.constant 0 : index
    %c0_75 = arith.constant 0 : index
    %127 = vector.load %arg4[%c22, %c0_74, %c0_75] : memref<32x256x128xbf16, #tpu.memory_space<vmem>>, vector<1x256x128xbf16>
    %128 = vector.shape_cast %127 : vector<1x256x128xbf16> to vector<256x128xbf16>
    %cst_76 = arith.constant dense<0.000000e+00> : vector<1x128xf32>
    %129 = tpu.matmul %126, %128, %cst_76 {dimension_numbers = #tpu.dot_dimension_numbers<[1], [0], [0], [1], [0, 0, 1, 1], [], []>} : vector<1x256xbf16>, vector<256x128xbf16>, vector<1x128xf32> -> vector<1x128xf32>
    %130 = arith.addf %125, %129 : vector<1x128xf32>
    %131 = vector.extract_strided_slice %16 {offsets = [23, 0], sizes = [1, 256], strides = [1, 1]} : vector<32x256xbf16> to vector<1x256xbf16>
    %c23 = arith.constant 23 : index
    %c0_77 = arith.constant 0 : index
    %c0_78 = arith.constant 0 : index
    %132 = vector.load %arg4[%c23, %c0_77, %c0_78] : memref<32x256x128xbf16, #tpu.memory_space<vmem>>, vector<1x256x128xbf16>
    %133 = vector.shape_cast %132 : vector<1x256x128xbf16> to vector<256x128xbf16>
    %cst_79 = arith.constant dense<0.000000e+00> : vector<1x128xf32>
    %134 = tpu.matmul %131, %133, %cst_79 {dimension_numbers = #tpu.dot_dimension_numbers<[1], [0], [0], [1], [0, 0, 1, 1], [], []>} : vector<1x256xbf16>, vector<256x128xbf16>, vector<1x128xf32> -> vector<1x128xf32>
    %135 = arith.addf %130, %134 : vector<1x128xf32>
    %136 = vector.extract_strided_slice %16 {offsets = [24, 0], sizes = [1, 256], strides = [1, 1]} : vector<32x256xbf16> to vector<1x256xbf16>
    %c24 = arith.constant 24 : index
    %c0_80 = arith.constant 0 : index
    %c0_81 = arith.constant 0 : index
    %137 = vector.load %arg4[%c24, %c0_80, %c0_81] : memref<32x256x128xbf16, #tpu.memory_space<vmem>>, vector<1x256x128xbf16>
    %138 = vector.shape_cast %137 : vector<1x256x128xbf16> to vector<256x128xbf16>
    %cst_82 = arith.constant dense<0.000000e+00> : vector<1x128xf32>
    %139 = tpu.matmul %136, %138, %cst_82 {dimension_numbers = #tpu.dot_dimension_numbers<[1], [0], [0], [1], [0, 0, 1, 1], [], []>} : vector<1x256xbf16>, vector<256x128xbf16>, vector<1x128xf32> -> vector<1x128xf32>
    %140 = arith.addf %135, %139 : vector<1x128xf32>
    %141 = vector.extract_strided_slice %16 {offsets = [25, 0], sizes = [1, 256], strides = [1, 1]} : vector<32x256xbf16> to vector<1x256xbf16>
    %c25 = arith.constant 25 : index
    %c0_83 = arith.constant 0 : index
    %c0_84 = arith.constant 0 : index
    %142 = vector.load %arg4[%c25, %c0_83, %c0_84] : memref<32x256x128xbf16, #tpu.memory_space<vmem>>, vector<1x256x128xbf16>
    %143 = vector.shape_cast %142 : vector<1x256x128xbf16> to vector<256x128xbf16>
    %cst_85 = arith.constant dense<0.000000e+00> : vector<1x128xf32>
    %144 = tpu.matmul %141, %143, %cst_85 {dimension_numbers = #tpu.dot_dimension_numbers<[1], [0], [0], [1], [0, 0, 1, 1], [], []>} : vector<1x256xbf16>, vector<256x128xbf16>, vector<1x128xf32> -> vector<1x128xf32>
    %145 = arith.addf %140, %144 : vector<1x128xf32>
    %146 = vector.extract_strided_slice %16 {offsets = [26, 0], sizes = [1, 256], strides = [1, 1]} : vector<32x256xbf16> to vector<1x256xbf16>
    %c26 = arith.constant 26 : index
    %c0_86 = arith.constant 0 : index
    %c0_87 = arith.constant 0 : index
    %147 = vector.load %arg4[%c26, %c0_86, %c0_87] : memref<32x256x128xbf16, #tpu.memory_space<vmem>>, vector<1x256x128xbf16>
    %148 = vector.shape_cast %147 : vector<1x256x128xbf16> to vector<256x128xbf16>
    %cst_88 = arith.constant dense<0.000000e+00> : vector<1x128xf32>
    %149 = tpu.matmul %146, %148, %cst_88 {dimension_numbers = #tpu.dot_dimension_numbers<[1], [0], [0], [1], [0, 0, 1, 1], [], []>} : vector<1x256xbf16>, vector<256x128xbf16>, vector<1x128xf32> -> vector<1x128xf32>
    %150 = arith.addf %145, %149 : vector<1x128xf32>
    %151 = vector.extract_strided_slice %16 {offsets = [27, 0], sizes = [1, 256], strides = [1, 1]} : vector<32x256xbf16> to vector<1x256xbf16>
    %c27 = arith.constant 27 : index
    %c0_89 = arith.constant 0 : index
    %c0_90 = arith.constant 0 : index
    %152 = vector.load %arg4[%c27, %c0_89, %c0_90] : memref<32x256x128xbf16, #tpu.memory_space<vmem>>, vector<1x256x128xbf16>
    %153 = vector.shape_cast %152 : vector<1x256x128xbf16> to vector<256x128xbf16>
    %cst_91 = arith.constant dense<0.000000e+00> : vector<1x128xf32>
    %154 = tpu.matmul %151, %153, %cst_91 {dimension_numbers = #tpu.dot_dimension_numbers<[1], [0], [0], [1], [0, 0, 1, 1], [], []>} : vector<1x256xbf16>, vector<256x128xbf16>, vector<1x128xf32> -> vector<1x128xf32>
    %155 = arith.addf %150, %154 : vector<1x128xf32>
    %156 = vector.extract_strided_slice %16 {offsets = [28, 0], sizes = [1, 256], strides = [1, 1]} : vector<32x256xbf16> to vector<1x256xbf16>
    %c28 = arith.constant 28 : index
    %c0_92 = arith.constant 0 : index
    %c0_93 = arith.constant 0 : index
    %157 = vector.load %arg4[%c28, %c0_92, %c0_93] : memref<32x256x128xbf16, #tpu.memory_space<vmem>>, vector<1x256x128xbf16>
    %158 = vector.shape_cast %157 : vector<1x256x128xbf16> to vector<256x128xbf16>
    %cst_94 = arith.constant dense<0.000000e+00> : vector<1x128xf32>
    %159 = tpu.matmul %156, %158, %cst_94 {dimension_numbers = #tpu.dot_dimension_numbers<[1], [0], [0], [1], [0, 0, 1, 1], [], []>} : vector<1x256xbf16>, vector<256x128xbf16>, vector<1x128xf32> -> vector<1x128xf32>
    %160 = arith.addf %155, %159 : vector<1x128xf32>
    %161 = vector.extract_strided_slice %16 {offsets = [29, 0], sizes = [1, 256], strides = [1, 1]} : vector<32x256xbf16> to vector<1x256xbf16>
    %c29 = arith.constant 29 : index
    %c0_95 = arith.constant 0 : index
    %c0_96 = arith.constant 0 : index
    %162 = vector.load %arg4[%c29, %c0_95, %c0_96] : memref<32x256x128xbf16, #tpu.memory_space<vmem>>, vector<1x256x128xbf16>
    %163 = vector.shape_cast %162 : vector<1x256x128xbf16> to vector<256x128xbf16>
    %cst_97 = arith.constant dense<0.000000e+00> : vector<1x128xf32>
    %164 = tpu.matmul %161, %163, %cst_97 {dimension_numbers = #tpu.dot_dimension_numbers<[1], [0], [0], [1], [0, 0, 1, 1], [], []>} : vector<1x256xbf16>, vector<256x128xbf16>, vector<1x128xf32> -> vector<1x128xf32>
    %165 = arith.addf %160, %164 : vector<1x128xf32>
    %166 = vector.extract_strided_slice %16 {offsets = [30, 0], sizes = [1, 256], strides = [1, 1]} : vector<32x256xbf16> to vector<1x256xbf16>
    %c30 = arith.constant 30 : index
    %c0_98 = arith.constant 0 : index
    %c0_99 = arith.constant 0 : index
    %167 = vector.load %arg4[%c30, %c0_98, %c0_99] : memref<32x256x128xbf16, #tpu.memory_space<vmem>>, vector<1x256x128xbf16>
    %168 = vector.shape_cast %167 : vector<1x256x128xbf16> to vector<256x128xbf16>
    %cst_100 = arith.constant dense<0.000000e+00> : vector<1x128xf32>
    %169 = tpu.matmul %166, %168, %cst_100 {dimension_numbers = #tpu.dot_dimension_numbers<[1], [0], [0], [1], [0, 0, 1, 1], [], []>} : vector<1x256xbf16>, vector<256x128xbf16>, vector<1x128xf32> -> vector<1x128xf32>
    %170 = arith.addf %165, %169 : vector<1x128xf32>
    %171 = vector.extract_strided_slice %16 {offsets = [31, 0], sizes = [1, 256], strides = [1, 1]} : vector<32x256xbf16> to vector<1x256xbf16>
    %c31 = arith.constant 31 : index
    %c0_101 = arith.constant 0 : index
    %c0_102 = arith.constant 0 : index
    %172 = vector.load %arg4[%c31, %c0_101, %c0_102] : memref<32x256x128xbf16, #tpu.memory_space<vmem>>, vector<1x256x128xbf16>
    %173 = vector.shape_cast %172 : vector<1x256x128xbf16> to vector<256x128xbf16>
    %cst_103 = arith.constant dense<0.000000e+00> : vector<1x128xf32>
    %174 = tpu.matmul %171, %173, %cst_103 {dimension_numbers = #tpu.dot_dimension_numbers<[1], [0], [0], [1], [0, 0, 1, 1], [], []>} : vector<1x256xbf16>, vector<256x128xbf16>, vector<1x128xf32> -> vector<1x128xf32>
    %175 = arith.addf %170, %174 : vector<1x128xf32>
    %c0_104 = arith.constant 0 : index
    %c0_105 = arith.constant 0 : index
    %176 = vector.load %arg5[%c0_104, %c0_105] : memref<1x128xf32, #tpu.memory_space<vmem>>, vector<1x128xf32>
    %177 = arith.addf %175, %176 : vector<1x128xf32>
    %cst_106 = arith.constant 0.000000e+00 : f32
    %178 = vector.broadcast %cst_106 : f32 to vector<1x128xf32>
    %179 = arith.maximumf %177, %178 : vector<1x128xf32>
    %c0_107 = arith.constant 0 : index
    %c0_108 = arith.constant 0 : index
    %180 = vector.load %arg6[%c0_107, %c0_108] : memref<128x10xf32, #tpu.memory_space<vmem>>, vector<128x10xf32>
    %cst_109 = arith.constant dense<0.000000e+00> : vector<1x10xf32>
    %181 = tpu.matmul %179, %180, %cst_109 {dimension_numbers = #tpu.dot_dimension_numbers<[1], [0], [0], [1], [0, 0, 1, 1], [], []>} : vector<1x128xf32>, vector<128x10xf32>, vector<1x10xf32> -> vector<1x10xf32>
    %c0_110 = arith.constant 0 : index
    %c0_111 = arith.constant 0 : index
    %182 = vector.load %arg7[%c0_110, %c0_111] : memref<1x10xf32, #tpu.memory_space<vmem>>, vector<1x10xf32>
    %183 = arith.addf %181, %182 : vector<1x10xf32>
    %c0_112 = arith.constant 0 : index
    %c0_113 = arith.constant 0 : index
    %c0_114 = arith.constant 0 : index
    %184 = vector.load %arg8[%c0_112, %c0_113, %c0_114] : memref<1x1x10xf32, #tpu.memory_space<vmem>>, vector<1x1x10xf32>
    %185 = vector.shape_cast %184 : vector<1x1x10xf32> to vector<1x10xf32>
    %186 = vector.shape_cast %183 : vector<1x10xf32> to vector<1x1x10xf32>
    tpu.vector_store %arg8[%c0_112, %c0_113, %c0_114], %186 {strides = array<i32>} : memref<1x1x10xf32, #tpu.memory_space<vmem>>, vector<1x1x10xf32>,
    return
  }
  func.func @transform_0(%arg0: i32) -> (i32, i32, i32) {
    %c0_i32 = arith.constant 0 : i32
    %c0_i32_0 = arith.constant 0 : i32
    %c0_i32_1 = arith.constant 0 : i32
    return %arg0, %c0_i32, %c0_i32_0 : i32, i32, i32
  }
  func.func @transform_1(%arg0: i32) -> (i32, i32) {
    %c0_i32 = arith.constant 0 : i32
    %c0_i32_0 = arith.constant 0 : i32
    %c0_i32_1 = arith.constant 0 : i32
    return %c0_i32, %c0_i32_0 : i32, i32
  }
  func.func @transform_2(%arg0: i32) -> (i32, i32) {
    %c0_i32 = arith.constant 0 : i32
    %c0_i32_0 = arith.constant 0 : i32
    %c0_i32_1 = arith.constant 0 : i32
    return %c0_i32, %c0_i32_0 : i32, i32
  }
  func.func @transform_3(%arg0: i32) -> (i32, i32, i32) {
    %c0_i32 = arith.constant 0 : i32
    %c0_i32_0 = arith.constant 0 : i32
    %c0_i32_1 = arith.constant 0 : i32
    %c0_i32_2 = arith.constant 0 : i32
    return %c0_i32, %c0_i32_0, %c0_i32_1 : i32, i32, i32
  }
  func.func @transform_4(%arg0: i32) -> (i32, i32) {
    %c0_i32 = arith.constant 0 : i32
    %c0_i32_0 = arith.constant 0 : i32
    %c0_i32_1 = arith.constant 0 : i32
    return %c0_i32, %c0_i32_0 : i32, i32
  }
  func.func @transform_5(%arg0: i32) -> (i32, i32) {
    %c0_i32 = arith.constant 0 : i32
    %c0_i32_0 = arith.constant 0 : i32
    %c0_i32_1 = arith.constant 0 : i32
    return %c0_i32, %c0_i32_0 : i32, i32
  }
  func.func @transform_6(%arg0: i32) -> (i32, i32) {
    %c0_i32 = arith.constant 0 : i32
    %c0_i32_0 = arith.constant 0 : i32
    %c0_i32_1 = arith.constant 0 : i32
    return %c0_i32, %c0_i32_0 : i32, i32
  }
  func.func @transform_7(%arg0: i32) -> (i32, i32, i32) {
    %c0_i32 = arith.constant 0 : i32
    %c0_i32_0 = arith.constant 0 : i32
    %c0_i32_1 = arith.constant 0 : i32
    return %arg0, %c0_i32, %c0_i32_0 : i32, i32, i32
  }
}

</mosaic_0001>

<bundles_post_ra>
// kernel: cnn_forward.2
= control target key start
LH: loop header
LB: loop body
LE: loop exit
PB: predicated region body
PF: predicated region fallthrough
CT: control target
= control target key end

     0   :  { %s2153_s12 = smov 0   ;;  %s2876_s0 = inlined_call_operand.vmem [shape: bf16[2,128,1088], index: 0, kind: input, shape index: {}]   ;;  %s2877_s1 = inlined_call_operand.vmem [shape: bf16[144,128], index: 1, kind: input, shape index: {}]   ;;  %s2878_s2 = inlined_call_operand.vmem [shape: f32[144,1], index: 2, kind: input, shape index: {}]   ;;  %s2879_s3 = inlined_call_operand.vmem [shape: bf16[2,16,1088], index: 3, kind: output, shape index: {}]  }
   0x1 LB: > { %s1667_s13 = sadd.s32 4294967295, %s2130_s12   ;;  %p1671_p0 = scmp.ge.s32.totalorder %s2130_s12, 1  ;;  %s2130_s12 = sphi %s2153_s12, %s13_s12  }
   0x2   : > { %p137_p1 = scmp.lt.s32.totalorder %s2130_s12, 3 }
   0x4   : > { %p138_p2 = pnand %p1671_p0, %p137_p1 }
   0x6   : > { %141 = sbr.rel (%p138_p2) target bundleno = 523 (0x20b), region = 32 }
   0xb   : > { %p161_p3 = scmp.lt.s32.totalorder %s1667_s13, 1  ;;  %v271_v0 = vld [vmem:[%s2878_s2 + $0x10] sm:$0xff]  ;;  %v2132_v1 = vmov 0   ;;  %v272_v11 = vld [vmem:[%s2878_s2 + $0x18] sm:$0xff]  ;;  %v269_v14 = vld [vmem:[%s2878_s2] sm:$0xff]  ;;  %vm1605_vm0 = vcmask 519168  }
   0xc   : > { %2117 = vset.pattern.permute.xlu1 %v2132_v1  ;;  %2116 = vset.pattern.permute.xlu0 %v2132_v1  ;;  %v276_v18 = vld [vmem:[%s2878_s2 + $0x38] sm:$0xff]  ;;  %v270_v19 = vld [vmem:[%s2878_s2 + $0x8] sm:$0xff]  ;;  %v279_v26 = vld [vmem:[%s2878_s2 + $0x50] sm:$0xff] }
   0xd   : > { %s2891_s13 = smov (!%p161_p3, %s1667_s13), 1  ;;  %299 = vperm.xlu1 %2117, %v271_v0   ;;  %2118 = vset.pattern.permute.xlu2 %v2132_v1  ;;  %v275_v27 = vld [vmem:[%s2878_s2 + $0x30] sm:$0xff]  ;;  %v273_v35 = vld [vmem:[%s2878_s2 + $0x20] sm:$0xff]  ;;  %v2234_v49 = vld [vmem:[%s2877_s1 + $0x28] sm:$0xff] }
   0xe   : > { %s2105_s16 = smul.u32 576, %s2891_s13  ;;  %289 = vperm.xlu0 %2116, %v269_v14   ;;  %v2216_v37 = vld [vmem:[%s2877_s1] sm:$0xff]  ;;  %v2221_v38 = vld [vmem:[%s2877_s1 + $0x10] sm:$0xff]  ;;  %309 = vperm.xlu2 %2118, %v273_v35   ;;  %v278_v0 = vld [vmem:[%s2878_s2 + $0x48] sm:$0xff] }
   0xf   : > { %v2241_v54 = vld [vmem:[%s2877_s1 + $0x40] sm:$0xff]  ;;  %v274_v1 = vld [vmem:[%s2878_s2 + $0x28] sm:$0xff]  ;;  %s2106_s4 = smul.u32 72, %s2891_s13 }
  0x10   : > { %s2170_s19 = scalar_lea.vmem %s2876_s0, %s2105_s16 }
  0x11   : > { %v1964_v2 = vld [vmem:[%s2170_s19 + $0x1f8] sm:$0xf]  ;;  %v2076_v3 = vld [vmem:[%s2170_s19 + $0x218] sm:$0xf0]  ;;  %v1928_v4 = vld [vmem:[%s2170_s19 + $0x1b0] sm:$0xf]  ;;  %s2700_s8 = scalar_lea.vmem %s2879_s3, %s2106_s4 }
  0x12   : > { %v1965_v5 = vor.u32 %v2076_v3, %v1964_v2  ;;  %v2067_v6 = vld [vmem:[%s2170_s19 + $0x1d0] sm:$0xf0]  ;;  %v1892_v8 = vld [vmem:[%s2170_s19 + $0x168] sm:$0xf]  ;;  %v2058_v9 = vld [vmem:[%s2170_s19 + $0x188] sm:$0xf0] }
  0x13   : > { %v1929_v7 = vor.u32 %v2067_v6, %v1928_v4  ;;  %v1893_v10 = vor.u32 %v2058_v9, %v1892_v8  ;;  %v1856_v12 = vld [vmem:[%s2170_s19 + $0x120] sm:$0xf]  ;;  %v2049_v13 = vld [vmem:[%s2170_s19 + $0x140] sm:$0xf0]  ;;  %v1820_v16 = vld [vmem:[%s2170_s19 + $0xd8] sm:$0xf] }
  0x14   : > { %799 = vmatpush.bf16.msra.mxu0 %v1965_v5  ;;  %2081 = vmatpush.bf16.msra.mxu1 %v1965_v5  ;;  %v1857_v15 = vor.u32 %v2049_v13, %v1856_v12  ;;  %v2040_v17 = vld [vmem:[%s2170_s19 + $0xf8] sm:$0xf0]  ;;  %v1784_v21 = vld [vmem:[%s2170_s19 + $0x90] sm:$0xf]  ;;  %v2031_v22 = vld [vmem:[%s2170_s19 + $0xb0] sm:$0xf0] }
  0x15   : > { %2082 = vmatpush.bf16.msra.mxu2 %v1965_v5  ;;  %2083 = vmatpush.bf16.msra.mxu3 %v1965_v5  ;;  %v1821_v20 = vor.u32 %v2040_v17, %v1820_v16  ;;  %v1785_v23 = vor.u32 %v2031_v22, %v1784_v21  ;;  %v1748_v24 = vld [vmem:[%s2170_s19 + $0x48] sm:$0xf]  ;;  %v2022_v25 = vld [vmem:[%s2170_s19 + $0x68] sm:$0xf0]  ;;  %v1712_v29 = vld [vmem:[%s2170_s19] sm:$0xf] }
  0x16   : > { %304 = vperm.xlu1 %2117, %v272_v11   ;;  %294 = vperm.xlu0 %2116, %v270_v19   ;;  %v1749_v28 = vor.u32 %v2022_v25, %v1748_v24  ;;  %v2013_v30 = vld [vmem:[%s2170_s19 + $0x20] sm:$0xf0]  ;;  %v1974_v32 = vld [vmem:[%s2170_s19 + $0x224] sm:$0xf0]  ;;  %v1972_v33 = vld [vmem:[%s2170_s19 + $0x200] sm:$0xf] }
  0x17   : > { %v2073_v31 = vld [vmem:[%s2170_s19 + $0x204] sm:$0xf]  ;;  %v1713_v36 = vor.u32 %v2013_v30, %v1712_v29  ;;  %v1980_v39 = vld [vmem:[%s2170_s19 + $0x208] sm:$0xf]  ;;  %v2078_v40 = vld [vmem:[%s2170_s19 + $0x228] sm:$0xf0]  ;;  %314 = vperm.xlu2 %2118, %v274_v1  }
  0x18   : > { %800 = vmatpush.bf16.msra.mxu0 %v1929_v7  ;;  %2084 = vmatpush.bf16.msra.mxu1 %v1929_v7  ;;  %v2077_v34 = vld [vmem:[%s2170_s19 + $0x220] sm:$0xf0]  ;;  %v1977_v41 = vor.u32 %v2073_v31, %v1974_v32  ;;  %v2064_v43 = vld [vmem:[%s2170_s19 + $0x1bc] sm:$0xf]  ;;  %v1966_v45 = vld [vmem:[%s2170_s19 + $0x21c] sm:$0xf0]  ;;  %v1981_v50 = vor.u32 %v2078_v40, %v1980_v39 }
  0x19   : > { %2085 = vmatpush.bf16.msra.mxu2 %v1929_v7  ;;  %2086 = vmatpush.bf16.msra.mxu3 %v1929_v7  ;;  %v1973_v42 = vor.u32 %v2077_v34, %v1972_v33  ;;  %v2072_v44 = vld [vmem:[%s2170_s19 + $0x1fc] sm:$0xf]  ;;  %v1938_v46 = vld [vmem:[%s2170_s19 + $0x1dc] sm:$0xf0]  ;;  %v1936_v47 = vld [vmem:[%s2170_s19 + $0x1b8] sm:$0xf] }
  0x1a   : > { %v2068_v48 = vld [vmem:[%s2170_s19 + $0x1d8] sm:$0xf0]  ;;  %v1944_v51 = vld [vmem:[%s2170_s19 + $0x1c0] sm:$0xf]  ;;  %v2069_v52 = vld [vmem:[%s2170_s19 + $0x1e0] sm:$0xf0]  ;;  %v1969_v53 = vor.u32 %v2072_v44, %v1966_v45  ;;  %v1941_v55 = vor.u32 %v2064_v43, %v1938_v46 }
  0x1b   : > { %v1937_v56 = vor.u32 %v2068_v48, %v1936_v47  ;;  %v2055_v57 = vld [vmem:[%s2170_s19 + $0x174] sm:$0xf]  ;;  %v1930_v59 = vld [vmem:[%s2170_s19 + $0x1d4] sm:$0xf0]  ;;  %v1900_v61 = vld [vmem:[%s2170_s19 + $0x170] sm:$0xf]  ;;  %v1945_v63 = vor.u32 %v2069_v52, %v1944_v51 }
  0x1c   : > { %801 = vmatpush.bf16.msra.mxu0 %v1893_v10  ;;  %2087 = vmatpush.bf16.msra.mxu1 %v1893_v10  ;;  %v2063_v58 = vld [vmem:[%s2170_s19 + $0x1b4] sm:$0xf]  ;;  %v1902_v60 = vld [vmem:[%s2170_s19 + $0x194] sm:$0xf0]  ;;  %v2060_v3 = vld [vmem:[%s2170_s19 + $0x198] sm:$0xf0] }
  0x1d   : > { %2088 = vmatpush.bf16.msra.mxu2 %v1893_v10  ;;  %2089 = vmatpush.bf16.msra.mxu3 %v1893_v10  ;;  %v2059_v62 = vld [vmem:[%s2170_s19 + $0x190] sm:$0xf0]  ;;  %v1908_v2 = vld [vmem:[%s2170_s19 + $0x178] sm:$0xf]  ;;  %v2046_v4 = vld [vmem:[%s2170_s19 + $0x12c] sm:$0xf]  ;;  %v1933_v5 = vor.u32 %v2063_v58, %v1930_v59  ;;  %v1905_v6 = vor.u32 %v2055_v57, %v1902_v60 }
  0x1e   : > { %324 = vperm.xlu1 %2117, %v276_v18   ;;  %319 = vperm.xlu0 %2116, %v275_v27   ;;  %v1901_v7 = vor.u32 %v2059_v62, %v1900_v61  ;;  %v2054_v8 = vld [vmem:[%s2170_s19 + $0x16c] sm:$0xf]  ;;  %v1894_v9 = vld [vmem:[%s2170_s19 + $0x18c] sm:$0xf0]  ;;  %v1864_v12 = vld [vmem:[%s2170_s19 + $0x128] sm:$0xf]  ;;  %v1909_v14 = vor.u32 %v2060_v3, %v1908_v2 }
  0x1f   : > { %v282_v10 = vld [vmem:[%s2878_s2 + $0x68] sm:$0xff]  ;;  %v1866_v11 = vld [vmem:[%s2170_s19 + $0x14c] sm:$0xf0]  ;;  %v2051_v16 = vld [vmem:[%s2170_s19 + $0x150] sm:$0xf0]  ;;  %v1897_v17 = vor.u32 %v2054_v8, %v1894_v9 }
  0x20   : > { %802 = vmatpush.bf16.msra.mxu0 %v1857_v15  ;;  %2090 = vmatpush.bf16.msra.mxu1 %v1857_v15  ;;  %v2050_v13 = vld [vmem:[%s2170_s19 + $0x148] sm:$0xf0]  ;;  %v1869_v18 = vor.u32 %v2046_v4, %v1866_v11  ;;  %v2037_v19 = vld [vmem:[%s2170_s19 + $0xe4] sm:$0xf]  ;;  %v1858_v22 = vld [vmem:[%s2170_s19 + $0x144] sm:$0xf0] }
  0x21   : > { %2091 = vmatpush.bf16.msra.mxu2 %v1857_v15  ;;  %2092 = vmatpush.bf16.msra.mxu3 %v1857_v15  ;;  %v1872_v15 = vld [vmem:[%s2170_s19 + $0x130] sm:$0xf]  ;;  %v2045_v21 = vld [vmem:[%s2170_s19 + $0x124] sm:$0xf]  ;;  %v1828_v24 = vld [vmem:[%s2170_s19 + $0xe0] sm:$0xf] }
  0x22   : > { %v2041_v25 = vld [vmem:[%s2170_s19 + $0x100] sm:$0xf0]  ;;  %v2287_v29 = vld [vmem:[%s2877_s1 + $0x8] sm:$0xff]  ;;  %v2292_v30 = vld [vmem:[%s2877_s1 + $0x18] sm:$0xff]  ;;  %v1861_v33 = vor.u32 %v2045_v21, %v1858_v22 }
  0x23   : > { %v281_v27 = vld [vmem:[%s2878_s2 + $0x60] sm:$0xff]  ;;  %v1836_v31 = vld [vmem:[%s2170_s19 + $0xe8] sm:$0xf]  ;;  %v2042_v32 = vld [vmem:[%s2170_s19 + $0x108] sm:$0xf0] }
  0x24   : > { %803 = vmatpush.bf16.msra.mxu0 %v1821_v20  ;;  %2093 = vmatpush.bf16.msra.mxu1 %v1821_v20  ;;  %v2028_v35 = vld [vmem:[%s2170_s19 + $0x9c] sm:$0xf]  ;;  %v1822_v40 = vld [vmem:[%s2170_s19 + $0xfc] sm:$0xf0]  ;;  %v2305_v44 = vld [vmem:[%s2877_s1 + $0x30] sm:$0xff]  ;;  %v1837_v45 = vor.u32 %v2042_v32, %v1836_v31 }
  0x25   : > { %2094 = vmatpush.bf16.msra.mxu2 %v1821_v20  ;;  %2095 = vmatpush.bf16.msra.mxu3 %v1821_v20  ;;  %v1865_v20 = vor.u32 %v2050_v13, %v1864_v12  ;;  %v2036_v39 = vld [vmem:[%s2170_s19 + $0xdc] sm:$0xf]  ;;  %v1800_v46 = vld [vmem:[%s2170_s19 + $0xa0] sm:$0xf]  ;;  %v2033_v47 = vld [vmem:[%s2170_s19 + $0xc0] sm:$0xf0] }
  0x26   : > { %339 = vperm.xlu1 %2117, %v279_v26   ;;  %334 = vperm.xlu0 %2116, %v278_v0   ;;  %v1873_v26 = vor.u32 %v2051_v16, %v1872_v15  ;;  %v2032_v43 = vld [vmem:[%s2170_s19 + $0xb8] sm:$0xf0]  ;;  %v1825_v48 = vor.u32 %v2036_v39, %v1822_v40  ;;  %v2019_v51 = vld [vmem:[%s2170_s19 + $0x54] sm:$0xf]  ;;  %v1756_v57 = vld [vmem:[%s2170_s19 + $0x50] sm:$0xf]  ;;  %v1801_v59 = vor.u32 %v2033_v47, %v1800_v46 }
  0x27   : > { %v2023_v58 = vld [vmem:[%s2170_s19 + $0x70] sm:$0xf0]  ;;  %v1764_v60 = vld [vmem:[%s2170_s19 + $0x58] sm:$0xf]  ;;  %v2024_v61 = vld [vmem:[%s2170_s19 + $0x78] sm:$0xf0] }
  0x28   : > { %804 = vmatpush.bf16.msra.mxu0 %v1785_v23  ;;  %2096 = vmatpush.bf16.msra.mxu1 %v1785_v23  ;;  %v2010_v62 = vld [vmem:[%s2170_s19 + $0xc] sm:$0xf]  ;;  %v280_v1 = vld [vmem:[%s2878_s2 + $0x58] sm:$0xff]  ;;  %v285_v2 = vld [vmem:[%s2878_s2 + $0x80] sm:$0xff]  ;;  %v1757_v4 = vor.u32 %v2023_v58, %v1756_v57  ;;  %v1765_v11 = vor.u32 %v2024_v61, %v1764_v60 }
  0x29   : > { %2097 = vmatpush.bf16.msra.mxu2 %v1785_v23  ;;  %2098 = vmatpush.bf16.msra.mxu3 %v1785_v23  ;;  %v1830_v23 = vld [vmem:[%s2170_s19 + $0x104] sm:$0xf0]  ;;  %v2014_v8 = vld [vmem:[%s2170_s19 + $0x28] sm:$0xf0]  ;;  %v1988_v9 = vld [vmem:[%s2170_s19 + $0x210] sm:$0xf] }
  0x2a   : > { %v1833_v34 = vor.u32 %v2037_v19, %v1830_v23  ;;  %v2079_v12 = vld [vmem:[%s2170_s19 + $0x230] sm:$0xf0]  ;;  %v1728_v15 = vld [vmem:[%s2170_s19 + $0x10] sm:$0xf]  ;;  %v1714_v21 = vld [vmem:[%s2170_s19 + $0x24] sm:$0xf0] }
  0x2b   : > { %v2075_v13 = vld [vmem:[%s2170_s19 + $0x214] sm:$0xf]  ;;  %v2074_v22 = vld [vmem:[%s2170_s19 + $0x20c] sm:$0xf]  ;;  %v1989_v23 = vor.u32 %v2079_v12, %v1988_v9  ;;  %v1952_v39 = vld [vmem:[%s2170_s19 + $0x1c8] sm:$0xf] }
  0x2c   : > { %805 = vmatpush.bf16.msra.mxu0 %v1749_v28  ;;  %2099 = vmatpush.bf16.msra.mxu1 %v1749_v28  ;;  %v2015_v16 = vld [vmem:[%s2170_s19 + $0x30] sm:$0xf0]  ;;  %v2070_v40 = vld [vmem:[%s2170_s19 + $0x1e8] sm:$0xf0]  ;;  %v1946_v47 = vld [vmem:[%s2170_s19 + $0x1e4] sm:$0xf0] }
  0x2d   : > { %2100 = vmatpush.bf16.msra.mxu2 %v1749_v28  ;;  %2101 = vmatpush.bf16.msra.mxu3 %v1749_v28  ;;  %v277_v28 = vld [vmem:[%s2878_s2 + $0x40] sm:$0xff]  ;;  %v2056_v60 = vld [vmem:[%s2170_s19 + $0x17c] sm:$0xf]  ;;  %v1874_v9 = vld [vmem:[%s2170_s19 + $0x154] sm:$0xf0] }
  0x2e   : > { %354 = vperm.xlu1 %2117, %v282_v10   ;;  %349 = vperm.xlu0 %2116, %v281_v27   ;;  %v284_v10 = vld [vmem:[%s2878_s2 + $0x78] sm:$0xff]  ;;  %v2057_v57 = vld [vmem:[%s2170_s19 + $0x184] sm:$0xf]  ;;  %v1910_v61 = vld [vmem:[%s2170_s19 + $0x19c] sm:$0xf0] }
  0x2f   : > { %329 = vperm.xlu2 %2118, %v277_v28   ;;  %v2080_v27 = vld [vmem:[%s2170_s19 + $0x238] sm:$0xf0]  ;;  %v1729_v28 = vor.u32 %v2015_v16, %v1728_v15  ;;  %v1888_v12 = vld [vmem:[%s2170_s19 + $0x140] sm:$0xf]  ;;  %v1844_v15 = vld [vmem:[%s2170_s19 + $0xf0] sm:$0xf] }
  0x30   : > { %806 = vmatpush.bf16.msra.mxu0 %v1713_v36  ;;  %2102 = vmatpush.bf16.msra.mxu1 %v1713_v36  ;;  %v2043_v16 = vld [vmem:[%s2170_s19 + $0x110] sm:$0xf0] }
  0x31   : > { %2103 = vmatpush.bf16.msra.mxu2 %v1713_v36  ;;  %2104 = vmatpush.bf16.msra.mxu3 %v1713_v36  ;;  %v1829_v36 = vor.u32 %v2041_v25, %v1828_v24  ;;  %v1982_v25 = vld [vmem:[%s2170_s19 + $0x22c] sm:$0xf0] }
  0x32   : > { %v1985_v32 = vor.u32 %v2074_v22, %v1982_v25  ;;  %v1838_v22 = vld [vmem:[%s2170_s19 + $0x10c] sm:$0xf0]  ;;  %v2044_v25 = vld [vmem:[%s2170_s19 + $0x118] sm:$0xf0] }
  0x33   : > { %807 = vmatmul.bf16.vlgmr.msra.gmra.mxu0 %v2216_v37  ;;  %817 = vmatmul.bf16.vlgmr.msra.gmra.mxu1 %v2221_v38 }
  0x34   : > { %832 = vmatmul.bf16.vlgmr.msra.gmra.mxu2 %v2234_v49  ;;  %1015 = vmatpush.bf16.msrb.mxu0 %v1981_v50 }
  0x35   : > { %961 = vmatpush.bf16.msrb.mxu3 %v1977_v41  ;;  %907 = vmatpush.bf16.msrb.mxu2 %v1973_v42  ;;  %v1794_v41 = vld [vmem:[%s2170_s19 + $0xbc] sm:$0xf0]  ;;  %v1792_v42 = vld [vmem:[%s2170_s19 + $0x98] sm:$0xf] }
  0x36   : > { %853 = vmatpush.bf16.msrb.mxu1 %v1969_v53  ;;  %847 = vmatmul.bf16.vlgmr.msra.gmra.mxu3 %v2241_v54  ;;  %v1797_v50 = vor.u32 %v2028_v35, %v1794_v41  ;;  %v1793_v52 = vor.u32 %v2032_v43, %v1792_v42  ;;  %v2027_v53 = vld [vmem:[%s2170_s19 + $0x94] sm:$0xf]  ;;  %v2355_v35 = vld [vmem:[%s2877_s1 + $0x38] sm:$0xff]  ;;  %v1953_v41 = vor.u32 %v2070_v40, %v1952_v39  ;;  %v2066_v42 = vld [vmem:[%s2170_s19 + $0x1cc] sm:$0xf] }
  0x37   : > { %344 = vperm.xlu2 %2118, %v280_v1   ;;  %369 = vperm.xlu1 %2117, %v285_v2   ;;  %v1954_v43 = vld [vmem:[%s2170_s19 + $0x1ec] sm:$0xf0]  ;;  %v2062_v1 = vld [vmem:[%s2170_s19 + $0x1a8] sm:$0xf0] }
  0x38   : > { %1016 = vmatpush.bf16.msrb.mxu0 %v1945_v63  ;;  %v1722_v63 = vld [vmem:[%s2170_s19 + $0x2c] sm:$0xf0]  ;;  %364 = vperm.xlu0 %2116, %v284_v10   ;;  %v1957_v46 = vor.u32 %v2066_v42, %v1954_v43  ;;  %v1802_v42 = vld [vmem:[%s2170_s19 + $0xc4] sm:$0xf0] }
  0x39   : > { %962 = vmatpush.bf16.msrb.mxu3 %v1941_v55  ;;  %908 = vmatpush.bf16.msrb.mxu2 %v1937_v56  ;;  %v1786_v55 = vld [vmem:[%s2170_s19 + $0xb4] sm:$0xf0]  ;;  %v1816_v43 = vld [vmem:[%s2170_s19 + $0xb0] sm:$0xf] }
  0x3a   : > { %854 = vmatpush.bf16.msrb.mxu1 %v1933_v5  ;;  %v1758_v56 = vld [vmem:[%s2170_s19 + $0x74] sm:$0xf0]  ;;  %v1789_v0 = vor.u32 %v2027_v53, %v1786_v55  ;;  %v2018_v5 = vld [vmem:[%s2170_s19 + $0x4c] sm:$0xf]  ;;  %v1916_v55 = vld [vmem:[%s2170_s19 + $0x180] sm:$0xf] }
  0x3b   : > { %v1761_v3 = vor.u32 %v2019_v51, %v1758_v56  ;;  %v286_v53 = vld [vmem:[%s2878_s2 + $0x88] sm:$0xff]  ;;  %v2061_v56 = vld [vmem:[%s2170_s19 + $0x1a0] sm:$0xf0] }
  0x3c   : > { %1017 = vmatpush.bf16.msrb.mxu0 %v1909_v14  ;;  %v1990_v14 = vld [vmem:[%s2170_s19 + $0x234] sm:$0xf0]  ;;  %v1917_v58 = vor.u32 %v2061_v56, %v1916_v55  ;;  %v1772_v55 = vld [vmem:[%s2170_s19 + $0x60] sm:$0xf]  ;;  %v2025_v56 = vld [vmem:[%s2170_s19 + $0x80] sm:$0xf0] }
  0x3d   : > { %963 = vmatpush.bf16.msrb.mxu3 %v1905_v6  ;;  %909 = vmatpush.bf16.msrb.mxu2 %v1901_v7  ;;  %v1750_v6 = vld [vmem:[%s2170_s19 + $0x6c] sm:$0xf0]  ;;  %v1720_v7 = vld [vmem:[%s2170_s19 + $0x8] sm:$0xf]  ;;  %v1993_v24 = vor.u32 %v2075_v13, %v1990_v14  ;;  %v2053_v13 = vld [vmem:[%s2170_s19 + $0x160] sm:$0xf0] }
  0x3e   : > { %855 = vmatpush.bf16.msrb.mxu1 %v1897_v17  ;;  %v1753_v17 = vor.u32 %v2018_v5, %v1750_v6  ;;  %v1721_v19 = vor.u32 %v2014_v8, %v1720_v7  ;;  %v2048_v5 = vld [vmem:[%s2170_s19 + $0x13c] sm:$0xf]  ;;  %v1882_v7 = vld [vmem:[%s2170_s19 + $0x15c] sm:$0xf0]  ;;  %v2047_v8 = vld [vmem:[%s2170_s19 + $0x134] sm:$0xf]  ;;  %v1889_v14 = vor.u32 %v2053_v13, %v1888_v12 }
  0x3f   : > { %v1885_v10 = vor.u32 %v2048_v5, %v1882_v7  ;;  %v2026_v5 = vld [vmem:[%s2170_s19 + $0x88] sm:$0xf0]  ;;  %v1744_v12 = vld [vmem:[%s2170_s19 + $0x20] sm:$0xf]  ;;  %v2017_v13 = vld [vmem:[%s2170_s19 + $0x40] sm:$0xf0] }
  0x40   : > { %1018 = vmatpush.bf16.msrb.mxu0 %v1873_v26  ;;  %v1996_v26 = vld [vmem:[%s2170_s19 + $0x218] sm:$0xf] }
  0x41   : > { %964 = vmatpush.bf16.msrb.mxu3 %v1869_v18  ;;  %910 = vmatpush.bf16.msrb.mxu2 %v1865_v20  ;;  %v1725_v18 = vor.u32 %v2010_v62, %v1722_v63  ;;  %v2009_v20 = vld [vmem:[%s2170_s19 + $0x4] sm:$0xf]  ;;  %v1913_v63 = vor.u32 %v2056_v60, %v1910_v61 }
  0x42   : > { %856 = vmatpush.bf16.msrb.mxu1 %v1861_v33  ;;  %v1717_v31 = vor.u32 %v2009_v20, %v1714_v21  ;;  %v1997_v33 = vor.u32 %v2080_v27, %v1996_v26  ;;  %v2038_v21 = vld [vmem:[%s2170_s19 + $0xec] sm:$0xf]  ;;  %v1808_v27 = vld [vmem:[%s2170_s19 + $0xa8] sm:$0xf] }
  0x43   : > { %812 = vmatmul.bf16.gmra.mxu0 %v2287_v29  ;;  %822 = vmatmul.bf16.gmra.mxu1 %v2292_v30 }
  0x44   : > { %837 = vmatmul.bf16.gmra.mxu2 %v2305_v44  ;;  %1019 = vmatpush.bf16.msrb.mxu0 %v1837_v45  ;;  %v2065_v45 = vld [vmem:[%s2170_s19 + $0x1c4] sm:$0xf] }
  0x45   : > { %965 = vmatpush.bf16.msrb.mxu3 %v1833_v34  ;;  %911 = vmatpush.bf16.msrb.mxu2 %v1829_v36  ;;  %v2350_v34 = vld [vmem:[%s2877_s1 + $0x20] sm:$0xff]  ;;  %v283_v36 = vld [vmem:[%s2878_s2 + $0x70] sm:$0xff]  ;;  %v1949_v51 = vor.u32 %v2065_v45, %v1946_v47 }
  0x46   : > { %857 = vmatpush.bf16.msrb.mxu1 %v1825_v48  ;;  %359 = vperm.xlu2 %2118, %v283_v36   ;;  %v1960_v48 = vld [vmem:[%s2170_s19 + $0x1d0] sm:$0xf] }
  0x48   : > { %1020 = vmatpush.bf16.msrb.mxu0 %v1801_v59  ;;  %v1918_v59 = vld [vmem:[%s2170_s19 + $0x1a4] sm:$0xf0] }
  0x49   : > { %966 = vmatpush.bf16.msrb.mxu3 %v1797_v50  ;;  %912 = vmatpush.bf16.msrb.mxu2 %v1793_v52  ;;  %v2071_v50 = vld [vmem:[%s2170_s19 + $0x1f0] sm:$0xf0]  ;;  %v1921_v62 = vor.u32 %v2057_v57, %v1918_v59  ;;  %v2021_v57 = vld [vmem:[%s2170_s19 + $0x64] sm:$0xf]  ;;  %v1774_v59 = vld [vmem:[%s2170_s19 + $0x84] sm:$0xf0] }
  0x4a   : > { %858 = vmatpush.bf16.msrb.mxu1 %v1789_v0  ;;  %v1961_v52 = vor.u32 %v2071_v50, %v1960_v48  ;;  %v1924_v0 = vld [vmem:[%s2170_s19 + $0x188] sm:$0xf]  ;;  %v1777_v60 = vor.u32 %v2021_v57, %v1774_v59  ;;  %v1730_v57 = vld [vmem:[%s2170_s19 + $0x34] sm:$0xf0] }
  0x4b   : > { %v1925_v2 = vor.u32 %v2062_v1, %v1924_v0  ;;  %v1766_v0 = vld [vmem:[%s2170_s19 + $0x7c] sm:$0xf0]  ;;  %v1780_v1 = vld [vmem:[%s2170_s19 + $0x68] sm:$0xf] }
  0x4c   : > { %1021 = vmatpush.bf16.msrb.mxu0 %v1765_v11  ;;  %v1877_v11 = vor.u32 %v2047_v8, %v1874_v9  ;;  %v2012_v8 = vld [vmem:[%s2170_s19 + $0x1c] sm:$0xf]  ;;  %v1738_v9 = vld [vmem:[%s2170_s19 + $0x3c] sm:$0xf0] }
  0x4d   : > { %967 = vmatpush.bf16.msrb.mxu3 %v1761_v3  ;;  %913 = vmatpush.bf16.msrb.mxu2 %v1757_v4  ;;  %v1880_v3 = vld [vmem:[%s2170_s19 + $0x138] sm:$0xf]  ;;  %v2052_v4 = vld [vmem:[%s2170_s19 + $0x158] sm:$0xf0] }
  0x4e   : > { %859 = vmatpush.bf16.msrb.mxu1 %v1753_v17  ;;  %374 = vperm.xlu2 %2118, %v286_v53   ;;  %v1881_v6 = vor.u32 %v2052_v4, %v1880_v3  ;;  %v2039_v17 = vld [vmem:[%s2170_s19 + $0xf4] sm:$0xf] }
  0x50   : > { %1022 = vmatpush.bf16.msrb.mxu0 %v1729_v28  ;;  %v2034_v28 = vld [vmem:[%s2170_s19 + $0xc8] sm:$0xf0] }
  0x51   : > { %968 = vmatpush.bf16.msrb.mxu3 %v1725_v18  ;;  %914 = vmatpush.bf16.msrb.mxu2 %v1721_v19  ;;  %v1845_v18 = vor.u32 %v2043_v16, %v1844_v15  ;;  %v1846_v19 = vld [vmem:[%s2170_s19 + $0x114] sm:$0xf0]  ;;  %v1745_v16 = vor.u32 %v2017_v13, %v1744_v12 }
  0x52   : > { %860 = vmatpush.bf16.msrb.mxu1 %v1717_v31  ;;  %v1849_v20 = vor.u32 %v2039_v17, %v1846_v19  ;;  %v2030_v31 = vld [vmem:[%s2170_s19 + $0xac] sm:$0xf] }
  0x53   : > { %827 = vmatmul.bf16.gmra.mxu1 %v2350_v34  ;;  %1023 = vmatmul.bf16.vlgmr.msrb.gmra.mxu0 %v2216_v37 }
  0x54   : > { %969 = vmatmul.bf16.vlgmr.msrb.gmra.mxu3 %v2216_v37  ;;  %1231 = vmatpush.bf16.msra.mxu0 %v1997_v33  ;;  %v1810_v33 = vld [vmem:[%s2170_s19 + $0xcc] sm:$0xf0] }
  0x55   : > { %1123 = vmatpush.bf16.msra.mxu2 %v1989_v23  ;;  %1177 = vmatpush.bf16.msra.mxu3 %v1993_v24  ;;  %v1852_v23 = vld [vmem:[%s2170_s19 + $0xf8] sm:$0xf]  ;;  %v1841_v24 = vor.u32 %v2038_v21, %v1838_v22  ;;  %v1813_v36 = vor.u32 %v2030_v31, %v1810_v33  ;;  %v2016_v33 = vld [vmem:[%s2170_s19 + $0x38] sm:$0xf0] }
  0x56   : > { %1069 = vmatpush.bf16.msra.mxu1 %v1985_v32  ;;  %842 = vmatmul.bf16.gmra.mxu2 %v2355_v35  ;;  %v1853_v26 = vor.u32 %v2044_v25, %v1852_v23  ;;  %v1809_v32 = vor.u32 %v2034_v28, %v1808_v27 }
  0x58   : > { %1232 = vmatpush.bf16.msra.mxu0 %v1961_v52 }
  0x59   : > { %1124 = vmatpush.bf16.msra.mxu2 %v1953_v41  ;;  %1178 = vmatpush.bf16.msra.mxu3 %v1957_v46  ;;  %v2029_v41 = vld [vmem:[%s2170_s19 + $0xa4] sm:$0xf]  ;;  %v2035_v46 = vld [vmem:[%s2170_s19 + $0xd0] sm:$0xf0] }
  0x5a   : > { %1070 = vmatpush.bf16.msra.mxu1 %v1949_v51  ;;  %v1805_v45 = vor.u32 %v2029_v41, %v1802_v42  ;;  %v1817_v47 = vor.u32 %v2035_v46, %v1816_v43 }
  0x5c   : > { %1233 = vmatpush.bf16.msra.mxu0 %v1925_v2 }
  0x5d   : > { %1125 = vmatpush.bf16.msra.mxu2 %v1917_v58  ;;  %1179 = vmatpush.bf16.msra.mxu3 %v1921_v62  ;;  %v1773_v58 = vor.u32 %v2025_v56, %v1772_v55  ;;  %v2011_v56 = vld [vmem:[%s2170_s19 + $0x14] sm:$0xf] }
  0x5e   : > { %1071 = vmatpush.bf16.msra.mxu1 %v1913_v63  ;;  %v2020_v63 = vld [vmem:[%s2170_s19 + $0x5c] sm:$0xf] }
  0x5f   : > { %v1769_v4 = vor.u32 %v2020_v63, %v1766_v0 }
  0x60   : > { %1234 = vmatpush.bf16.msra.mxu0 %v1889_v14 }
  0x61   : > { %1126 = vmatpush.bf16.msra.mxu2 %v1881_v6  ;;  %1180 = vmatpush.bf16.msra.mxu3 %v1885_v10  ;;  %v1741_v10 = vor.u32 %v2012_v8, %v1738_v9 }
  0x62   : > { %1072 = vmatpush.bf16.msra.mxu1 %v1877_v11 }
  0x63   : > { %861 = vmatmul.bf16.vlgmr.msrb.gmra.mxu1 %v2216_v37  ;;  %1028 = vmatmul.bf16.gmra.mxu0 %v2287_v29 }
  0x64   : > { %974 = vmatmul.bf16.gmra.mxu3 %v2287_v29  ;;  %1235 = vmatpush.bf16.msra.mxu0 %v1853_v26 }
  0x65   : > { %1127 = vmatpush.bf16.msra.mxu2 %v1845_v18  ;;  %1181 = vmatpush.bf16.msra.mxu3 %v1849_v20 }
  0x66   : > { %915 = vmatmul.bf16.vlgmr.msrb.gmra.mxu2 %v2216_v37  ;;  %1073 = vmatpush.bf16.msra.mxu1 %v1841_v24 }
  0x68   : > { %v2431_v48 = vpop.permute.xlu2 %309  ;;  %1236 = vmatpush.bf16.msra.mxu0 %v1817_v47 }
  0x69   : > { %1128 = vmatpush.bf16.msra.mxu2 %v1809_v32  ;;  %1182 = vmatpush.bf16.msra.mxu3 %v1813_v36  ;;  %v1736_v32 = vld [vmem:[%s2170_s19 + $0x18] sm:$0xf] }
  0x6a   : > { %1074 = vmatpush.bf16.msra.mxu1 %v1805_v45  ;;  %v1737_v43 = vor.u32 %v2016_v33, %v1736_v32 }
  0x6d   : > { %1129 = vmatpush.bf16.msra.mxu2 %v1773_v58  ;;  %1183 = vmatpush.bf16.msra.mxu3 %v1777_v60 }
  0x6e   : > { %1075 = vmatpush.bf16.msra.mxu1 %v1769_v4 }
  0x71   : > { %v2445_v61 = vpop.permute.xlu2 %314  ;;  %1184 = vmatpush.bf16.msra.mxu3 %v1741_v10  ;;  %1130 = vmatpush.bf16.msra.mxu2 %v1737_v43 }
  0x73   : > { %866 = vmatmul.bf16.gmra.mxu1 %v2287_v29  ;;  %1033 = vmatmul.bf16.gmra.mxu0 %v2221_v38 }
  0x74   : > { %979 = vmatmul.bf16.gmra.mxu3 %v2221_v38 }
  0x76   : > { %920 = vmatmul.bf16.gmra.mxu2 %v2287_v29 }
  0x7f   : > { %v2423_v39 = vpop.permute.xlu1 %299 }
  0x80   : > { %v2425_v40 = vpop.permute.xlu0 %289 }
  0x83   : > { %871 = vmatmul.bf16.gmra.mxu1 %v2221_v38  ;;  %1038 = vmatmul.bf16.gmra.mxu0 %v2292_v30 }
  0x84   : > { %984 = vmatmul.bf16.gmra.mxu3 %v2292_v30 }
  0x86   : > { %925 = vmatmul.bf16.gmra.mxu2 %v2221_v38 }
  0x88   : > { %v2433_v50 = vpop.permute.xlu1 %304  ;;  %v2435_v53 = vpop.permute.xlu0 %294 }
  0x89   : > { %v2467_v21 = vpop.permute.xlu2 %329 }
  0x90   : > { %v2453_v6 = vpop.permute.xlu1 %324  ;;  %v2455_v7 = vpop.permute.xlu0 %319 }
  0x91   : > { %2884 = vst [vmem:[#allocation2_spill] sm:$0xff] %v2453_v6  ;;  %v2486_v59 = vpop.permute.xlu2 %344 }
  0x92   : > { %2885 = vst [vmem:[#allocation3_spill] sm:$0xff] %v2455_v7 }
  0x93   : > { %876 = vmatmul.bf16.gmra.mxu1 %v2292_v30  ;;  %1043 = vmatmul.bf16.gmra.mxu0 %v2350_v34 }
  0x94   : > { %989 = vmatmul.bf16.gmra.mxu3 %v2350_v34 }
  0x96   : > { %930 = vmatmul.bf16.gmra.mxu2 %v2292_v30 }
  0x98   : > { %v2472_v24 = vpop.permute.xlu1 %339  ;;  %v2477_v27 = vpop.permute.xlu0 %334 }
  0xa0   : > { %v2489_v0 = vpop.permute.xlu1 %354 }
  0xa3   : > { %881 = vmatmul.bf16.gmra.mxu1 %v2350_v34  ;;  %1048 = vmatmul.bf16.gmra.mxu0 %v2234_v49 }
  0xa4   : > { %994 = vmatmul.bf16.gmra.mxu3 %v2234_v49 }
  0xa6   : > { %935 = vmatmul.bf16.gmra.mxu2 %v2350_v34 }
  0xb0   : > { %v808_v51 = vpop.f32.mrf.mxu0  ;;  %v818_v52 = vpop.f32.mrf.mxu1 }
  0xb1   : > { %v809_v11 = vadd.f32 %v808_v51, %v2425_v40  ;;  %v819_v20 = vadd.f32 %v818_v52, %v2431_v48 }
  0xb3   : > { %886 = vmatmul.bf16.gmra.mxu1 %v2234_v49  ;;  %1053 = vmatmul.bf16.gmra.mxu0 %v2305_v44  ;;  %v1285_v19 = vmax.f32 %v809_v11, 0.0  ;;  %v1321_v26 = vmax.f32 %v819_v20, 0.0 }
  0xb4   : > { %999 = vmatmul.bf16.gmra.mxu3 %v2305_v44 }
  0xb6   : > { %940 = vmatmul.bf16.gmra.mxu2 %v2234_v49  ;;  %v1781_v49 = vor.u32 %v2026_v5, %v1780_v1  ;;  %v1733_v1 = vor.u32 %v2011_v56, %v1730_v57 }
  0xb7   : > { %v2447_v62 = vpop.f32.mrf.mxu2 }
  0xb8   : > { %v810_v2 = vpop.f32.mrf.mxu0  ;;  %v820_v3 = vpop.f32.mrf.mxu1  ;;  %1237 = vmatpush.bf16.msra.mxu0 %v1781_v49  ;;  %1076 = vmatpush.bf16.msra.mxu1 %v1733_v1  ;;  %v834_v11 = vadd.f32 %v2447_v62, %v2472_v24 }
  0xb9   : > { %v2464_v15 = vpop.f32.mrf.mxu3  ;;  %v811_v36 = vadd.f32 %v810_v2, %v2435_v53  ;;  %v821_v47 = vadd.f32 %v820_v3, %v2445_v61  ;;  %v2491_v3 = vpop.permute.xlu0 %349 }
  0xba   : > { %v1375_v20 = vmax.f32 %v834_v11, 0.0  ;;  %v2503_v62 = vpop.permute.xlu1 %369 }
  0xbb   : > { %v1294_v58 = vmax.f32 %v811_v36, 0.0  ;;  %v1330_v2 = vmax.f32 %v821_v47, 0.0 }
  0xbc   : > { %1238 = vmatpush.bf16.msra.mxu0 %v1745_v16 }
  0xbf   : > { %v2462_v14 = vpop.f32.mrf.mxu2 }
  0xc0   : > { %v813_v17 = vpop.f32.mrf.mxu0  ;;  %v823_v18 = vpop.f32.mrf.mxu1  ;;  %v836_v36 = vadd.f32 %v2462_v14, %v2486_v59 }
  0xc1   : > { %v814_v22 = vadd.f32 %v813_v17, %v2423_v39  ;;  %v824_v23 = vadd.f32 %v823_v18, %v2455_v7  ;;  %v850_v55 = vpop.f32.mrf.mxu3  ;;  %v2498_v17 = vpop.permute.xlu2 %359 }
  0xc2   : > { %v1384_v56 = vmax.f32 %v836_v36, 0.0 }
  0xc3   : > { %v1303_v25 = vmax.f32 %v814_v22, 0.0  ;;  %891 = vmatmul.bf16.gmra.mxu1 %v2305_v44  ;;  %1058 = vmatmul.bf16.gmra.mxu0 %v2355_v35  ;;  %v1339_v31 = vmax.f32 %v824_v23, 0.0 }
  0xc4   : > { %1004 = vmatmul.bf16.gmra.mxu3 %v2355_v35 }
  0xc5   : > { %v1447_v28 = vmax.f32 %v1285_v19, %v1303_v25 }
  0xc6   : > { %945 = vmatmul.bf16.gmra.mxu2 %v2305_v44 }
  0xc7   : > { %v1465_v41 = vmax.f32 %v1447_v28, %v1321_v26  ;;  %v838_v42 = vpop.f32.mrf.mxu2 }
  0xc8   : > { %v815_v45 = vpop.f32.mrf.mxu0  ;;  %v825_v46 = vpop.f32.mrf.mxu1  ;;  %v839_v16 = vadd.f32 %v838_v42, %v2491_v3 }
  0xc9   : > { %v1483_v51 = vmax.f32 %v1465_v41, %v1339_v31  ;;  %v816_v52 = vadd.f32 %v815_v45, %v2433_v50  ;;  %v826_v63 = vadd.f32 %v825_v46, %v2453_v6  ;;  %v849_v31 = vadd.f32 %v2464_v15, %v2503_v62 }
  0xca   : > { %v1393_v23 = vmax.f32 %v839_v16, 0.0 }
  0xcb   : > { %v1312_v60 = vmax.f32 %v816_v52, 0.0  ;;  %v1348_v5 = vmax.f32 %v826_v63, 0.0  ;;  %v1429_v47 = vmax.f32 %v849_v31, 0.0 }
  0xcd   : > { %v1456_v4 = vmax.f32 %v1294_v58, %v1312_v60  ;;  %v2513_v58 = vpop.permute.xlu2 %374  ;;  %v2515_v60 = vpop.permute.xlu0 %364 }
  0xcf   : > { %v1474_v49 = vmax.f32 %v1456_v4, %v1330_v2  ;;  %v840_v8 = vpop.f32.mrf.mxu2 }
  0xd0   : > { %v828_v9 = vpop.f32.mrf.mxu1  ;;  %v1024_v10 = vpop.f32.mrf.mxu0  ;;  %v841_v45 = vadd.f32 %v840_v8, %v2489_v0 }
  0xd1   : > { %v1492_v12 = vmax.f32 %v1474_v49, %v1348_v5  ;;  %v829_v13 = vadd.f32 %v828_v9, %v2467_v21  ;;  %v1025_v57 = vadd.f32 %v1024_v10, %v2425_v40  ;;  %v851_v5 = vadd.f32 %v850_v55, %v2513_v58 }
  0xd2   : > { %v1402_v14 = vmax.f32 %v841_v45, 0.0 }
  0xd3   : > { %v1357_v18 = vmax.f32 %v829_v13, 0.0  ;;  %896 = vmatmul.bf16.gmra.mxu1 %v2355_v35  ;;  %1063 = vmatmul.bf16.gmra.mxu0 %v2241_v54  ;;  %v1289_v9 = vmax.f32 %v1025_v57, 0.0 }
  0xd4   : > { %1009 = vmatmul.bf16.gmra.mxu3 %v2241_v54 }
  0xd5   : > { %v1501_v22 = vmax.f32 %v1483_v51, %v1357_v18  ;;  %v1438_v18 = vmax.f32 %v851_v5, 0.0 }
  0xd6   : > { %950 = vmatmul.bf16.gmra.mxu2 %v2355_v35 }
  0xd7   : > { %v970_v19 = vpop.f32.mrf.mxu3  ;;  %v1519_v25 = vmax.f32 %v1501_v22, %v1375_v20 }
  0xd8   : > { %v830_v32 = vpop.f32.mrf.mxu1  ;;  %v1026_v33 = vpop.f32.mrf.mxu0  ;;  %v971_v11 = vadd.f32 %v970_v19, %v2425_v40 }
  0xd9   : > { %v843_v26 = vpop.f32.mrf.mxu2  ;;  %v1537_v41 = vmax.f32 %v1519_v25, %v1393_v23  ;;  %v831_v42 = vadd.f32 %v830_v32, %v2477_v27 }
  0xda   : > { %v844_v28 = vadd.f32 %v843_v26, %v2498_v17  ;;  %v1288_v22 = vmax.f32 %v971_v11, 0.0  ;;  %v1027_v26 = vadd.f32 %v1026_v33, %v2435_v53 }
  0xdb   : > { %v1366_v46 = vmax.f32 %v831_v42, 0.0 }
  0xdc   : > { %v1411_v43 = vmax.f32 %v844_v28, 0.0 }
  0xdd   : > { %v1510_v15 = vmax.f32 %v1492_v12, %v1366_v46 }
  0xde   : > { %v1555_v51 = vmax.f32 %v1537_v41, %v1411_v43  ;;  %v1298_v43 = vmax.f32 %v1027_v26, 0.0 }
  0xdf   : > { %v972_v52 = vpop.f32.mrf.mxu3  ;;  %v1528_v1 = vmax.f32 %v1510_v15, %v1384_v56 }
  0xe0   : > { %v2517_v63 = vmax.f32 %v1555_v51, %v1429_v47  ;;  %v862_v49 = vpop.f32.mrf.mxu1  ;;  %v1029_v8 = vpop.f32.mrf.mxu0  ;;  %v973_v45 = vadd.f32 %v972_v52, %v2435_v53 }
  0xe1   : > { %v845_v2 = vpop.f32.mrf.mxu2  ;;  %v1546_v10 = vmax.f32 %v1528_v1, %v1402_v14  ;;  %v1030_v13 = vadd.f32 %v1029_v8, %v2423_v39  ;;  %v863_v57 = vadd.f32 %v862_v49, %v2425_v40 }
  0xe2   : > { %v846_v4 = vadd.f32 %v845_v2, %v2515_v60  ;;  %v1297_v56 = vmax.f32 %v973_v45, 0.0 }
  0xe3   : > { %v1307_v16 = vmax.f32 %v1030_v13, 0.0  ;;  %901 = vmatmul.bf16.gmra.mxu1 %v2241_v54  ;;  %1239 = vmatmul.bf16.vlgmr.msra.gmra.mxu0 %v2216_v37  ;;  %v1286_v52 = vmax.f32 %v863_v57, 0.0 }
  0xe4   : > { %1185 = vmatmul.bf16.vlgmr.msra.gmra.mxu3 %v2216_v37  ;;  %v1420_v12 = vmax.f32 %v846_v4, 0.0 }
  0xe5   : > { %v1451_v23 = vmax.f32 %v1289_v9, %v1307_v16 }
  0xe6   : > { %v1564_v20 = vmax.f32 %v1546_v10, %v1420_v12  ;;  %955 = vmatmul.bf16.gmra.mxu2 %v2241_v54 }
  0xe7   : > { %v975_v55 = vpop.f32.mrf.mxu3 }
  0xe8   : > { %v976_v19 = vadd.f32 %v975_v55, %v2423_v39  ;;  %v2528_v25 = vmax.f32 %v1564_v20, %v1438_v18  ;;  %v864_v32 = vpop.f32.mrf.mxu1  ;;  %v1031_v36 = vpop.f32.mrf.mxu0 }
  0xe9   : > { %v916_v31 = vpop.f32.mrf.mxu2  ;;  %v1032_v42 = vadd.f32 %v1031_v36, %v2433_v50  ;;  %v865_v16 = vadd.f32 %v864_v32, %v2435_v53 }
  0xea   : > { %v1306_v28 = vmax.f32 %v976_v19, 0.0  ;;  %v917_v12 = vadd.f32 %v916_v31, %v2425_v40 }
  0xeb   : > { %v1316_v54 = vmax.f32 %v1032_v42, 0.0 }
  0xec   : > { %v1450_v41 = vmax.f32 %v1288_v22, %v1306_v28 }
  0xed   : > { %v1460_v47 = vmax.f32 %v1298_v43, %v1316_v54 }
  0xef   : > { %v977_v46 = vpop.f32.mrf.mxu3 }
  0xf0   : > { %v978_v51 = vadd.f32 %v977_v46, %v2433_v50  ;;  %v867_v14 = vpop.f32.mrf.mxu1  ;;  %v1034_v1 = vpop.f32.mrf.mxu0 }
  0xf1   : > { %v918_v33 = vpop.f32.mrf.mxu2  ;;  %v868_v4 = vadd.f32 %v867_v14, %v2423_v39  ;;  %v1035_v5 = vadd.f32 %v1034_v1, %v2431_v48 }
  0xf2   : > { %v1315_v15 = vmax.f32 %v978_v51, 0.0 }
  0xf3   : > { %v1304_v8 = vmax.f32 %v868_v4, 0.0  ;;  %v1325_v9 = vmax.f32 %v1035_v5, 0.0  ;;  %1077 = vmatmul.bf16.vlgmr.msra.gmra.mxu1 %v2216_v37  ;;  %1244 = vmatmul.bf16.gmra.mxu0 %v2287_v29 }
  0xf4   : > { %v1459_v2 = vmax.f32 %v1297_v56, %v1315_v15  ;;  %1190 = vmatmul.bf16.gmra.mxu3 %v2287_v29  ;;  %v919_v56 = vadd.f32 %v918_v33, %v2435_v53 }
  0xf5   : > { %v1448_v49 = vmax.f32 %v1286_v52, %v1304_v8  ;;  %v1469_v10 = vmax.f32 %v1451_v23, %v1325_v9  ;;  %v1295_v23 = vmax.f32 %v865_v16, 0.0 }
  0xf6   : > { %1131 = vmatmul.bf16.vlgmr.msra.gmra.mxu2 %v2216_v37  ;;  %v1287_v37 = vmax.f32 %v917_v12, 0.0  ;;  %v1296_v8 = vmax.f32 %v919_v56, 0.0 }
  0xf7   : > { %v980_v11 = vpop.f32.mrf.mxu3 }
  0xf8   : > { %v981_v13 = vadd.f32 %v980_v11, %v2431_v48  ;;  %v869_v22 = vpop.f32.mrf.mxu1  ;;  %v1036_v19 = vpop.f32.mrf.mxu0 }
  0xf9   : > { %v921_v20 = vpop.f32.mrf.mxu2  ;;  %v870_v28 = vadd.f32 %v869_v22, %v2433_v50  ;;  %v1037_v36 = vadd.f32 %v1036_v19, %v2445_v61 }
  0xfa   : > { %v1324_v18 = vmax.f32 %v981_v13, 0.0  ;;  %v922_v55 = vadd.f32 %v921_v20, %v2423_v39 }
  0xfb   : > { %v1313_v43 = vmax.f32 %v870_v28, 0.0  ;;  %v1334_v45 = vmax.f32 %v1037_v36, 0.0 }
  0xfc   : > { %v1468_v26 = vmax.f32 %v1450_v41, %v1324_v18  ;;  %v1305_v42 = vmax.f32 %v922_v55, 0.0 }
  0xfd   : > { %v1457_v46 = vmax.f32 %v1295_v23, %v1313_v43  ;;  %v1478_v32 = vmax.f32 %v1460_v47, %v1334_v45 }
  0xfe   : > { %v1449_v54 = vmax.f32 %v1287_v37, %v1305_v42 }
  0xff   : > { %v982_v31 = vpop.f32.mrf.mxu3 }
 0x100   : > { %v983_v51 = vadd.f32 %v982_v31, %v2445_v61  ;;  %v872_v14 = vpop.f32.mrf.mxu1  ;;  %v1039_v1 = vpop.f32.mrf.mxu0 }
 0x101   : > { %v923_v15 = vpop.f32.mrf.mxu2  ;;  %v873_v5 = vadd.f32 %v872_v14, %v2431_v48  ;;  %v1040_v52 = vadd.f32 %v1039_v1, %v2455_v7 }
 0x102   : > { %v1333_v57 = vmax.f32 %v983_v51, 0.0  ;;  %v924_v41 = vadd.f32 %v923_v15, %v2433_v50 }
 0x103   : > { %v1322_v47 = vmax.f32 %v873_v5, 0.0  ;;  %v1343_v11 = vmax.f32 %v1040_v52, 0.0  ;;  %1082 = vmatmul.bf16.gmra.mxu1 %v2287_v29  ;;  %1249 = vmatmul.bf16.gmra.mxu0 %v2221_v38 }
 0x104   : > { %v1477_v4 = vmax.f32 %v1459_v2, %v1333_v57  ;;  %1195 = vmatmul.bf16.gmra.mxu3 %v2221_v38  ;;  %v1314_v9 = vmax.f32 %v924_v41, 0.0 }
 0x105   : > { %v1466_v12 = vmax.f32 %v1448_v49, %v1322_v47  ;;  %v1487_v2 = vmax.f32 %v1469_v10, %v1343_v11 }
 0x106   : > { %v1458_v33 = vmax.f32 %v1296_v8, %v1314_v9  ;;  %1136 = vmatmul.bf16.gmra.mxu2 %v2287_v29 }
 0x107   : > { %v985_v13 = vpop.f32.mrf.mxu3 }
 0x108   : > { %v986_v16 = vadd.f32 %v985_v13, %v2455_v7  ;;  %v874_v22 = vpop.f32.mrf.mxu1  ;;  %v1041_v19 = vpop.f32.mrf.mxu0 }
 0x109   : > { %v926_v20 = vpop.f32.mrf.mxu2  ;;  %v875_v36 = vadd.f32 %v874_v22, %v2445_v61  ;;  %v1042_v38 = vadd.f32 %v1041_v19, %v2453_v6 }
 0x10a   : > { %v1342_v18 = vmax.f32 %v986_v16, 0.0  ;;  %v927_v55 = vadd.f32 %v926_v20, %v2431_v48 }
 0x10b   : > { %v1331_v42 = vmax.f32 %v875_v36, 0.0  ;;  %v1352_v23 = vmax.f32 %v1042_v38, 0.0 }
 0x10c   : > { %v2558_v28 = vmax.f32 %v1468_v26, %v1342_v18  ;;  %v1323_v37 = vmax.f32 %v927_v55, 0.0 }
 0x10d   : > { %v1475_v10 = vmax.f32 %v1457_v46, %v1331_v42  ;;  %v1496_v43 = vmax.f32 %v1478_v32, %v1352_v23  ;;  %v2119_v32 = vld [vmem:[%s2877_s1 + $0x10] sm:$0xff] }
 0x10e   : > { %v1467_v29 = vmax.f32 %v1449_v54, %v1323_v37 }
 0x10f   : > { %v987_v49 = vpop.f32.mrf.mxu3 }
 0x110   : > { %v988_v45 = vadd.f32 %v987_v49, %v2453_v6  ;;  %v877_v57 = vpop.f32.mrf.mxu1  ;;  %v1044_v26 = vpop.f32.mrf.mxu0 }
 0x111   : > { %v928_v51 = vpop.f32.mrf.mxu2  ;;  %v878_v41 = vadd.f32 %v877_v57, %v2455_v7  ;;  %v1045_v14 = vadd.f32 %v1044_v26, %v2467_v21 }
 0x112   : > { %v1351_v31 = vmax.f32 %v988_v45, 0.0  ;;  %v929_v56 = vadd.f32 %v928_v51, %v2445_v61 }
 0x113   : > { %v1340_v1 = vmax.f32 %v878_v41, 0.0  ;;  %v1361_v46 = vmax.f32 %v1045_v14, 0.0  ;;  %1087 = vmatmul.bf16.gmra.mxu1 %v2119_v32  ;;  %1254 = vmatmul.bf16.gmra.mxu0 %v2292_v30 }
 0x114   : > { %v2564_v15 = vmax.f32 %v1477_v4, %v1351_v31  ;;  %1200 = vmatmul.bf16.gmra.mxu3 %v2292_v30  ;;  %v1332_v54 = vmax.f32 %v929_v56, 0.0 }
 0x115   : > { %v2575_v4 = vmax.f32 %v1466_v12, %v1340_v1  ;;  %v1505_v8 = vmax.f32 %v1487_v2, %v1361_v46 }
 0x116   : > { %v1476_v5 = vmax.f32 %v1458_v33, %v1332_v54  ;;  %1141 = vmatmul.bf16.gmra.mxu2 %v2119_v32 }
 0x117   : > { %v2573_v52 = vpop.f32.mrf.mxu3 }
 0x118   : > { %v879_v11 = vpop.f32.mrf.mxu1  ;;  %v1046_v13 = vpop.f32.mrf.mxu0 }
 0x119   : > { %v931_v9 = vpop.f32.mrf.mxu2  ;;  %v880_v16 = vadd.f32 %v879_v11, %v2453_v6  ;;  %v1047_v18 = vadd.f32 %v1046_v13, %v2477_v27 }
 0x11a   : > { %v932_v47 = vadd.f32 %v931_v9, %v2455_v7 }
 0x11b   : > { %v1349_v55 = vmax.f32 %v880_v16, 0.0  ;;  %v1370_v22 = vmax.f32 %v1047_v18, 0.0 }
 0x11c   : > { %v1341_v20 = vmax.f32 %v932_v47, 0.0 }
 0x11d   : > { %v2584_v36 = vmax.f32 %v1475_v10, %v1349_v55  ;;  %v1514_v12 = vmax.f32 %v1496_v43, %v1370_v22 }
 0x11e   : > { %v2580_v19 = vmax.f32 %v1467_v29, %v1341_v20 }
 0x11f   : > { %v2582_v33 = vpop.f32.mrf.mxu3 }
 0x120   : > { %v2587_v37 = vpop.f32.mrf.mxu1  ;;  %v1049_v42 = vpop.f32.mrf.mxu0 }
 0x121   : > { %v933_v2 = vpop.f32.mrf.mxu2  ;;  %v1050_v23 = vadd.f32 %v1049_v42, %v2472_v24 }
 0x122   : > { %v934_v38 = vadd.f32 %v933_v2, %v2453_v6 }
 0x123   : > { %v1379_v45 = vmax.f32 %v1050_v23, 0.0  ;;  %1092 = vmatmul.bf16.gmra.mxu1 %v2292_v30  ;;  %1259 = vmatmul.bf16.gmra.mxu0 %v2350_v34 }
 0x124   : > { %1205 = vmatmul.bf16.gmra.mxu3 %v2350_v34  ;;  %v1350_v49 = vmax.f32 %v934_v38, 0.0 }
 0x125   : > { %v1523_v43 = vmax.f32 %v1505_v8, %v1379_v45 }
 0x126   : > { %v2593_v29 = vmax.f32 %v1476_v5, %v1350_v49  ;;  %1146 = vmatmul.bf16.gmra.mxu2 %v2292_v30  ;;  %v2120_v30 = vld [vmem:[%s2877_s1 + $0x28] sm:$0xff] }
 0x127   : > { %v995_v10 = vpop.f32.mrf.mxu3 }
 0x128   : > { %v2596_v51 = vpop.f32.mrf.mxu1  ;;  %v1051_v56 = vpop.f32.mrf.mxu0 }
 0x129   : > { %v936_v31 = vpop.f32.mrf.mxu2  ;;  %v1052_v57 = vadd.f32 %v1051_v56, %v2486_v59 }
 0x12b   : > { %v1388_v26 = vmax.f32 %v1052_v57, 0.0 }
 0x12d   : > { %v1532_v14 = vmax.f32 %v1514_v12, %v1388_v26 }
 0x12f   : > { %v2599_v41 = vpop.f32.mrf.mxu3 }
 0x130   : > { %v887_v1 = vpop.f32.mrf.mxu1  ;;  %v1054_v46 = vpop.f32.mrf.mxu0 }
 0x131   : > { %v2601_v54 = vpop.f32.mrf.mxu2  ;;  %v1055_v32 = vadd.f32 %v1054_v46, %v2491_v3 }
 0x133   : > { %v1397_v5 = vmax.f32 %v1055_v32, 0.0  ;;  %1097 = vmatmul.bf16.gmra.mxu1 %v2350_v34  ;;  %1264 = vmatmul.bf16.gmra.mxu0 %v2120_v30 }
 0x134   : > { %1210 = vmatmul.bf16.gmra.mxu3 %v2120_v30 }
 0x135   : > { %v1541_v9 = vmax.f32 %v1523_v43, %v1397_v5 }
 0x136   : > { %1151 = vmatmul.bf16.gmra.mxu2 %v2350_v34 }
 0x137   : > { %v2608_v8 = vpop.f32.mrf.mxu3 }
 0x138   : > { %v2613_v11 = vpop.f32.mrf.mxu1  ;;  %v1056_v13 = vpop.f32.mrf.mxu0 }
 0x139   : > { %v2611_v47 = vpop.f32.mrf.mxu2  ;;  %v1057_v16 = vadd.f32 %v1056_v13, %v2489_v0 }
 0x13b   : > { %v1406_v18 = vmax.f32 %v1057_v16, 0.0  ;;  %v991_v16 = vadd.f32 %v2573_v52, %v2467_v21 }
 0x13d   : > { %v1550_v55 = vmax.f32 %v1532_v14, %v1406_v18  ;;  %v883_v18 = vadd.f32 %v2587_v37, %v2467_v21 }
 0x13f   : > { %v2616_v20 = vpop.f32.mrf.mxu3 }
 0x140   : > { %v892_v12 = vpop.f32.mrf.mxu1  ;;  %v1059_v2 = vpop.f32.mrf.mxu0 }
 0x141   : > { %v2618_v22 = vpop.f32.mrf.mxu2  ;;  %v1060_v38 = vadd.f32 %v1059_v2, %v2498_v17  ;;  %v993_v2 = vadd.f32 %v2582_v33, %v2477_v27  ;;  %v893_v52 = vadd.f32 %v892_v12, %v2491_v3 }
 0x143   : > { %v1415_v34 = vmax.f32 %v1060_v38, 0.0  ;;  %1102 = vmatmul.bf16.gmra.mxu1 %v2120_v30  ;;  %1269 = vmatmul.bf16.gmra.mxu0 %v2305_v44  ;;  %v996_v38 = vadd.f32 %v995_v10, %v2472_v24 }
 0x144   : > { %1215 = vmatmul.bf16.gmra.mxu3 %v2305_v44 }
 0x145   : > { %v1559_v23 = vmax.f32 %v1541_v9, %v1415_v34  ;;  %v888_v34 = vadd.f32 %v887_v1, %v2472_v24  ;;  %v885_v1 = vadd.f32 %v2596_v51, %v2477_v27 }
 0x146   : > { %1156 = vmatmul.bf16.gmra.mxu2 %v2120_v30  ;;  %v2121_v30 = vld [vmem:[%s2877_s1 + $0x30] sm:$0xff] }
 0x147   : > { %v1005_v42 = vpop.f32.mrf.mxu3 }
 0x148   : > { %v894_v45 = vpop.f32.mrf.mxu1  ;;  %v1061_v43 = vpop.f32.mrf.mxu0 }
 0x149   : > { %v946_v49 = vpop.f32.mrf.mxu2  ;;  %v1062_v56 = vadd.f32 %v1061_v43, %v2515_v60 }
 0x14b   : > { %v1424_v57 = vmax.f32 %v1062_v56, 0.0  ;;  %v937_v56 = vadd.f32 %v936_v31, %v2467_v21 }
 0x14d   : > { %v1568_v14 = vmax.f32 %v1550_v55, %v1424_v57  ;;  %v1359_v10 = vmax.f32 %v937_v56, 0.0  ;;  %v890_v56 = vadd.f32 %v2613_v11, %v2486_v59  ;;  %v895_v11 = vadd.f32 %v894_v45, %v2489_v0 }
 0x14f   : > { %v2624_v26 = vpop.f32.mrf.mxu3 }
 0x150   : > { %v897_v32 = vpop.f32.mrf.mxu1  ;;  %v1064_v5 = vpop.f32.mrf.mxu0 }
 0x151   : > { %v2626_v46 = vpop.f32.mrf.mxu2  ;;  %v1065_v13 = vadd.f32 %v1064_v5, %v2503_v62  ;;  %v898_v33 = vadd.f32 %v897_v32, %v2498_v17  ;;  %v1001_v32 = vadd.f32 %v2608_v8, %v2491_v3  ;;  %v947_v8 = vadd.f32 %v946_v49, %v2491_v3 }
 0x153   : > { %v1433_v44 = vmax.f32 %v1065_v13, 0.0  ;;  %1107 = vmatmul.bf16.gmra.mxu1 %v2121_v30  ;;  %1274 = vmatmul.bf16.gmra.mxu0 %v2355_v35  ;;  %v1360_v13 = vmax.f32 %v991_v16, 0.0  ;;  %v1396_v49 = vmax.f32 %v1001_v32, 0.0 }
 0x154   : > { %1220 = vmatmul.bf16.gmra.mxu3 %v2355_v35 }
 0x155   : > { %v2638_v55 = vmax.f32 %v1559_v23, %v1433_v44  ;;  %v1369_v23 = vmax.f32 %v993_v2, 0.0  ;;  %v1378_v44 = vmax.f32 %v996_v38, 0.0  ;;  %v1504_v31 = vmax.f32 %v2558_v28, %v1360_v13 }
 0x156   : > { %1161 = vmatmul.bf16.gmra.mxu2 %v2121_v30  ;;  %v1358_v30 = vmax.f32 %v883_v18, 0.0  ;;  %v1394_v18 = vmax.f32 %v893_v52, 0.0  ;;  %v942_v38 = vadd.f32 %v2611_v47, %v2472_v24  ;;  %v1412_v28 = vmax.f32 %v898_v33, 0.0 }
 0x157   : > { %v1010_v9 = vpop.f32.mrf.mxu3  ;;  %2886 = vst [vmem:[#allocation4_spill] sm:$0xff] %v2638_v55  ;;  %v1376_v55 = vmax.f32 %v888_v34, 0.0  ;;  %v2657_v2 = vmax.f32 %v2564_v15, %v1369_v23  ;;  %v1522_v34 = vmax.f32 %v1504_v31, %v1378_v44  ;;  %v2668_v15 = vadd.f32 %v2599_v41, %v2486_v59 }
 0x158   : > { %v899_v57 = vpop.f32.mrf.mxu1  ;;  %v1066_v5 = vpop.f32.mrf.mxu0  ;;  %v1502_v16 = vmax.f32 %v2575_v4, %v1358_v30  ;;  %v1503_v4 = vmax.f32 %v2580_v19, %v1359_v10  ;;  %v2679_v19 = vld [vmem:[%s2877_s1 + $0x40] sm:$0xff]  ;;  %v939_v41 = vadd.f32 %v2601_v54, %v2477_v27  ;;  %v1377_v52 = vmax.f32 %v942_v38, 0.0 }
 0x159   : > { %v951_v43 = vpop.f32.mrf.mxu2  ;;  %v1067_v37 = vadd.f32 %v1066_v5, %v2513_v58  ;;  %v900_v45 = vadd.f32 %v899_v57, %v2515_v60  ;;  %v1387_v10 = vmax.f32 %v2668_v15, 0.0  ;;  %v1011_v54 = vadd.f32 %v1010_v9, %v2503_v62 }
 0x15a   : > { %v1520_v51 = vmax.f32 %v1502_v16, %v1376_v55  ;;  %v1006_v55 = vadd.f32 %v1005_v42, %v2498_v17  ;;  %v1385_v42 = vmax.f32 %v890_v56, 0.0  ;;  %v944_v57 = vadd.f32 %v2618_v22, %v2486_v59 }
 0x15b   : > { %v1442_v6 = vmax.f32 %v1067_v37, 0.0  ;;  %v952_v37 = vadd.f32 %v951_v43, %v2498_v17  ;;  %v2123_v43 = vld [vmem:[%s2877_s1 + $0x38] sm:$0xff]  ;;  %v1368_v32 = vmax.f32 %v939_v41, 0.0  ;;  %v1540_v38 = vmax.f32 %v1522_v34, %v1396_v49 }
 0x15c   : > { %v1538_v47 = vmax.f32 %v1520_v51, %v1394_v18  ;;  %v1414_v16 = vmax.f32 %v1006_v55, 0.0  ;;  %v1003_v56 = vadd.f32 %v2616_v20, %v2489_v0  ;;  %v949_v34 = vadd.f32 %v2626_v46, %v2489_v0 }
 0x15d   : > { %v2654_v12 = vmax.f32 %v1568_v14, %v1442_v6  ;;  %v1367_v6 = vmax.f32 %v885_v1, 0.0  ;;  %v1395_v1 = vmax.f32 %v947_v8, 0.0  ;;  %v1413_v51 = vmax.f32 %v952_v37, 0.0 }
 0x15e   : > { %v1556_v23 = vmax.f32 %v1538_v47, %v1412_v28  ;;  %v1421_v28 = vmax.f32 %v900_v45, 0.0  ;;  %v1386_v55 = vmax.f32 %v944_v57, 0.0  ;;  %v1008_v20 = vadd.f32 %v2624_v26, %v2515_v60 }
 0x15f   : > { %v2650_v7 = vpop.f32.mrf.mxu3  ;;  %v1511_v33 = vmax.f32 %v2584_v36, %v1367_v6  ;;  %v1521_v36 = vmax.f32 %v1503_v4, %v1377_v52  ;;  %v1432_v4 = vmax.f32 %v1011_v54, 0.0  ;;  %v1512_v46 = vmax.f32 %v2593_v29, %v1368_v32 }
 0x160   : > { %v902_v14 = vpop.f32.mrf.mxu1  ;;  %v2671_v13 = vpop.f32.mrf.mxu0  ;;  %v1405_v37 = vmax.f32 %v1003_v56, 0.0  ;;  %v1404_v45 = vmax.f32 %v949_v34, 0.0  ;;  %v1423_v29 = vmax.f32 %v1008_v20, 0.0 }
 0x161   : > { %v953_v5 = vpop.f32.mrf.mxu2  ;;  %v903_v30 = vadd.f32 %v902_v14, %v2503_v62  ;;  %v1529_v9 = vmax.f32 %v1511_v33, %v1385_v42  ;;  %v1539_v15 = vmax.f32 %v1521_v36, %v1395_v1  ;;  %v1013_v33 = vadd.f32 %v2650_v7, %v2513_v58 }
 0x162   : > { %v954_v49 = vadd.f32 %v953_v5, %v2515_v60  ;;  %v1241_v26 = vadd.f32 %v2671_v13, %v2425_v40  ;;  %v1530_v57 = vmax.f32 %v1512_v46, %v1386_v55 }
 0x163   : > { %v1430_v44 = vmax.f32 %v903_v30, 0.0  ;;  %1112 = vmatmul.bf16.gmra.mxu1 %v2355_v35  ;;  %1279 = vmatmul.bf16.gmra.mxu0 %v2679_v19  ;;  %v1403_v35 = vmax.f32 %v895_v11, 0.0  ;;  %v1558_v11 = vmax.f32 %v1540_v38, %v1414_v16 }
 0x164   : > { %1225 = vmatmul.bf16.gmra.mxu3 %v2679_v19  ;;  %v1422_v16 = vmax.f32 %v954_v49, 0.0  ;;  %v1548_v36 = vmax.f32 %v1530_v57, %v1404_v45 }
 0x165   : > { %v1574_v18 = vmax.f32 %v1556_v23, %v1430_v44  ;;  %v1547_v30 = vmax.f32 %v1529_v9, %v1403_v35  ;;  %v1576_v44 = vmax.f32 %v1558_v11, %v1432_v4 }
 0x166   : > { %1166 = vmatmul.bf16.gmra.mxu2 %v2123_v43  ;;  %v1531_v43 = vmax.f32 %v2657_v2, %v1387_v10  ;;  %v1293_v10 = vmax.f32 %v1241_v26, 0.0 }
 0x167   : > { %v1186_v31 = vpop.f32.mrf.mxu3  ;;  %v1591_v22 = vpack.c.bf16 %v1574_v18, %v2517_v63  ;;  %v1557_v63 = vmax.f32 %v1539_v15, %v1413_v51  ;;  %v1565_v42 = vmax.f32 %v1547_v30, %v1421_v28  ;;  %v1441_v51 = vmax.f32 %v1013_v33, 0.0 }
 0x168   : > { %v904_v14 = vpop.f32.mrf.mxu1  ;;  %v1242_v47 = vpop.f32.mrf.mxu0  ;;  %v1549_v38 = vmax.f32 %v1531_v43, %v1405_v37  ;;  %v1187_v13 = vadd.f32 %v1186_v31, %v2425_v40 }
 0x169   : > { %v956_v6 = vpop.f32.mrf.mxu2  ;;  %1601 = vst [vmem:[%s2700_s8] sm:$0xff] %v1591_v22  ;;  %v905_v41 = vadd.f32 %v904_v14, %v2513_v58  ;;  %v1566_v22 = vmax.f32 %v1548_v36, %v1422_v16  ;;  %v1243_v11 = vadd.f32 %v1242_v47, %v2435_v53 }
 0x16a   : > { %v957_v8 = vadd.f32 %v956_v6, %v2503_v62  ;;  %v1567_v28 = vmax.f32 %v1549_v38, %v1423_v29 }
 0x16b   : > { %v1439_v23 = vmax.f32 %v905_v41, 0.0  ;;  %v1302_v46 = vmax.f32 %v1243_v11, 0.0 }
 0x16c   : > { %v1431_v52 = vmax.f32 %v957_v8, 0.0  ;;  %v1585_v15 = vmax.f32 %v1567_v28, %v1441_v51  ;;  %v1292_v8 = vmax.f32 %v1187_v13, 0.0 }
 0x16d   : > { %v1583_v5 = vmax.f32 %v1565_v42, %v1439_v23 }
 0x16e   : > { %v1575_v1 = vmax.f32 %v1557_v63, %v1431_v52 }
 0x16f   : > { %v1188_v54 = vpop.f32.mrf.mxu3  ;;  %v1596_v18 = vpack.c.bf16 %v1583_v5, %v2528_v25 }
 0x170   : > { %v1592_v35 = vpack.c.bf16 %v1576_v44, %v1575_v1  ;;  %v1078_v9 = vpop.f32.mrf.mxu1  ;;  %v1245_v2 = vpop.f32.mrf.mxu0  ;;  %v1189_v37 = vadd.f32 %v1188_v54, %v2435_v53 }
 0x171   : > { %v958_v32 = vpop.f32.mrf.mxu2  ;;  %1607 = vst [vmem:[%s2700_s8 + $0x24] sm:$0xff] %v1596_v18  ;;  %v1246_v56 = vadd.f32 %v1245_v2, %v2423_v39  ;;  %v1079_v33 = vadd.f32 %v1078_v9, %v2425_v40 }
 0x172   : > { %1602 = vst [vmem:[%s2700_s8 + $0x8] sm:$0xff] %v1592_v35  ;;  %v959_v7 = vadd.f32 %v958_v32, %v2513_v58  ;;  %v1301_v44 = vmax.f32 %v1189_v37, 0.0  ;;  %v2887_v37 = vld [vmem:[#allocation3_spill] sm:$0xff] }
 0x173   : > { %v1311_v25 = vmax.f32 %v1246_v56, 0.0  ;;  %1117 = vmatmul.bf16.gmra.mxu1 %v2679_v19  ;;  %v1290_v16 = vmax.f32 %v1079_v33, 0.0 }
 0x174   : > { %v1440_v6 = vmax.f32 %v959_v7, 0.0 }
 0x175   : > { %v1455_v14 = vmax.f32 %v1293_v10, %v1311_v25 }
 0x176   : > { %v1584_v34 = vmax.f32 %v1566_v22, %v1440_v6  ;;  %1171 = vmatmul.bf16.gmra.mxu2 %v2679_v19 }
 0x177   : > { %v1191_v4 = vpop.f32.mrf.mxu3 }
 0x178   : > { %v1192_v55 = vadd.f32 %v1191_v4, %v2423_v39  ;;  %v1597_v31 = vpack.c.bf16 %v1585_v15, %v1584_v34  ;;  %v1080_v20 = vpop.f32.mrf.mxu1  ;;  %v1247_v63 = vpop.f32.mrf.mxu0 }
 0x179   : > { %v1132_v41 = vpop.f32.mrf.mxu2  ;;  %v1248_v52 = vadd.f32 %v1247_v63, %v2433_v50  ;;  %v1081_v7 = vadd.f32 %v1080_v20, %v2435_v53 }
 0x17a   : > { %v1310_v30 = vmax.f32 %v1192_v55, 0.0  ;;  %1608 = vst [vmem:[%s2700_s8 + $0x2c] sm:$0xff] %v1597_v31  ;;  %v1133_v51 = vadd.f32 %v1132_v41, %v2425_v40 }
 0x17b   : > { %v1320_v19 = vmax.f32 %v1248_v52, 0.0  ;;  %v1299_v34 = vmax.f32 %v1081_v7, 0.0 }
 0x17c   : > { %v1454_v49 = vmax.f32 %v1292_v8, %v1310_v30  ;;  %v1291_v25 = vmax.f32 %v1133_v51, 0.0 }
 0x17d   : > { %v1464_v23 = vmax.f32 %v1302_v46, %v1320_v19 }
 0x17f   : > { %v1193_v42 = vpop.f32.mrf.mxu3 }
 0x180   : > { %v1194_v45 = vadd.f32 %v1193_v42, %v2433_v50  ;;  %v1083_v43 = vpop.f32.mrf.mxu1  ;;  %v1250_v26 = vpop.f32.mrf.mxu0 }
 0x181   : > { %v1134_v1 = vpop.f32.mrf.mxu2  ;;  %v1084_v57 = vadd.f32 %v1083_v43, %v2423_v39  ;;  %v1251_v29 = vadd.f32 %v1250_v26, %v2431_v48 }
 0x182   : > { %v1319_v47 = vmax.f32 %v1194_v45, 0.0 }
 0x183   : > { %v1308_v35 = vmax.f32 %v1084_v57, 0.0  ;;  %v1329_v54 = vmax.f32 %v1251_v29, 0.0 }
 0x184   : > { %v1463_v5 = vmax.f32 %v1301_v44, %v1319_v47 }
 0x185   : > { %v1452_v32 = vmax.f32 %v1290_v16, %v1308_v35  ;;  %v1473_v38 = vmax.f32 %v1455_v14, %v1329_v54  ;;  %v2888_v54 = vld [vmem:[#allocation2_spill] sm:$0xff] }
 0x187   : > { %v1196_v18 = vpop.f32.mrf.mxu3 }
 0x188   : > { %v1197_v36 = vadd.f32 %v1196_v18, %v2431_v48  ;;  %v1085_v13 = vpop.f32.mrf.mxu1  ;;  %v1252_v56 = vpop.f32.mrf.mxu0 }
 0x189   : > { %v1137_v2 = vpop.f32.mrf.mxu2  ;;  %v1086_v22 = vadd.f32 %v1085_v13, %v2433_v50  ;;  %v1253_v6 = vadd.f32 %v1252_v56, %v2445_v61 }
 0x18a   : > { %v1328_v9 = vmax.f32 %v1197_v36, 0.0  ;;  %v1138_v10 = vadd.f32 %v1137_v2, %v2423_v39  ;;  %v1135_v39 = vadd.f32 %v1134_v1, %v2435_v53 }
 0x18b   : > { %v1317_v4 = vmax.f32 %v1086_v22, 0.0  ;;  %v1338_v8 = vmax.f32 %v1253_v6, 0.0 }
 0x18c   : > { %v1472_v28 = vmax.f32 %v1454_v49, %v1328_v9  ;;  %v1309_v15 = vmax.f32 %v1138_v10, 0.0  ;;  %v1300_v42 = vmax.f32 %v1135_v39, 0.0 }
 0x18d   : > { %v1461_v55 = vmax.f32 %v1299_v34, %v1317_v4  ;;  %v1482_v31 = vmax.f32 %v1464_v23, %v1338_v8 }
 0x18e   : > { %v1453_v14 = vmax.f32 %v1291_v25, %v1309_v15 }
 0x18f   : > { %v1198_v40 = vpop.f32.mrf.mxu3 }
 0x190   : > { %v1199_v11 = vadd.f32 %v1198_v40, %v2445_v61  ;;  %v1088_v63 = vpop.f32.mrf.mxu1  ;;  %v1255_v49 = vpop.f32.mrf.mxu0 }
 0x191   : > { %v1139_v41 = vpop.f32.mrf.mxu2  ;;  %v1089_v46 = vadd.f32 %v1088_v63, %v2431_v48  ;;  %v1256_v19 = vadd.f32 %v1255_v49, %v2887_v37 }
 0x192   : > { %v1337_v30 = vmax.f32 %v1199_v11, 0.0  ;;  %v1140_v20 = vadd.f32 %v1139_v41, %v2433_v50 }
 0x193   : > { %v1326_v44 = vmax.f32 %v1089_v46, 0.0  ;;  %v1347_v33 = vmax.f32 %v1256_v19, 0.0 }
 0x194   : > { %v1481_v52 = vmax.f32 %v1463_v5, %v1337_v30  ;;  %v1318_v45 = vmax.f32 %v1140_v20, 0.0 }
 0x195   : > { %v1470_v43 = vmax.f32 %v1452_v32, %v1326_v44  ;;  %v2747_v26 = vmax.f32 %v1473_v38, %v1347_v33 }
 0x196   : > { %v1462_v23 = vmax.f32 %v1300_v42, %v1318_v45 }
 0x197   : > { %v1201_v47 = vpop.f32.mrf.mxu3 }
 0x198   : > { %v1202_v53 = vadd.f32 %v1201_v47, %v2887_v37  ;;  %v1090_v5 = vpop.f32.mrf.mxu1  ;;  %v1257_v29 = vpop.f32.mrf.mxu0 }
 0x199   : > { %v1142_v50 = vpop.f32.mrf.mxu2  ;;  %v1091_v35 = vadd.f32 %v1090_v5, %v2445_v61  ;;  %v1258_v18 = vadd.f32 %v1257_v29, %v2888_v54 }
 0x19a   : > { %v1346_v1 = vmax.f32 %v1202_v53, 0.0  ;;  %v1143_v57 = vadd.f32 %v1142_v50, %v2431_v48 }
 0x19b   : > { %v1335_v51 = vmax.f32 %v1091_v35, 0.0  ;;  %v1356_v7 = vmax.f32 %v1258_v18, 0.0 }
 0x19c   : > { %v2751_v16 = vmax.f32 %v1472_v28, %v1346_v1  ;;  %v1327_v36 = vmax.f32 %v1143_v57, 0.0 }
 0x19d   : > { %v1479_v9 = vmax.f32 %v1461_v55, %v1335_v51  ;;  %v2755_v2 = vmax.f32 %v1482_v31, %v1356_v7 }
 0x19e   : > { %v1471_v32 = vmax.f32 %v1453_v14, %v1327_v36 }
 0x19f   : > { %v1203_v38 = vpop.f32.mrf.mxu3 }
 0x1a0   : > { %v1204_v10 = vadd.f32 %v1203_v38, %v2888_v54  ;;  %v1093_v28 = vpop.f32.mrf.mxu1  ;;  %v1260_v22 = vpop.f32.mrf.mxu0 }
 0x1a1   : > { %v1144_v48 = vpop.f32.mrf.mxu2  ;;  %v1094_v25 = vadd.f32 %v1093_v28, %v2887_v37  ;;  %v1261_v51 = vadd.f32 %v1260_v22, %v2467_v21 }
 0x1a2   : > { %v1355_v13 = vmax.f32 %v1204_v10, 0.0  ;;  %v1145_v56 = vadd.f32 %v1144_v48, %v2445_v61 }
 0x1a3   : > { %v1344_v34 = vmax.f32 %v1094_v25, 0.0  ;;  %v1365_v10 = vmax.f32 %v1261_v51, 0.0 }
 0x1a4   : > { %v2759_v6 = vmax.f32 %v1481_v52, %v1355_v13  ;;  %v1336_v15 = vmax.f32 %v1145_v56, 0.0 }
 0x1a5   : > { %v2762_v14 = vmax.f32 %v1470_v43, %v1344_v34  ;;  %v1509_v25 = vmax.f32 %v2747_v26, %v1365_v10 }
 0x1a6   : > { %v1480_v4 = vmax.f32 %v1462_v23, %v1336_v15 }
 0x1a7   : > { %v1206_v8 = vpop.f32.mrf.mxu3 }
 0x1a8   : > { %v1095_v31 = vpop.f32.mrf.mxu1  ;;  %v1262_v11 = vpop.f32.mrf.mxu0 }
 0x1a9   : > { %v1147_v40 = vpop.f32.mrf.mxu2  ;;  %v1096_v39 = vadd.f32 %v1095_v31, %v2888_v54  ;;  %v1263_v15 = vadd.f32 %v1262_v11, %v2477_v27 }
 0x1aa   : > { %v1148_v55 = vadd.f32 %v1147_v40, %v2887_v37 }
 0x1ab   : > { %v1353_v30 = vmax.f32 %v1096_v39, 0.0 }
 0x1ac   : > { %v1345_v61 = vmax.f32 %v1148_v55, 0.0 }
 0x1ad   : > { %v2768_v63 = vmax.f32 %v1479_v9, %v1353_v30 }
 0x1ae   : > { %v2766_v41 = vmax.f32 %v1471_v32, %v1345_v61  ;;  %v1374_v61 = vmax.f32 %v1263_v15, 0.0 }
 0x1af   : > { %v1208_v20 = vpop.f32.mrf.mxu3 }
 0x1b0   : > { %v1098_v46 = vpop.f32.mrf.mxu1  ;;  %v1265_v19 = vpop.f32.mrf.mxu0 }
 0x1b1   : > { %v1149_v49 = vpop.f32.mrf.mxu2  ;;  %v1266_v7 = vadd.f32 %v1265_v19, %v2472_v24 }
 0x1b2   : > { %v1150_v52 = vadd.f32 %v1149_v49, %v2888_v54 }
 0x1b3   : > { %v1383_v48 = vmax.f32 %v1266_v7, 0.0 }
 0x1b4   : > { %v1354_v42 = vmax.f32 %v1150_v52, 0.0 }
 0x1b5   : > { %v1527_v34 = vmax.f32 %v1509_v25, %v1383_v48 }
 0x1b6   : > { %v2771_v45 = vmax.f32 %v1480_v4, %v1354_v42 }
 0x1b7   : > { %v1211_v37 = vpop.f32.mrf.mxu3 }
 0x1b8   : > { %v2773_v33 = vpop.f32.mrf.mxu1  ;;  %v1267_v23 = vpop.f32.mrf.mxu0 }
 0x1b9   : > { %v1152_v44 = vpop.f32.mrf.mxu2  ;;  %v1268_v4 = vadd.f32 %v1267_v23, %v2486_v59  ;;  %v1518_v23 = vmax.f32 %v2755_v2, %v1374_v61 }
 0x1ba   : > { %v1153_v2 = vadd.f32 %v1152_v44, %v2467_v21  ;;  %v1101_v44 = vadd.f32 %v2773_v33, %v2477_v27 }
 0x1bb   : > { %v1392_v19 = vmax.f32 %v1268_v4, 0.0 }
 0x1bd   : > { %v1536_v48 = vmax.f32 %v1518_v23, %v1392_v19 }
 0x1bf   : > { %v2775_v47 = vpop.f32.mrf.mxu3 }
 0x1c0   : > { %v1103_v53 = vpop.f32.mrf.mxu1  ;;  %v1270_v1 = vpop.f32.mrf.mxu0 }
 0x1c1   : > { %v2777_v43 = vpop.f32.mrf.mxu2  ;;  %v1271_v13 = vadd.f32 %v1270_v1, %v2491_v3  ;;  %v1207_v1 = vadd.f32 %v1206_v8, %v2467_v21 }
 0x1c3   : > { %v1401_v22 = vmax.f32 %v1271_v13, 0.0  ;;  %v1212_v13 = vadd.f32 %v1211_v37, %v2472_v24  ;;  %v1364_v15 = vmax.f32 %v1207_v1, 0.0 }
 0x1c5   : > { %v1545_v30 = vmax.f32 %v1527_v34, %v1401_v22 }
 0x1c7   : > { %v2779_v50 = vpop.f32.mrf.mxu3 }
 0x1c8   : > { %v2783_v5 = vpop.f32.mrf.mxu1  ;;  %v1272_v29 = vpop.f32.mrf.mxu0  ;;  %v1217_v1 = vadd.f32 %v2779_v50, %v2491_v3 }
 0x1c9   : > { %v2781_v57 = vpop.f32.mrf.mxu2  ;;  %v1273_v49 = vadd.f32 %v1272_v29, %v2489_v0  ;;  %v1209_v29 = vadd.f32 %v1208_v20, %v2477_v27  ;;  %v1106_v23 = vadd.f32 %v2783_v5, %v2486_v59 }
 0x1cb   : > { %v1410_v51 = vmax.f32 %v1273_v49, 0.0  ;;  %v1373_v37 = vmax.f32 %v1209_v29, 0.0  ;;  %v1214_v29 = vadd.f32 %v2775_v47, %v2486_v59 }
 0x1cd   : > { %v1554_v4 = vmax.f32 %v1536_v48, %v1410_v51 }
 0x1cf   : > { %v2787_v36 = vpop.f32.mrf.mxu3 }
 0x1d0   : > { %v1108_v54 = vpop.f32.mrf.mxu1  ;;  %v1275_v18 = vpop.f32.mrf.mxu0 }
 0x1d1   : > { %v2785_v35 = vpop.f32.mrf.mxu2  ;;  %v1276_v56 = vadd.f32 %v1275_v18, %v2498_v17  ;;  %v1099_v18 = vadd.f32 %v1098_v46, %v2467_v21  ;;  %v1363_v21 = vmax.f32 %v1153_v2, 0.0  ;;  %v1391_v2 = vmax.f32 %v1214_v29, 0.0 }
 0x1d3   : > { %v1419_v40 = vmax.f32 %v1276_v56, 0.0  ;;  %v1362_v34 = vmax.f32 %v1099_v18, 0.0 }
 0x1d5   : > { %v1563_v42 = vmax.f32 %v1545_v30, %v1419_v40  ;;  %v1109_v40 = vadd.f32 %v1108_v54, %v2491_v3  ;;  %v1506_v19 = vmax.f32 %v2762_v14, %v1362_v34  ;;  %v1160_v34 = vadd.f32 %v2785_v35, %v2486_v59 }
 0x1d7   : > { %v2797_v28 = vpop.f32.mrf.mxu3  ;;  %v1398_v54 = vmax.f32 %v1109_v40, 0.0 }
 0x1d8   : > { %v2793_v38 = vpop.f32.mrf.mxu1  ;;  %v1277_v9 = vpop.f32.mrf.mxu0 }
 0x1d9   : > { %v2791_v32 = vpop.f32.mrf.mxu2  ;;  %v1278_v26 = vadd.f32 %v1277_v9, %v2515_v60  ;;  %v1104_v9 = vadd.f32 %v1103_v53, %v2472_v24 }
 0x1da   : > { %v1163_v50 = vadd.f32 %v2791_v32, %v2491_v3  ;;  %v1389_v3 = vmax.f32 %v1106_v23, 0.0 }
 0x1db   : > { %v1428_v56 = vmax.f32 %v1278_v26, 0.0  ;;  %v1380_v61 = vmax.f32 %v1104_v9, 0.0  ;;  %v2826_v26 = vmax.f32 %v2759_v6, %v1373_v37  ;;  %v1371_v6 = vmax.f32 %v1101_v44, 0.0 }
 0x1dc   : > { %v1400_v9 = vmax.f32 %v1217_v1, 0.0 }
 0x1dd   : > { %v1572_v53 = vmax.f32 %v1554_v4, %v1428_v56 }
 0x1df   : > { %v2810_v7 = vpop.f32.mrf.mxu3 }
 0x1e0   : > { %v1113_v31 = vpop.f32.mrf.mxu1  ;;  %v1280_v39 = vpop.f32.mrf.mxu0 }
 0x1e1   : > { %v2802_v55 = vpop.f32.mrf.mxu2  ;;  %v1281_v52 = vadd.f32 %v1280_v39, %v2503_v62  ;;  %v1382_v39 = vmax.f32 %v1212_v13, 0.0  ;;  %v1114_v30 = vadd.f32 %v1113_v31, %v2498_v17  ;;  %v1158_v31 = vadd.f32 %v2781_v57, %v2472_v24 }
 0x1e2   : > { %v1222_v24 = vadd.f32 %v2797_v28, %v2498_v17  ;;  %v1111_v57 = vadd.f32 %v2793_v38, %v2489_v0  ;;  %v1515_v28 = vmax.f32 %v2768_v63, %v1371_v6  ;;  %v1399_v38 = vmax.f32 %v1163_v50, 0.0 }
 0x1e3   : > { %v1437_v11 = vmax.f32 %v1281_v52, 0.0  ;;  %v1508_v52 = vmax.f32 %v2751_v16, %v1364_v15  ;;  %v1524_v16 = vmax.f32 %v1506_v19, %v1380_v61  ;;  %v1416_v33 = vmax.f32 %v1114_v30, 0.0 }
 0x1e4   : > { %v1381_v47 = vmax.f32 %v1158_v31, 0.0  ;;  %v1418_v4 = vmax.f32 %v1222_v24, 0.0  ;;  %v1533_v37 = vmax.f32 %v1515_v28, %v1389_v3  ;;  %v1165_v59 = vadd.f32 %v2802_v55, %v2489_v0 }
 0x1e5   : > { %v1581_v10 = vmax.f32 %v1563_v42, %v1437_v11  ;;  %v1526_v11 = vmax.f32 %v1508_v52, %v1382_v39  ;;  %v1542_v48 = vmax.f32 %v1524_v16, %v1398_v54  ;;  %v2889_v39 = vld [vmem:[#allocation4_spill] sm:$0xff] }
 0x1e6   : > { %v1408_v23 = vmax.f32 %v1165_v59, 0.0 }
 0x1e7   : > { %v1595_v25 = vpack.c.bf16 %v1581_v10, %v1581_v10  ;;  %v1226_v18 = vpop.f32.mrf.mxu3  ;;  %v1507_v10 = vmax.f32 %v2766_v41, %v1363_v21  ;;  %v1155_v41 = vadd.f32 %v2777_v43, %v2477_v27  ;;  %v1560_v32 = vmax.f32 %v1542_v48, %v1416_v33 }
 0x1e8   : > { %v1115_v46 = vpop.f32.mrf.mxu1  ;;  %v1282_v22 = vpop.f32.mrf.mxu0  ;;  %v1407_v27 = vmax.f32 %v1111_v57, 0.0  ;;  %v1390_v21 = vmax.f32 %v1160_v34, 0.0 }
 0x1e9   : > { %v1167_v8 = vpop.f32.mrf.mxu2  ;;  %1606 = vst.msk [vmem:[%s2700_s8 + $0x20] sm:$0xf] %vm1605_vm0, %v1595_v25  ;;  %v1283_v20 = vadd.f32 %v1282_v22, %v2513_v58  ;;  %v1116_v25 = vadd.f32 %v1115_v46, %v2515_v60  ;;  %v1227_v22 = vadd.f32 %v1226_v18, %v2503_v62  ;;  %v1372_v40 = vmax.f32 %v1155_v41, 0.0 }
 0x1ea   : > { %v1168_v56 = vadd.f32 %v1167_v8, %v2498_v17  ;;  %v1525_v17 = vmax.f32 %v1507_v10, %v1381_v47  ;;  %v1219_v46 = vadd.f32 %v2787_v36, %v2489_v0  ;;  %v1551_v19 = vmax.f32 %v1533_v37, %v1407_v27 }
 0x1eb   : > { %v1446_v49 = vmax.f32 %v1283_v20, 0.0  ;;  %v1544_v20 = vmax.f32 %v1526_v11, %v1400_v9  ;;  %v1425_v63 = vmax.f32 %v1116_v25, 0.0  ;;  %v1436_v35 = vmax.f32 %v1227_v22, 0.0 }
 0x1ec   : > { %v1417_v8 = vmax.f32 %v1168_v56, 0.0  ;;  %v1543_v30 = vmax.f32 %v1525_v17, %v1399_v38  ;;  %v1224_v36 = vadd.f32 %v2810_v7, %v2515_v60  ;;  %v1516_v0 = vmax.f32 %v2771_v45, %v1372_v40 }
 0x1ed   : > { %v1590_v42 = vmax.f32 %v1572_v53, %v1446_v49  ;;  %v1562_v44 = vmax.f32 %v1544_v20, %v1418_v4  ;;  %v1409_v55 = vmax.f32 %v1219_v46, 0.0  ;;  %v1569_v16 = vmax.f32 %v1551_v19, %v1425_v63 }
 0x1ee   : > { %v1561_v11 = vmax.f32 %v1543_v30, %v1417_v8  ;;  %v1535_v10 = vmax.f32 %v2826_v26, %v1391_v2  ;;  %v1534_v7 = vmax.f32 %v1516_v0, %v1390_v21  ;;  %v1427_v29 = vmax.f32 %v1224_v36, 0.0 }
 0x1ef   : > { %v1600_v14 = vpack.c.bf16 %v1590_v42, %v1590_v42  ;;  %v1228_v54 = vpop.f32.mrf.mxu3  ;;  %v1580_v33 = vmax.f32 %v1562_v44, %v1436_v35 }
 0x1f0   : > { %v1118_v13 = vpop.f32.mrf.mxu1  ;;  %v1229_v18 = vadd.f32 %v1228_v54, %v2513_v58  ;;  %v1552_v48 = vmax.f32 %v1534_v7, %v1408_v23 }
 0x1f1   : > { %v1169_v51 = vpop.f32.mrf.mxu2  ;;  %1611 = vst.msk [vmem:[%s2700_s8 + $0x44] sm:$0xf] %vm1605_vm0, %v1600_v14  ;;  %v1119_v5 = vadd.f32 %v1118_v13, %v2503_v62  ;;  %v1553_v13 = vmax.f32 %v1535_v10, %v1409_v55 }
 0x1f2   : > { %v1170_v1 = vadd.f32 %v1169_v51, %v2515_v60  ;;  %v1445_v24 = vmax.f32 %v1229_v18, 0.0 }
 0x1f3   : > { %v1434_v15 = vmax.f32 %v1119_v5, 0.0  ;;  %v1571_v5 = vmax.f32 %v1553_v13, %v1427_v29 }
 0x1f4   : > { %v1426_v50 = vmax.f32 %v1170_v1, 0.0 }
 0x1f5   : > { %v1578_v43 = vmax.f32 %v1560_v32, %v1434_v15  ;;  %v1589_v26 = vmax.f32 %v1571_v5, %v1445_v24 }
 0x1f6   : > { %v1570_v41 = vmax.f32 %v1552_v48, %v1426_v50 }
 0x1f7   : > { %v1593_v61 = vpack.c.bf16 %v1578_v43, %v2889_v39 }
 0x1f8   : > { %v1120_v52 = vpop.f32.mrf.mxu1 }
 0x1f9   : > { %v1172_v53 = vpop.f32.mrf.mxu2  ;;  %1603 = vst [vmem:[%s2700_s8 + $0x10] sm:$0xff] %v1593_v61  ;;  %v1121_v42 = vadd.f32 %v1120_v52, %v2513_v58 }
 0x1fa   : > { %v1173_v49 = vadd.f32 %v1172_v53, %v2503_v62 }
 0x1fb   : > { %v1443_v62 = vmax.f32 %v1121_v42, 0.0 }
 0x1fc   : > { %v1435_v31 = vmax.f32 %v1173_v49, 0.0 }
 0x1fd   : > { %v1587_v6 = vmax.f32 %v1569_v16, %v1443_v62 }
 0x1fe   : > { %v1579_v14 = vmax.f32 %v1561_v11, %v1435_v31 }
 0x1ff   : > { %v1598_v45 = vpack.c.bf16 %v1587_v6, %v2654_v12 }
 0x200   : > { %v1594_v60 = vpack.c.bf16 %v1580_v33, %v1579_v14 }
 0x201   : > { %v1174_v51 = vpop.f32.mrf.mxu2  ;;  %1609 = vst [vmem:[%s2700_s8 + $0x34] sm:$0xff] %v1598_v45 }
 0x202   : > { %1604 = vst [vmem:[%s2700_s8 + $0x18] sm:$0xff] %v1594_v60  ;;  %v1175_v57 = vadd.f32 %v1174_v51, %v2513_v58 }
 0x204   : > { %v1444_v9 = vmax.f32 %v1175_v57, 0.0 }
 0x206   : > { %v1588_v47 = vmax.f32 %v1570_v41, %v1444_v9 }
 0x208   : > { %v1599_v56 = vpack.c.bf16 %v1589_v26, %v1588_v47 }
 0x20a   : > { %1610 = vst [vmem:[%s2700_s8 + $0x3c] sm:$0xff] %v1599_v56 }
 0x20b PF: > { %s13_s12 = sadd.s32 1, %s2130_s12  }
 0x20c   : > { %p10_p4 = scmp.ge.s32.totalorder %s13_s12, 4  }
 0x20e   :  { %12 = sbr.rel (!%p10_p4) target bundleno = 1 (0x1), region = 62 }

// kernel: cnn_forward.3
= control target key start
LH: loop header
LB: loop body
LE: loop exit
PB: predicated region body
PF: predicated region fallthrough
CT: control target
= control target key end

     0   :  { %12 = vsyncpa [#allocation3], 0  ;;  %s12306_s0 = inlined_call_operand.vmem [shape: bf16[2,256,256], index: 0, kind: input, shape index: {}]   ;;  %s12307_s1 = inlined_call_operand.vmem [shape: bf16[128,256], index: 1, kind: input, shape index: {}]   ;;  %s12308_s2 = inlined_call_operand.vmem [shape: f32[128,1], index: 2, kind: input, shape index: {}]   ;;  %s12309_s3 = inlined_call_operand.vmem [shape: bf16[32,256,128], index: 3, kind: input, shape index: {}]   ;;  %s12310_s4 = inlined_call_operand.vmem [shape: f32[1,128], index: 4, kind: input, shape index: {}]   ;;  %s12311_s5 = inlined_call_operand.vmem [shape: f32[128,10], index: 5, kind: input, shape index: {}]   ;;  %s12312_s6 = inlined_call_operand.vmem [shape: f32[1,10], index: 6, kind: input, shape index: {}]   ;;  %s12313_s7 = inlined_call_operand.hbm [shape: f32[2,1,10], index: 7, kind: output, shape index: {}]  }
   0x1   :  { %14 = vsyncpa [#allocation3 + $0x1], 0  ;;  %s10120_s24 = smov 0   ;;  %s10122_s25 = smov 0  }
   0x2   :  { %s10124_s26 = smov 0   ;;  %s10126_s27 = smov 0  }
   0x3 LB: > { %s10141_s28 = sadd.s32 4294967295, %s10077_s27   ;;  %s6171_s29 = sadd.s32 4294967294, %s10077_s27   ;;  %s10077_s27 = sphi %s10126_s27, %s12319_s27   ;;  %s10073_s26 = sphi %s10124_s26, %s12318_s26   ;;  %s10069_s25 = sphi %s10122_s25, %s12317_s25   ;;  %s10065_s24 = sphi %s10120_s24, %s12316_s24  }
   0x4   : > { %s10145_s30 = sadd.s32 1, %s10077_s27   ;;  %s179_s8 = sadd.s32 1, %s10073_s26 }
   0x5   : > { %s176_s9 = ssub.s32 %s10077_s27, %s10145_s30  ;;  %p189_p0 = scmp.ne.s32.totalorder %s10073_s26, %s10069_s25 }
   0x6   : > { %p177_p1 = scmp.eq.s32.totalorder %s176_s9, 0  ;;  %p190_p2 = scmp.eq.s32.totalorder %s10141_s28, 1 }
   0x7   : > { %p195_p3 = scmp.ne.s32.totalorder %s10069_s25, %s10065_s24  ;;  %p196_p4 = scmp.eq.s32.totalorder %s6171_s29, 1 }
   0x8   : > { %s10156_s10 = scalar_select %p177_p1, %s10073_s26, %s179_s8  }
   0x9   : > { %p10158_p5 = por %p190_p2, %p189_p0  ;;  %p10162_p6 = por %p196_p4, %p195_p3 }
   0xa   : > { %p6174_p7 = scmp.ge.s32.totalorder %s10077_s27, 1  ;;  %p240_p8 = scmp.lt.s32.totalorder %s10077_s27, 3 }
   0xc   : > { %p241_p9 = pnand %p6174_p7, %p240_p8 }
   0xd   : > { %p271_p10 = scmp.lt.s32.totalorder (!%p241_p9), %s10141_s28, 1  ;;  %s269_s29 = sand.u32 (!%p241_p9), 1, %s10069_s25  }
   0xe   : > { %244 = sbr.rel (%p241_p9) target bundleno = 1019 (0x3fb), region = 48  ;;  %s270_s16 = scalar_lea.vmem (!%p241_p9), [#allocation2], %s269_s29 }
   0xf   : > { %s6104_s19 = scalar_lea.sflag (!%p241_p9), [#allocation3], %s269_s29  ;;  %s10035_s23 = scalar_lea.hbm (!%p241_p9), %s12313_s7, 2 }
  0x13   : > { %s272_s13 = scalar_select %p271_p10, %s10141_s28, 1  ;;  %vm6101_vm0 = vcmask 73728  }
  0x15   : > { %s9411_s14 = sshll.u32 %s272_s13, 8  ;;  %s6112_s13 = scalar_lea.hbm %s12313_s7, %s10141_s28 }
  0x16   : > { %s10173_s17 = scalar_lea.vmem %s12306_s0, %s9411_s14  ;;  %s6116_s18 = sshll.u32 %s6112_s13, 4  ;;  %s6117_s18 = int_to_ptr.hbm [resolvable:$true] %s6116_s18 }
  0x17   : > { %v6299_v0 = vld [vmem:[%s10173_s17 + $0x70] sm:$0xf]  ;;  %v9443_v1 = vld [vmem:[%s10173_s17 + $0x74] sm:$0xf0]  ;;  %v9442_v5 = vld [vmem:[%s10173_s17 + $0x74] sm:$0xf] }
  0x18   : > { %v6363_v2 = vld [vmem:[%s10173_s17 + $0xf0] sm:$0xf]  ;;  %v6300_v3 = vor.u32 %v9443_v1, %v6299_v0  ;;  %v9459_v4 = vld [vmem:[%s10173_s17 + $0xf4] sm:$0xf0]  ;;  %v6301_v6 = vld [vmem:[%s10173_s17 + $0x78] sm:$0xf0] }
  0x19   : > { %v6364_v7 = vor.u32 %v9459_v4, %v6363_v2  ;;  %v6304_v8 = vor.u32 %v9442_v5, %v6301_v6  ;;  %v9458_v9 = vld [vmem:[%s10173_s17 + $0xf4] sm:$0xf]  ;;  %v6365_v10 = vld [vmem:[%s10173_s17 + $0xf8] sm:$0xf0]  ;;  %v6291_v11 = vld [vmem:[%s10173_s17 + $0x60] sm:$0xf] }
  0x1a   : > { %660 = vmatpush.bf16.msra.mxu0 %v6300_v3  ;;  %v6368_v12 = vor.u32 %v9458_v9, %v6365_v10  ;;  %v9441_v13 = vld [vmem:[%s10173_s17 + $0x64] sm:$0xf0]  ;;  %v6355_v14 = vld [vmem:[%s10173_s17 + $0xe0] sm:$0xf]  ;;  %v9440_v18 = vld [vmem:[%s10173_s17 + $0x64] sm:$0xf] }
  0x1b   : > { %v9457_v15 = vld [vmem:[%s10173_s17 + $0xe4] sm:$0xf0]  ;;  %709 = vmatpush.bf16.msra.mxu1 %v6364_v7  ;;  %758 = vmatpush.bf16.msra.mxu2 %v6304_v8  ;;  %v6292_v16 = vor.u32 %v9441_v13, %v6291_v11  ;;  %v6293_v19 = vld [vmem:[%s10173_s17 + $0x68] sm:$0xf0]  ;;  %v9456_v20 = vld [vmem:[%s10173_s17 + $0xe4] sm:$0xf] }
  0x1c   : > { %v6356_v17 = vor.u32 %v9457_v15, %v6355_v14  ;;  %807 = vmatpush.bf16.msra.mxu3 %v6368_v12  ;;  %v6296_v21 = vor.u32 %v9440_v18, %v6293_v19  ;;  %v6357_v22 = vld [vmem:[%s10173_s17 + $0xe8] sm:$0xf0]  ;;  %v6283_v23 = vld [vmem:[%s10173_s17 + $0x50] sm:$0xf]  ;;  %v9439_v24 = vld [vmem:[%s10173_s17 + $0x54] sm:$0xf0] }
  0x1d   : > { %v6360_v25 = vor.u32 %v9456_v20, %v6357_v22  ;;  %v6347_v26 = vld [vmem:[%s10173_s17 + $0xd0] sm:$0xf]  ;;  %v9455_v27 = vld [vmem:[%s10173_s17 + $0xd4] sm:$0xf0]  ;;  %v9438_v28 = vld [vmem:[%s10173_s17 + $0x54] sm:$0xf]  ;;  %v6284_v29 = vor.u32 %v9439_v24, %v6283_v23 }
  0x1e   : > { %661 = vmatpush.bf16.msra.mxu0 %v6292_v16  ;;  %v6285_v30 = vld [vmem:[%s10173_s17 + $0x58] sm:$0xf0]  ;;  %v9454_v31 = vld [vmem:[%s10173_s17 + $0xd4] sm:$0xf]  ;;  %v6348_v33 = vor.u32 %v9455_v27, %v6347_v26  ;;  %v6275_v35 = vld [vmem:[%s10173_s17 + $0x40] sm:$0xf] }
  0x1f   : > { %v6349_v32 = vld [vmem:[%s10173_s17 + $0xd8] sm:$0xf0]  ;;  %710 = vmatpush.bf16.msra.mxu1 %v6356_v17  ;;  %759 = vmatpush.bf16.msra.mxu2 %v6296_v21  ;;  %v6288_v34 = vor.u32 %v9438_v28, %v6285_v30  ;;  %v9437_v36 = vld [vmem:[%s10173_s17 + $0x44] sm:$0xf0]  ;;  %v6339_v37 = vld [vmem:[%s10173_s17 + $0xc0] sm:$0xf] }
  0x20   : > { %808 = vmatpush.bf16.msra.mxu3 %v6360_v25  ;;  %v6352_v38 = vor.u32 %v9454_v31, %v6349_v32  ;;  %v9453_v39 = vld [vmem:[%s10173_s17 + $0xc4] sm:$0xf0]  ;;  %v9436_v40 = vld [vmem:[%s10173_s17 + $0x44] sm:$0xf]  ;;  %v6277_v41 = vld [vmem:[%s10173_s17 + $0x48] sm:$0xf0]  ;;  %v6276_v44 = vor.u32 %v9437_v36, %v6275_v35 }
  0x21   : > { %v9452_v42 = vld [vmem:[%s10173_s17 + $0xc4] sm:$0xf]  ;;  %v6341_v43 = vld [vmem:[%s10173_s17 + $0xc8] sm:$0xf0]  ;;  %v6340_v45 = vor.u32 %v9453_v39, %v6339_v37  ;;  %v6280_v46 = vor.u32 %v9436_v40, %v6277_v41  ;;  %v6267_v47 = vld [vmem:[%s10173_s17 + $0x30] sm:$0xf] }
  0x22   : > { %662 = vmatpush.bf16.msra.mxu0 %v6284_v29  ;;  %v9435_v48 = vld [vmem:[%s10173_s17 + $0x34] sm:$0xf0]  ;;  %v6331_v49 = vld [vmem:[%s10173_s17 + $0xb0] sm:$0xf]  ;;  %v6344_v50 = vor.u32 %v9452_v42, %v6341_v43  ;;  %v9434_v52 = vld [vmem:[%s10173_s17 + $0x34] sm:$0xf] }
  0x23   : > { %711 = vmatpush.bf16.msra.mxu1 %v6348_v33  ;;  %760 = vmatpush.bf16.msra.mxu2 %v6288_v34  ;;  %v9451_v51 = vld [vmem:[%s10173_s17 + $0xb4] sm:$0xf0]  ;;  %v6269_v53 = vld [vmem:[%s10173_s17 + $0x38] sm:$0xf0]  ;;  %v9450_v54 = vld [vmem:[%s10173_s17 + $0xb4] sm:$0xf]  ;;  %v6268_v56 = vor.u32 %v9435_v48, %v6267_v47 }
  0x24   : > { %809 = vmatpush.bf16.msra.mxu3 %v6352_v38  ;;  %v6333_v55 = vld [vmem:[%s10173_s17 + $0xb8] sm:$0xf0]  ;;  %v6332_v57 = vor.u32 %v9451_v51, %v6331_v49  ;;  %v6272_v58 = vor.u32 %v9434_v52, %v6269_v53  ;;  %v6259_v59 = vld [vmem:[%s10173_s17 + $0x20] sm:$0xf]  ;;  %v9433_v60 = vld [vmem:[%s10173_s17 + $0x24] sm:$0xf0] }
  0x25   : > { %v6323_v61 = vld [vmem:[%s10173_s17 + $0xa0] sm:$0xf]  ;;  %v6336_v62 = vor.u32 %v9450_v54, %v6333_v55  ;;  %v9449_v63 = vld [vmem:[%s10173_s17 + $0xa4] sm:$0xf0]  ;;  %v9432_v0 = vld [vmem:[%s10173_s17 + $0x24] sm:$0xf]  ;;  %v6260_v4 = vor.u32 %v9433_v60, %v6259_v59 }
  0x26   : > { %663 = vmatpush.bf16.msra.mxu0 %v6276_v44  ;;  %v6261_v1 = vld [vmem:[%s10173_s17 + $0x28] sm:$0xf0]  ;;  %v9448_v2 = vld [vmem:[%s10173_s17 + $0xa4] sm:$0xf]  ;;  %v6324_v5 = vor.u32 %v9449_v63, %v6323_v61  ;;  %v6251_v7 = vld [vmem:[%s10173_s17 + $0x10] sm:$0xf] }
  0x27   : > { %712 = vmatpush.bf16.msra.mxu1 %v6340_v45  ;;  %761 = vmatpush.bf16.msra.mxu2 %v6280_v46  ;;  %v6325_v3 = vld [vmem:[%s10173_s17 + $0xa8] sm:$0xf0]  ;;  %v6264_v6 = vor.u32 %v9432_v0, %v6261_v1  ;;  %v9431_v8 = vld [vmem:[%s10173_s17 + $0x14] sm:$0xf0]  ;;  %v6315_v9 = vld [vmem:[%s10173_s17 + $0x90] sm:$0xf] }
  0x28   : > { %810 = vmatpush.bf16.msra.mxu3 %v6344_v50  ;;  %v6328_v10 = vor.u32 %v9448_v2, %v6325_v3  ;;  %v9447_v11 = vld [vmem:[%s10173_s17 + $0x94] sm:$0xf0]  ;;  %v9430_v12 = vld [vmem:[%s10173_s17 + $0x14] sm:$0xf]  ;;  %v6253_v13 = vld [vmem:[%s10173_s17 + $0x18] sm:$0xf0]  ;;  %v6252_v17 = vor.u32 %v9431_v8, %v6251_v7 }
  0x29   : > { %v9446_v14 = vld [vmem:[%s10173_s17 + $0x94] sm:$0xf]  ;;  %v6317_v15 = vld [vmem:[%s10173_s17 + $0x98] sm:$0xf0]  ;;  %v324_v16 = vld [vmem:[%s12308_s2] sm:$0xff]  ;;  %v10079_v18 = vmov 0   ;;  %v6316_v19 = vor.u32 %v9447_v11, %v6315_v9  ;;  %v6256_v20 = vor.u32 %v9430_v12, %v6253_v13 }
  0x2a   : > { %664 = vmatpush.bf16.msra.mxu0 %v6268_v56  ;;  %10012 = vset.pattern.permute.xlu0 %v10079_v18  ;;  %v6243_v21 = vld [vmem:[%s10173_s17] sm:$0xf]  ;;  %v9429_v22 = vld [vmem:[%s10173_s17 + $0x4] sm:$0xf0]  ;;  %v6320_v24 = vor.u32 %v9446_v14, %v6317_v15  ;;  %v9428_v26 = vld [vmem:[%s10173_s17 + $0x4] sm:$0xf] }
  0x2b   : > { %713 = vmatpush.bf16.msra.mxu1 %v6332_v57  ;;  %762 = vmatpush.bf16.msra.mxu2 %v6272_v58  ;;  %v6307_v23 = vld [vmem:[%s10173_s17 + $0x80] sm:$0xf]  ;;  %v9445_v25 = vld [vmem:[%s10173_s17 + $0x84] sm:$0xf0]  ;;  %v6245_v27 = vld [vmem:[%s10173_s17 + $0x8] sm:$0xf0]  ;;  %v6244_v30 = vor.u32 %v9429_v22, %v6243_v21 }
  0x2c   : > { %811 = vmatpush.bf16.msra.mxu3 %v6336_v62  ;;  %342 = vperm.xlu0 %10012, %v324_v16   ;;  %v9444_v28 = vld [vmem:[%s10173_s17 + $0x84] sm:$0xf]  ;;  %v6309_v29 = vld [vmem:[%s10173_s17 + $0x88] sm:$0xf0]  ;;  %v6179_v31 = vld [vmem:[%s12307_s1] sm:$0xf]  ;;  %v6308_v33 = vor.u32 %v9445_v25, %v6307_v23  ;;  %v6248_v34 = vor.u32 %v9428_v26, %v6245_v27 }
  0x2d   : > { %10013 = vset.pattern.permute.xlu1 %v10079_v18  ;;  %10014 = vset.pattern.permute.xlu2 %v10079_v18  ;;  %v9413_v32 = vld [vmem:[%s12307_s1 + $0x4] sm:$0xf0]  ;;  %v9412_v35 = vld [vmem:[%s12307_s1 + $0x4] sm:$0xf]  ;;  %v6181_v36 = vld [vmem:[%s12307_s1 + $0x8] sm:$0xf0]  ;;  %v6312_v37 = vor.u32 %v9444_v28, %v6309_v29 }
  0x2e   : > { %665 = vmatpush.bf16.msra.mxu0 %v6260_v4  ;;  %v6180_v38 = vor.u32 %v9413_v32, %v6179_v31  ;;  %v328_v39 = vld [vmem:[%s12308_s2 + $0x20] sm:$0xff]  ;;  %v6184_v40 = vor.u32 %v9412_v35, %v6181_v36  ;;  %v325_v42 = vld [vmem:[%s12308_s2 + $0x8] sm:$0xff]  ;;  %v6187_v45 = vld [vmem:[%s12307_s1 + $0x10] sm:$0xf]  ;;  %s6114_s17 = sshll.u32 %s270_s16, 4  ;;  %s10029_s20 = sshra.s32 %s6117_s18, 4  ;;  %s6115_s17 = int_to_ptr.vmem [resolvable:$true] %s6114_s17  ;;  %s10030_s20 = int_to_ptr.hbm [resolvable:$true] %s10029_s20 }
  0x2f   : > { %714 = vmatpush.bf16.msra.mxu1 %v6324_v5  ;;  %763 = vmatpush.bf16.msra.mxu2 %v6264_v6  ;;  %v332_v41 = vld [vmem:[%s12308_s2 + $0x40] sm:$0xff]  ;;  %v333_v43 = vld [vmem:[%s12308_s2 + $0x48] sm:$0xff]  ;;  %v9415_v46 = vld [vmem:[%s12307_s1 + $0x14] sm:$0xf0]  ;;  %s10031_s21 = scalar_lea.hbm %s10030_s20, 1  ;;  %p10036_p0 = scmp.lt.s32.totalorder %s10030_s20, %s12313_s7 }
  0x30   : > { %812 = vmatpush.bf16.msra.mxu3 %v6328_v10  ;;  %382 = vperm.xlu1 %10013, %v332_v41   ;;  %v336_v44 = vld [vmem:[%s12308_s2 + $0x60] sm:$0xff]  ;;  %v9414_v47 = vld [vmem:[%s12307_s1 + $0x14] sm:$0xf]  ;;  %v6189_v48 = vld [vmem:[%s12307_s1 + $0x18] sm:$0xf0]  ;;  %v6188_v49 = vor.u32 %v9415_v46, %v6187_v45  ;;  %p10032_p11 = scmp.ne.s32.totalorder %s10030_s20, %s10031_s21  ;;  %p10037_p1 = scmp.lt.s32.totalorder %s10035_s23, %s10031_s21 }
  0x31   : > { %347 = vperm.xlu2 %10014, %v325_v42   ;;  %v330_v50 = vld [vmem:[%s12308_s2 + $0x30] sm:$0xff]  ;;  %v6192_v51 = vor.u32 %v9414_v47, %v6189_v48  ;;  %v329_v52 = vld [vmem:[%s12308_s2 + $0x28] sm:$0xff]  ;;  %v327_v54 = vld [vmem:[%s12308_s2 + $0x18] sm:$0xff] }
  0x32   : > { %666 = vmatpush.bf16.msra.mxu0 %v6252_v17  ;;  %v337_v53 = vld [vmem:[%s12308_s2 + $0x68] sm:$0xff]  ;;  %v326_v55 = vld [vmem:[%s12308_s2 + $0x10] sm:$0xff]  ;;  %v6195_v57 = vld [vmem:[%s12307_s1 + $0x20] sm:$0xf]  ;;  %p10033_p12 = pnand %p10032_p11, %p10158_p5  ;;  %p10038_p2 = por %p10037_p1, %p10036_p0 }
  0x33   : > { %715 = vmatpush.bf16.msra.mxu1 %v6316_v19  ;;  %764 = vmatpush.bf16.msra.mxu2 %v6256_v20  ;;  %v334_v56 = vld [vmem:[%s12308_s2 + $0x50] sm:$0xff]  ;;  %v9417_v58 = vld [vmem:[%s12307_s1 + $0x24] sm:$0xf0]  ;;  %v9416_v59 = vld [vmem:[%s12307_s1 + $0x24] sm:$0xf] }
  0x34   : > { %813 = vmatpush.bf16.msra.mxu3 %v6320_v24  ;;  %362 = vperm.xlu0 %10012, %v328_v39   ;;  %v6197_v60 = vld [vmem:[%s12307_s1 + $0x28] sm:$0xf0]  ;;  %v6196_v61 = vor.u32 %v9417_v58, %v6195_v57  ;;  %v331_v63 = vld [vmem:[%s12308_s2 + $0x38] sm:$0xff]  ;;  %v6203_v0 = vld [vmem:[%s12307_s1 + $0x30] sm:$0xf]  ;;  %p10034_p13 = pneg %p10033_p12 }
  0x35   : > { %v6200_v62 = vor.u32 %v9416_v59, %v6197_v60  ;;  %v9419_v1 = vld [vmem:[%s12307_s1 + $0x34] sm:$0xf0]  ;;  %v9418_v2 = vld [vmem:[%s12307_s1 + $0x34] sm:$0xf]  ;;  %v6205_v3 = vld [vmem:[%s12307_s1 + $0x38] sm:$0xf0] }
  0x36   : > { %667 = vmatpush.bf16.msra.mxu0 %v6244_v30  ;;  %v6204_v4 = vor.u32 %v9419_v1, %v6203_v0  ;;  %v6208_v5 = vor.u32 %v9418_v2, %v6205_v3  ;;  %v6211_v6 = vld [vmem:[%s12307_s1 + $0x40] sm:$0xf]  ;;  %v9421_v7 = vld [vmem:[%s12307_s1 + $0x44] sm:$0xf0]  ;;  %v9420_v8 = vld [vmem:[%s12307_s1 + $0x44] sm:$0xf]  ;;  %p10039_p3 = pnand %p10038_p2, %p10034_p13 }
  0x37   : > { %716 = vmatpush.bf16.msra.mxu1 %v6308_v33  ;;  %765 = vmatpush.bf16.msra.mxu2 %v6248_v34  ;;  %v6213_v9 = vld [vmem:[%s12307_s1 + $0x48] sm:$0xf0]  ;;  %v6212_v10 = vor.u32 %v9421_v7, %v6211_v6  ;;  %v339_v12 = vld [vmem:[%s12308_s2 + $0x78] sm:$0xff]  ;;  %v6219_v13 = vld [vmem:[%s12307_s1 + $0x50] sm:$0xf] }
  0x38   : > { %814 = vmatpush.bf16.msra.mxu3 %v6312_v37  ;;  %402 = vperm.xlu1 %10013, %v336_v44   ;;  %v6216_v11 = vor.u32 %v9420_v8, %v6213_v9  ;;  %v9423_v14 = vld [vmem:[%s12307_s1 + $0x54] sm:$0xf0]  ;;  %v9422_v15 = vld [vmem:[%s12307_s1 + $0x54] sm:$0xf]  ;;  %v6221_v16 = vld [vmem:[%s12307_s1 + $0x58] sm:$0xf0] }
  0x39   : > { %668 = vmatmul.bf16.vlgmr.msra.gmra.mxu0 %v6180_v38  ;;  %367 = vperm.xlu2 %10014, %v329_v52   ;;  %v6220_v17 = vor.u32 %v9423_v14, %v6219_v13  ;;  %v6224_v18 = vor.u32 %v9422_v15, %v6221_v16  ;;  %v338_v19 = vld [vmem:[%s12308_s2 + $0x70] sm:$0xff]  ;;  %v335_v20 = vld [vmem:[%s12308_s2 + $0x58] sm:$0xff]  ;;  %v6227_v21 = vld [vmem:[%s12307_s1 + $0x60] sm:$0xf] }
  0x3a   : > { %717 = vmatmul.bf16.vlgmr.msra.gmra.mxu1 %v6184_v40  ;;  %766 = vmatmul.bf16.vlgmr.msra.gmra.mxu2 %v6180_v38  ;;  %v9425_v22 = vld [vmem:[%s12307_s1 + $0x64] sm:$0xf0]  ;;  %v9424_v23 = vld [vmem:[%s12307_s1 + $0x64] sm:$0xf]  ;;  %v6229_v24 = vld [vmem:[%s12307_s1 + $0x68] sm:$0xf0] }
  0x3b   : > { %815 = vmatmul.bf16.vlgmr.msra.gmra.mxu3 %v6184_v40  ;;  %v6228_v25 = vor.u32 %v9425_v22, %v6227_v21  ;;  %v6232_v26 = vor.u32 %v9424_v23, %v6229_v24  ;;  %v6235_v27 = vld [vmem:[%s12307_s1 + $0x70] sm:$0xf]  ;;  %v9427_v28 = vld [vmem:[%s12307_s1 + $0x74] sm:$0xf0]  ;;  %v9426_v29 = vld [vmem:[%s12307_s1 + $0x74] sm:$0xf] }
  0x3c   : > { %387 = vperm.xlu0 %10012, %v333_v43   ;;  %v6237_v30 = vld [vmem:[%s12307_s1 + $0x78] sm:$0xf0]  ;;  %v6236_v31 = vor.u32 %v9427_v28, %v6235_v27  ;;  %v9466_v1 = vld [vmem:[%s12309_s3 + $0x30] sm:$0xff]  ;;  %v9465_v8 = vld [vmem:[%s12309_s3 + $0x28] sm:$0xff] }
  0x3d   : > { %v6240_v32 = vor.u32 %v9426_v29, %v6237_v30  ;;  %v9467_v60 = vld [vmem:[%s12309_s3 + $0x38] sm:$0xff]  ;;  %v9474_v2 = vld [vmem:[%s12309_s3 + $0x70] sm:$0xff]  ;;  %v9473_v9 = vld [vmem:[%s12309_s3 + $0x68] sm:$0xff] }
  0x3e   : > { %1214 = vmatpush.bf16.msrb.mxu2 %v9467_v60  ;;  %v9482_v6 = vld [vmem:[%s12309_s3 + $0xb0] sm:$0xff]  ;;  %v9464_v14 = vld [vmem:[%s12309_s3 + $0x20] sm:$0xff]  ;;  %v9463_v21 = vld [vmem:[%s12309_s3 + $0x18] sm:$0xff] }
  0x3f   : > { %v9490_v7 = vld [vmem:[%s12309_s3 + $0xf0] sm:$0xff]  ;;  %v9472_v15 = vld [vmem:[%s12309_s3 + $0x60] sm:$0xff]  ;;  %v9471_v22 = vld [vmem:[%s12309_s3 + $0x58] sm:$0xff] }
  0x40   : > { %407 = vperm.xlu1 %10013, %v337_v53   ;;  %v9479_v23 = vld [vmem:[%s12309_s3 + $0x98] sm:$0xff]  ;;  %v9462_v27 = vld [vmem:[%s12309_s3 + $0x10] sm:$0xff] }
  0x41   : > { %352 = vperm.xlu2 %10014, %v326_v55   ;;  %v9487_v24 = vld [vmem:[%s12309_s3 + $0xd8] sm:$0xff]  ;;  %v9470_v28 = vld [vmem:[%s12309_s3 + $0x50] sm:$0xff] }
  0x42   : > { %1215 = vmatpush.bf16.msrb.mxu2 %v9466_v1 }
  0x44   : > { %372 = vperm.xlu0 %10012, %v330_v50  }
  0x46   : > { %1216 = vmatpush.bf16.msrb.mxu2 %v9465_v8  ;;  %v9499_v8 = vld [vmem:[%s12309_s3 + $0x138] sm:$0xff] }
  0x48   : > { %392 = vperm.xlu1 %10013, %v334_v56  }
  0x49   : > { %673 = vmatmul.bf16.gmra.mxu0 %v6188_v49  ;;  %412 = vperm.xlu2 %10014, %v338_v19   ;;  %v9480_v19 = vld [vmem:[%s12309_s3 + $0xa0] sm:$0xff] }
  0x4a   : > { %722 = vmatmul.bf16.gmra.mxu1 %v6192_v51  ;;  %771 = vmatmul.bf16.gmra.mxu2 %v6188_v49 }
  0x4b   : > { %820 = vmatmul.bf16.gmra.mxu3 %v6192_v51  ;;  %1217 = vmatpush.bf16.msrb.mxu2 %v9464_v14 }
  0x4c   : > { %357 = vperm.xlu0 %10012, %v327_v54  }
  0x4f   : > { %1218 = vmatpush.bf16.msrb.mxu2 %v9463_v21  ;;  %v9498_v21 = vld [vmem:[%s12309_s3 + $0x130] sm:$0xff] }
  0x50   : > { %377 = vperm.xlu1 %10013, %v331_v63   ;;  %v9491_v63 = vld [vmem:[%s12309_s3 + $0xf8] sm:$0xff] }
  0x51   : > { %397 = vperm.xlu2 %10014, %v335_v20   ;;  %1103 = vmatpush.bf16.msrb.mxu1 %v9491_v63  ;;  %v9488_v20 = vld [vmem:[%s12309_s3 + $0xe0] sm:$0xff]  ;;  %v9523_v63 = vld [vmem:[%s12309_s3 + $0x1f8] sm:$0xff] }
  0x53   : > { %1219 = vmatpush.bf16.msrb.mxu2 %v9462_v27  ;;  %v9521_v27 = vld [vmem:[%s12309_s3 + $0x1e8] sm:$0xff] }
  0x54   : > { %417 = vperm.xlu0 %10012, %v339_v12   ;;  %v9489_v12 = vld [vmem:[%s12309_s3 + $0xe8] sm:$0xff] }
  0x55   : > { %1104 = vmatpush.bf16.msrb.mxu1 %v9490_v7 }
  0x59   : > { %678 = vmatmul.bf16.gmra.mxu0 %v6196_v61  ;;  %1105 = vmatpush.bf16.msrb.mxu1 %v9489_v12 }
  0x5a   : > { %727 = vmatmul.bf16.gmra.mxu1 %v6200_v62  ;;  %776 = vmatmul.bf16.gmra.mxu2 %v6196_v61  ;;  %v9475_v61 = vld [vmem:[%s12309_s3 + $0x78] sm:$0xff] }
  0x5b   : > { %825 = vmatmul.bf16.gmra.mxu3 %v6200_v62  ;;  %v9483_v62 = vld [vmem:[%s12309_s3 + $0xb8] sm:$0xff] }
  0x5c   : > { %1227 = vmatpush.bf16.msrb.mxu3 %v9475_v61  ;;  %1090 = vmatpush.bf16.msrb.mxu0 %v9483_v62  ;;  %v9515_v62 = vld [vmem:[%s12309_s3 + $0x1b8] sm:$0xff] }
  0x5d   : > { %1106 = vmatpush.bf16.msrb.mxu1 %v9488_v20 }
  0x60   : > { %1228 = vmatpush.bf16.msrb.mxu3 %v9474_v2  ;;  %1091 = vmatpush.bf16.msrb.mxu0 %v9482_v6  ;;  %v9476_v2 = vld [vmem:[%s12309_s3 + $0x80] sm:$0xff] }
  0x61   : > { %1107 = vmatpush.bf16.msrb.mxu1 %v9487_v24  ;;  %v9484_v6 = vld [vmem:[%s12309_s3 + $0xc0] sm:$0xff] }
  0x64   : > { %1229 = vmatpush.bf16.msrb.mxu3 %v9473_v9  ;;  %v9507_v9 = vld [vmem:[%s12309_s3 + $0x178] sm:$0xff] }
  0x68   : > { %1230 = vmatpush.bf16.msrb.mxu3 %v9472_v15  ;;  %v9514_v15 = vld [vmem:[%s12309_s3 + $0x1b0] sm:$0xff] }
  0x69   : > { %683 = vmatmul.bf16.gmra.mxu0 %v6204_v4 }
  0x6a   : > { %732 = vmatmul.bf16.gmra.mxu1 %v6208_v5  ;;  %781 = vmatmul.bf16.gmra.mxu2 %v6204_v4 }
  0x6b   : > { %830 = vmatmul.bf16.gmra.mxu3 %v6208_v5 }
  0x6c   : > { %1231 = vmatpush.bf16.msrb.mxu3 %v9471_v22 }
  0x70   : > { %1232 = vmatpush.bf16.msrb.mxu3 %v9470_v28 }
  0x79   : > { %688 = vmatmul.bf16.gmra.mxu0 %v6212_v10 }
  0x7a   : > { %737 = vmatmul.bf16.gmra.mxu1 %v6216_v11  ;;  %786 = vmatmul.bf16.gmra.mxu2 %v6212_v10 }
  0x7b   : > { %835 = vmatmul.bf16.gmra.mxu3 %v6216_v11  ;;  %v9481_v11 = vld [vmem:[%s12309_s3 + $0xa8] sm:$0xff] }
  0x7c   : > { %1092 = vmatpush.bf16.msrb.mxu0 %v9481_v11 }
  0x80   : > { %1093 = vmatpush.bf16.msrb.mxu0 %v9480_v19  ;;  %v9522_v19 = vld [vmem:[%s12309_s3 + $0x1f0] sm:$0xff] }
  0x84   : > { %1094 = vmatpush.bf16.msrb.mxu0 %v9479_v23 }
  0x89   : > { %693 = vmatmul.bf16.gmra.mxu0 %v6220_v17 }
  0x8a   : > { %742 = vmatmul.bf16.gmra.mxu1 %v6224_v18  ;;  %791 = vmatmul.bf16.gmra.mxu2 %v6220_v17 }
  0x8b   : > { %840 = vmatmul.bf16.gmra.mxu3 %v6224_v18  ;;  %v10383_v33 = vpop.permute.xlu2 %347 }
  0x93   : > { %v10387_v39 = vpop.permute.xlu2 %367 }
  0x99   : > { %698 = vmatmul.bf16.gmra.mxu0 %v6228_v25 }
  0x9a   : > { %747 = vmatmul.bf16.gmra.mxu1 %v6232_v26  ;;  %796 = vmatmul.bf16.gmra.mxu2 %v6228_v25 }
  0x9b   : > { %845 = vmatmul.bf16.gmra.mxu3 %v6232_v26  ;;  %v353_v46 = vpop.permute.xlu2 %352 }
  0x9e   : > { %v343_v34 = vpop.permute.xlu0 %342 }
  0xa6   : > { %v10407_v59 = vpop.permute.xlu0 %362 }
  0xa9   : > { %703 = vmatmul.bf16.gmra.mxu0 %v6236_v31 }
  0xaa   : > { %801 = vmatmul.bf16.gmra.mxu2 %v6236_v31  ;;  %752 = vmatmul.bf16.gmra.mxu1 %v6240_v32  ;;  %v10497_v31 = vpop.permute.xlu1 %382 }
  0xab   : > { %850 = vmatmul.bf16.gmra.mxu3 %v6240_v32 }
  0xae   : > { %v10447_v10 = vpop.permute.xlu0 %387 }
  0xb2   : > { %v10548_v11 = vpop.permute.xlu1 %402 }
  0xb6   : > { %v669_v35 = vpop.f32.mrf.mxu0  ;;  %v373_v25 = vpop.permute.xlu0 %372 }
  0xb7   : > { %v670_v36 = vadd.f32 %v669_v35, %v343_v34  ;;  %v718_v37 = vpop.f32.mrf.mxu1  ;;  %v9478_v35 = vld [vmem:[%s12309_s3 + $0x90] sm:$0xff] }
  0xb8   : > { %1095 = vmatpush.bf16.msrb.mxu0 %v9478_v35  ;;  %v9520_v35 = vld [vmem:[%s12309_s3 + $0x1e0] sm:$0xff] }
  0xb9   : > { %v10385_v38 = vadd.f32 %v718_v37, %v670_v36  ;;  %v9486_v36 = vld [vmem:[%s12309_s3 + $0xd0] sm:$0xff] }
  0xba   : > { %1108 = vmatpush.bf16.msrb.mxu1 %v9486_v36  ;;  %v10591_v36 = vpop.permute.xlu1 %407 }
  0xbd   : > { %v767_v40 = vpop.f32.mrf.mxu2 }
  0xbe   : > { %v768_v41 = vadd.f32 %v767_v40, %v343_v34  ;;  %v816_v42 = vpop.f32.mrf.mxu3  ;;  %v10389_v43 = vpop.f32.mrf.mxu0  ;;  %v9461_v40 = vld [vmem:[%s12309_s3 + $0x8] sm:$0xff] }
  0xbf   : > { %v10391_v44 = vpop.f32.mrf.mxu1  ;;  %1220 = vmatpush.bf16.msrb.mxu2 %v9461_v40  ;;  %v9504_v40 = vld [vmem:[%s12309_s3 + $0x160] sm:$0xff] }
  0xc0   : > { %v10393_v45 = vadd.f32 %v816_v42, %v768_v41  ;;  %v9469_v41 = vld [vmem:[%s12309_s3 + $0x48] sm:$0xff] }
  0xc1   : > { %1233 = vmatpush.bf16.msrb.mxu3 %v9469_v41 }
  0xc5   : > { %v10395_v47 = vpop.f32.mrf.mxu2 }
  0xc6   : > { %v10397_v48 = vpop.f32.mrf.mxu3  ;;  %v674_v49 = vpop.f32.mrf.mxu0 }
  0xc7   : > { %v723_v50 = vpop.f32.mrf.mxu1  ;;  %v675_v51 = vadd.f32 %v674_v49, %v353_v46  ;;  %v9477_v49 = vld [vmem:[%s12309_s3 + $0x88] sm:$0xff] }
  0xc8   : > { %1096 = vmatpush.bf16.msrb.mxu0 %v9477_v49  ;;  %v9511_v49 = vld [vmem:[%s12309_s3 + $0x198] sm:$0xff] }
  0xc9   : > { %v10399_v52 = vadd.f32 %v723_v50, %v675_v51  ;;  %v9485_v50 = vld [vmem:[%s12309_s3 + $0xc8] sm:$0xff] }
  0xca   : > { %1109 = vmatpush.bf16.msrb.mxu1 %v9485_v50  ;;  %v9519_v50 = vld [vmem:[%s12309_s3 + $0x1d8] sm:$0xff] }
  0xcb   : > { %v860_v42 = vmax.f32 %v10399_v52, 0.0  ;;  %v9460_v52 = vld [vmem:[%s12309_s3] sm:$0xff] }
  0xcc   : > { %1221 = vmatpush.bf16.msrb.mxu2 %v9460_v52  ;;  %1097 = vmatpush.bf16.msrb.mxu0 %v9476_v2  ;;  %v9495_v52 = vld [vmem:[%s12309_s3 + $0x118] sm:$0xff]  ;;  %v393_v2 = vpop.permute.xlu1 %392 }
  0xcd   : > { %v772_v53 = vpop.f32.mrf.mxu2 }
  0xce   : > { %v773_v54 = vadd.f32 %v772_v53, %v353_v46  ;;  %v821_v55 = vpop.f32.mrf.mxu3  ;;  %v10401_v56 = vpop.f32.mrf.mxu0  ;;  %1110 = vmatpush.bf16.msrb.mxu1 %v9484_v6 }
  0xcf   : > { %v10403_v57 = vpop.f32.mrf.mxu1 }
  0xd0   : > { %v10405_v58 = vadd.f32 %v821_v55, %v773_v54  ;;  %v9468_v54 = vld [vmem:[%s12309_s3 + $0x40] sm:$0xff]  ;;  %1533 = vmatpush.bf16.msra.mxu2 %v9515_v62  ;;  %1373 = vmatpush.bf16.msra.mxu0 %v9499_v8  ;;  %v9494_v62 = vld [vmem:[%s12309_s3 + $0x110] sm:$0xff] }
  0xd1   : > { %1234 = vmatpush.bf16.msrb.mxu3 %v9468_v54  ;;  %v9503_v54 = vld [vmem:[%s12309_s3 + $0x158] sm:$0xff] }
  0xd2   : > { %v861_v12 = vmax.f32 %v10405_v58, 0.0  ;;  %1386 = vmatpush.bf16.msra.mxu1 %v9507_v9  ;;  %v9506_v58 = vld [vmem:[%s12309_s3 + $0x170] sm:$0xff]  ;;  %v9509_v9 = vld [vmem:[%s12309_s3 + $0x188] sm:$0xff] }
  0xd4   : > { %1534 = vmatpush.bf16.msra.mxu2 %v9514_v15  ;;  %1374 = vmatpush.bf16.msra.mxu0 %v9498_v21  ;;  %v9501_v21 = vld [vmem:[%s12309_s3 + $0x148] sm:$0xff] }
  0xd5   : > { %v10421_v0 = vpop.f32.mrf.mxu2  ;;  %1546 = vmatpush.bf16.msra.mxu3 %v9523_v63  ;;  %v9502_v63 = vld [vmem:[%s12309_s3 + $0x150] sm:$0xff] }
  0xd6   : > { %v10429_v3 = vpop.f32.mrf.mxu3  ;;  %v10431_v4 = vpop.f32.mrf.mxu0  ;;  %1387 = vmatpush.bf16.msra.mxu1 %v9506_v58 }
  0xd7   : > { %v10433_v5 = vpop.f32.mrf.mxu1 }
  0xd9   : > { %1547 = vmatpush.bf16.msra.mxu3 %v9522_v19  ;;  %v9493_v19 = vld [vmem:[%s12309_s3 + $0x108] sm:$0xff] }
  0xdd   : > { %v10455_v13 = vpop.f32.mrf.mxu2  ;;  %1548 = vmatpush.bf16.msra.mxu3 %v9521_v27  ;;  %v9516_v27 = vld [vmem:[%s12309_s3 + $0x1c0] sm:$0xff] }
  0xde   : > { %v10463_v16 = vpop.f32.mrf.mxu3  ;;  %v10465_v17 = vpop.f32.mrf.mxu0 }
  0xdf   : > { %v10467_v18 = vpop.f32.mrf.mxu1 }
  0xe1   : > { %1549 = vmatpush.bf16.msra.mxu3 %v9520_v35 }
  0xe5   : > { %v10487_v26 = vpop.f32.mrf.mxu2  ;;  %1550 = vmatpush.bf16.msra.mxu3 %v9519_v50 }
  0xe6   : > { %v10495_v29 = vpop.f32.mrf.mxu3  ;;  %v684_v30 = vpop.f32.mrf.mxu0 }
  0xe7   : > { %v685_v32 = vadd.f32 %v684_v30, %v373_v25  ;;  %v733_v34 = vpop.f32.mrf.mxu1  ;;  %v9497_v30 = vld [vmem:[%s12309_s3 + $0x128] sm:$0xff] }
  0xe8   : > { %1375 = vmatpush.bf16.msra.mxu0 %v9497_v30 }
  0xe9   : > { %v734_v37 = vadd.f32 %v733_v34, %v685_v32  ;;  %v9505_v32 = vld [vmem:[%s12309_s3 + $0x168] sm:$0xff]  ;;  %v9512_v34 = vld [vmem:[%s12309_s3 + $0x1a0] sm:$0xff] }
  0xea   : > { %1388 = vmatpush.bf16.msra.mxu1 %v9505_v32  ;;  %v9492_v32 = vld [vmem:[%s12309_s3 + $0x100] sm:$0xff] }
  0xeb   : > { %v868_v46 = vmax.f32 %v734_v37, 0.0  ;;  %v9496_v37 = vld [vmem:[%s12309_s3 + $0x120] sm:$0xff] }
  0xec   : > { %1376 = vmatpush.bf16.msra.mxu0 %v9496_v37 }
  0xed   : > { %v10518_v51 = vmax.f32 %v860_v42, %v868_v46  ;;  %v782_v53 = vpop.f32.mrf.mxu2 }
  0xee   : > { %v783_v55 = vadd.f32 %v782_v53, %v373_v25  ;;  %v831_v60 = vpop.f32.mrf.mxu3  ;;  %v10526_v61 = vpop.f32.mrf.mxu0  ;;  %v9513_v25 = vld [vmem:[%s12309_s3 + $0x1a8] sm:$0xff]  ;;  %1389 = vmatpush.bf16.msra.mxu1 %v9504_v40 }
  0xef   : > { %v10534_v1 = vpop.f32.mrf.mxu1  ;;  %1535 = vmatpush.bf16.msra.mxu2 %v9513_v25  ;;  %v9508_v25 = vld [vmem:[%s12309_s3 + $0x180] sm:$0xff] }
  0xf0   : > { %v832_v7 = vadd.f32 %v831_v60, %v783_v55  ;;  %1377 = vmatpush.bf16.msra.mxu0 %v9495_v52  ;;  %v9510_v55 = vld [vmem:[%s12309_s3 + $0x190] sm:$0xff] }
  0xf1   : > { %v9518_v60 = vld [vmem:[%s12309_s3 + $0x1d0] sm:$0xff] }
  0xf2   : > { %v869_v14 = vmax.f32 %v832_v7, 0.0  ;;  %1390 = vmatpush.bf16.msra.mxu1 %v9503_v54  ;;  %1551 = vmatpush.bf16.msra.mxu3 %v9518_v60  ;;  %v680_v60 = vadd.f32 %v10431_v4, %v10407_v59 }
  0xf3   : > { %1536 = vmatpush.bf16.msra.mxu2 %v9512_v34  ;;  %v9500_v34 = vld [vmem:[%s12309_s3 + $0x140] sm:$0xff] }
  0xf4   : > { %v10557_v20 = vmax.f32 %v861_v12, %v869_v14  ;;  %1378 = vmatpush.bf16.msra.mxu0 %v9494_v62  ;;  %v9517_v12 = vld [vmem:[%s12309_s3 + $0x1c8] sm:$0xff]  ;;  %v778_v62 = vadd.f32 %v10455_v13, %v10407_v59 }
  0xf5   : > { %v10565_v22 = vpop.f32.mrf.mxu2 }
  0xf6   : > { %v10567_v23 = vpop.f32.mrf.mxu3  ;;  %v10569_v24 = vpop.f32.mrf.mxu0  ;;  %1391 = vmatpush.bf16.msra.mxu1 %v9502_v63  ;;  %1552 = vmatpush.bf16.msra.mxu3 %v9517_v12  ;;  %v827_v4 = vadd.f32 %v10463_v16, %v778_v62 }
  0xf7   : > { %v10577_v28 = vpop.f32.mrf.mxu1  ;;  %1537 = vmatpush.bf16.msra.mxu2 %v9511_v49 }
  0xf8   : > { %1379 = vmatpush.bf16.msra.mxu0 %v9493_v19 }
  0xfa   : > { %1392 = vmatpush.bf16.msra.mxu1 %v9501_v21  ;;  %1553 = vmatpush.bf16.msra.mxu3 %v9516_v27  ;;  %v865_v21 = vmax.f32 %v827_v4, 0.0 }
  0xfb   : > { %1538 = vmatpush.bf16.msra.mxu2 %v9510_v55 }
  0xfc   : > { %1380 = vmatpush.bf16.msra.mxu0 %v9492_v32 }
  0xfd   : > { %v787_v41 = vpop.f32.mrf.mxu2 }
  0xfe   : > { %v10599_v42 = vpop.f32.mrf.mxu3  ;;  %v10601_v46 = vpop.f32.mrf.mxu0  ;;  %1393 = vmatpush.bf16.msra.mxu1 %v9500_v34 }
  0xff   : > { %v10609_v53 = vpop.f32.mrf.mxu1  ;;  %1539 = vmatpush.bf16.msra.mxu2 %v9509_v9 }
 0x103   : > { %1540 = vmatpush.bf16.msra.mxu2 %v9508_v25 }
 0x105   : > { %v10629_v6 = vpop.f32.mrf.mxu2 }
 0x106   : > { %v10631_v7 = vpop.f32.mrf.mxu3  ;;  %v694_v8 = vpop.f32.mrf.mxu0 }
 0x107   : > { %v695_v14 = vadd.f32 %v694_v8, %v393_v2  ;;  %v743_v15 = vpop.f32.mrf.mxu1  ;;  %v788_v8 = vadd.f32 %v787_v41, %v10497_v31  ;;  %v857_v41 = vmax.f32 %v10393_v45, 0.0 }
 0x109   : > { %v744_v58 = vadd.f32 %v743_v15, %v695_v14  ;;  %v729_v15 = vadd.f32 %v10433_v5, %v680_v60  ;;  %v889_v34 = vmax.f32 %v857_v41, %v865_v21  ;;  %v413_v60 = vpop.permute.xlu2 %412 }
 0x10b   : > { %v876_v30 = vmax.f32 %v744_v58, 0.0  ;;  %v864_v19 = vmax.f32 %v729_v15, 0.0 }
 0x10d   : > { %v10658_v35 = vmax.f32 %v10518_v51, %v876_v30  ;;  %v792_v37 = vpop.f32.mrf.mxu2 }
 0x10e   : > { %v793_v40 = vadd.f32 %v792_v37, %v393_v2  ;;  %v841_v49 = vpop.f32.mrf.mxu3  ;;  %v10660_v50 = vpop.f32.mrf.mxu0  ;;  %v690_v2 = vadd.f32 %v10569_v24, %v10497_v31  ;;  %v856_v24 = vmax.f32 %v10385_v38, 0.0 }
 0x10f   : > { %v10662_v52 = vpop.f32.mrf.mxu1 }
 0x110   : > { %v842_v54 = vadd.f32 %v841_v49, %v793_v40  ;;  %v739_v13 = vadd.f32 %v10577_v28, %v690_v2  ;;  %v888_v28 = vmax.f32 %v856_v24, %v864_v19  ;;  %v9539_v24 = vld [vmem:[%s12309_s3 + $0x278] sm:$0xff] }
 0x112   : > { %v877_v55 = vmax.f32 %v842_v54, 0.0  ;;  %v872_v25 = vmax.f32 %v739_v13, 0.0  ;;  %v9555_v13 = vld [vmem:[%s12309_s3 + $0x2f8] sm:$0xff] }
 0x114   : > { %v10669_v51 = vmax.f32 %v10557_v20, %v877_v55  ;;  %v837_v20 = vadd.f32 %v10599_v42, %v788_v8  ;;  %v896_v40 = vmax.f32 %v888_v28, %v872_v25 }
 0x115   : > { %v10671_v63 = vpop.f32.mrf.mxu2 }
 0x116   : > { %v10676_v9 = vpop.f32.mrf.mxu3  ;;  %v699_v12 = vpop.f32.mrf.mxu0  ;;  %v873_v27 = vmax.f32 %v837_v20, 0.0 }
 0x117   : > { %v748_v14 = vpop.f32.mrf.mxu1  ;;  %v700_v59 = vadd.f32 %v699_v12, %v10548_v11 }
 0x118   : > { %v897_v49 = vmax.f32 %v889_v34, %v873_v27 }
 0x119   : > { %v749_v58 = vadd.f32 %v748_v14, %v700_v59  ;;  %v9547_v59 = vld [vmem:[%s12309_s3 + $0x2b8] sm:$0xff] }
 0x11b   : > { %v880_v42 = vmax.f32 %v749_v58, 0.0  ;;  %v9531_v58 = vld [vmem:[%s12309_s3 + $0x238] sm:$0xff] }
 0x11d   : > { %v797_v31 = vpop.f32.mrf.mxu2  ;;  %v904_v38 = vmax.f32 %v896_v40, %v880_v42  ;;  %v9538_v42 = vld [vmem:[%s12309_s3 + $0x270] sm:$0xff]  ;;  %v9545_v40 = vld [vmem:[%s12309_s3 + $0x2a8] sm:$0xff] }
 0x11e   : > { %v798_v5 = vadd.f32 %v797_v31, %v10548_v11  ;;  %v846_v30 = vpop.f32.mrf.mxu3  ;;  %v10686_v16 = vpop.f32.mrf.mxu0 }
 0x11f   : > { %v10688_v32 = vpop.f32.mrf.mxu1 }
 0x120   : > { %v847_v37 = vadd.f32 %v846_v30, %v798_v5  ;;  %v9546_v5 = vld [vmem:[%s12309_s3 + $0x2b0] sm:$0xff] }
 0x121   : > { %v9554_v30 = vld [vmem:[%s12309_s3 + $0x2f0] sm:$0xff] }
 0x122   : > { %v881_v54 = vmax.f32 %v847_v37, 0.0 }
 0x124   : > { %v905_v55 = vmax.f32 %v897_v49, %v881_v54  ;;  %v9553_v49 = vld [vmem:[%s12309_s3 + $0x2e8] sm:$0xff] }
 0x125   : > { %v10690_v45 = vpop.f32.mrf.mxu2 }
 0x126   : > { %v912_v62 = vpack.c.bf16 %v905_v55, %v904_v38  ;;  %v10692_v2 = vpop.f32.mrf.mxu3  ;;  %v704_v11 = vpop.f32.mrf.mxu0  ;;  %v9529_v38 = vld [vmem:[%s12309_s3 + $0x228] sm:$0xff] }
 0x127   : > { %v705_v8 = vadd.f32 %v704_v11, %v413_v60  ;;  %v753_v12 = vpop.f32.mrf.mxu1  ;;  %v9537_v55 = vld [vmem:[%s12309_s3 + $0x268] sm:$0xff]  ;;  %v9552_v11 = vld [vmem:[%s12309_s3 + $0x2e0] sm:$0xff] }
 0x128   : > { %v982_v14 = vunpack.c.l.b16 %v912_v62  ;;  %v983_v15 = vunpack.c.h.b16 %v912_v62  ;;  %v9544_v62 = vld [vmem:[%s12309_s3 + $0x2a0] sm:$0xff] }
 0x129   : > { %v754_v4 = vadd.f32 %v753_v12, %v705_v8  ;;  %v9528_v12 = vld [vmem:[%s12309_s3 + $0x220] sm:$0xff] }
 0x12a   : > { %v10700_v20 = vpack.c.b16 %v982_v14, %v982_v14  ;;  %v10702_v19 = vpack.c.b16 %v983_v15, %v983_v15  ;;  %v9543_v14 = vld [vmem:[%s12309_s3 + $0x298] sm:$0xff] }
 0x12b   : > { %v884_v21 = vmax.f32 %v754_v4, 0.0  ;;  %v9551_v15 = vld [vmem:[%s12309_s3 + $0x2d8] sm:$0xff] }
 0x12c   : > { %1222 = vmatmul.bf16.vlgmr.msrb.gmra.mxu2 %v10700_v20  ;;  %1235 = vmatmul.bf16.vlgmr.msrb.gmra.mxu3 %v10702_v19  ;;  %v10713_v31 = vshrl.u32 %v10700_v20, 16  ;;  %v10716_v41 = vshrl.u32 %v10702_v19, 16 }
 0x12d   : > { %v908_v25 = vmax.f32 %v10658_v35, %v884_v21  ;;  %1853 = vmatpush.bf16.msrb.mxu2 %v9547_v59  ;;  %1866 = vmatpush.bf16.msrb.mxu3 %v9555_v13  ;;  %v802_v27 = vpop.f32.mrf.mxu2  ;;  %v9530_v35 = vld [vmem:[%s12309_s3 + $0x230] sm:$0xff]  ;;  %v9527_v13 = vld [vmem:[%s12309_s3 + $0x218] sm:$0xff] }
 0x12e   : > { %v803_v28 = vadd.f32 %v802_v27, %v413_v60  ;;  %1098 = vmatmul.bf16.vlgmr.msrb.gmra.mxu0 %v10713_v31  ;;  %1111 = vmatmul.bf16.vlgmr.msrb.gmra.mxu1 %v10716_v41  ;;  %v851_v34 = vpop.f32.mrf.mxu3  ;;  %v1433_v4 = vrot.slane %v10713_v31, 1  ;;  %v1434_v59 = vrot.slane %v10716_v41, 1  ;;  %v9535_v21 = vld [vmem:[%s12309_s3 + $0x258] sm:$0xff]  ;;  %v9550_v27 = vld [vmem:[%s12309_s3 + $0x2d0] sm:$0xff] }
 0x12f   : > { %1693 = vmatpush.bf16.msrb.mxu0 %v9531_v58  ;;  %1706 = vmatpush.bf16.msrb.mxu1 %v9539_v24  ;;  %v1273_v58 = vrot.slane %v10700_v20, 1  ;;  %v1274_v24 = vrot.slane %v10702_v19, 1 }
 0x130   : > { %v852_v37 = vadd.f32 %v851_v34, %v803_v28  ;;  %v9541_v28 = vld [vmem:[%s12309_s3 + $0x288] sm:$0xff] }
 0x131   : > { %1854 = vmatpush.bf16.msrb.mxu2 %v9546_v5  ;;  %1867 = vmatpush.bf16.msrb.mxu3 %v9554_v30  ;;  %v9526_v5 = vld [vmem:[%s12309_s3 + $0x210] sm:$0xff]  ;;  %v9549_v34 = vld [vmem:[%s12309_s3 + $0x2c8] sm:$0xff] }
 0x132   : > { %v885_v54 = vmax.f32 %v852_v37, 0.0  ;;  %v9534_v30 = vld [vmem:[%s12309_s3 + $0x250] sm:$0xff]  ;;  %v9540_v37 = vld [vmem:[%s12309_s3 + $0x280] sm:$0xff] }
 0x133   : > { %1694 = vmatpush.bf16.msrb.mxu0 %v9530_v35  ;;  %1707 = vmatpush.bf16.msrb.mxu1 %v9538_v42  ;;  %v9525_v35 = vld [vmem:[%s12309_s3 + $0x208] sm:$0xff] }
 0x134   : > { %v909_v60 = vmax.f32 %v10669_v51, %v885_v54  ;;  %v9536_v51 = vld [vmem:[%s12309_s3 + $0x260] sm:$0xff]  ;;  %v9533_v42 = vld [vmem:[%s12309_s3 + $0x248] sm:$0xff]  ;;  %v9587_v54 = vld [vmem:[%s12309_s3 + $0x3f8] sm:$0xff] }
 0x135   : > { %1855 = vmatpush.bf16.msrb.mxu2 %v9545_v40  ;;  %1868 = vmatpush.bf16.msrb.mxu3 %v9553_v49  ;;  %v9548_v40 = vld [vmem:[%s12309_s3 + $0x2c0] sm:$0xff]  ;;  %v9579_v49 = vld [vmem:[%s12309_s3 + $0x3b8] sm:$0xff] }
 0x136   : > { %v10752_v8 = vpack.c.bf16 %v909_v60, %v908_v25  ;;  %v9542_v25 = vld [vmem:[%s12309_s3 + $0x290] sm:$0xff]  ;;  %v9563_v60 = vld [vmem:[%s12309_s3 + $0x338] sm:$0xff] }
 0x137   : > { %1695 = vmatpush.bf16.msrb.mxu0 %v9529_v38  ;;  %1708 = vmatpush.bf16.msrb.mxu1 %v9537_v55  ;;  %v9524_v38 = vld [vmem:[%s12309_s3 + $0x200] sm:$0xff] }
 0x138   : > { %v9532_v55 = vld [vmem:[%s12309_s3 + $0x240] sm:$0xff] }
 0x139   : > { %1856 = vmatpush.bf16.msrb.mxu2 %v9544_v62  ;;  %1869 = vmatpush.bf16.msrb.mxu3 %v9552_v11  ;;  %v9571_v62 = vld [vmem:[%s12309_s3 + $0x378] sm:$0xff]  ;;  %v9578_v11 = vld [vmem:[%s12309_s3 + $0x3b0] sm:$0xff] }
 0x13b   : > { %1696 = vmatpush.bf16.msrb.mxu0 %v9528_v12  ;;  %1709 = vmatpush.bf16.msrb.mxu1 %v9536_v51  ;;  %v9586_v12 = vld [vmem:[%s12309_s3 + $0x3f0] sm:$0xff]  ;;  %v1753_v51 = vrot.slane %v10713_v31, 2 }
 0x13c   : > { %1541 = vmatmul.bf16.vlgmr.msra.gmra.mxu2 %v1433_v4  ;;  %1554 = vmatmul.bf16.vlgmr.msra.gmra.mxu3 %v1434_v59  ;;  %v9570_v4 = vld [vmem:[%s12309_s3 + $0x370] sm:$0xff]  ;;  %v1593_v59 = vrot.slane %v10700_v20, 2 }
 0x13d   : > { %1857 = vmatpush.bf16.msrb.mxu2 %v9543_v14  ;;  %1870 = vmatpush.bf16.msrb.mxu3 %v9551_v15  ;;  %v1754_v14 = vrot.slane %v10716_v41, 2  ;;  %v9562_v15 = vld [vmem:[%s12309_s3 + $0x330] sm:$0xff] }
 0x13e   : > { %1381 = vmatmul.bf16.vlgmr.msra.gmra.mxu0 %v1273_v58  ;;  %1394 = vmatmul.bf16.vlgmr.msra.gmra.mxu1 %v1274_v24  ;;  %v9585_v58 = vld [vmem:[%s12309_s3 + $0x3e8] sm:$0xff] }
 0x13f   : > { %1697 = vmatpush.bf16.msrb.mxu0 %v9527_v13  ;;  %1710 = vmatpush.bf16.msrb.mxu1 %v9535_v21  ;;  %v1594_v13 = vrot.slane %v10702_v19, 2  ;;  %v9577_v21 = vld [vmem:[%s12309_s3 + $0x3a8] sm:$0xff] }
 0x140   : > { %v9561_v24 = vld [vmem:[%s12309_s3 + $0x328] sm:$0xff] }
 0x141   : > { %1858 = vmatpush.bf16.msrb.mxu2 %v9542_v25  ;;  %1871 = vmatpush.bf16.msrb.mxu3 %v9550_v27  ;;  %v9569_v25 = vld [vmem:[%s12309_s3 + $0x368] sm:$0xff]  ;;  %v9576_v27 = vld [vmem:[%s12309_s3 + $0x3a0] sm:$0xff] }
 0x143   : > { %1698 = vmatpush.bf16.msrb.mxu0 %v9526_v5  ;;  %1711 = vmatpush.bf16.msrb.mxu1 %v9534_v30  ;;  %v9584_v5 = vld [vmem:[%s12309_s3 + $0x3e0] sm:$0xff] }
 0x144   : > { %v9560_v30 = vld [vmem:[%s12309_s3 + $0x320] sm:$0xff] }
 0x145   : > { %1859 = vmatpush.bf16.msrb.mxu2 %v9541_v28  ;;  %1872 = vmatpush.bf16.msrb.mxu3 %v9549_v34  ;;  %v9568_v28 = vld [vmem:[%s12309_s3 + $0x360] sm:$0xff]  ;;  %v9575_v34 = vld [vmem:[%s12309_s3 + $0x398] sm:$0xff] }
 0x147   : > { %1699 = vmatpush.bf16.msrb.mxu0 %v9525_v35  ;;  %1712 = vmatpush.bf16.msrb.mxu1 %v9533_v42  ;;  %v9583_v35 = vld [vmem:[%s12309_s3 + $0x3d8] sm:$0xff] }
 0x148   : > { %v9559_v42 = vld [vmem:[%s12309_s3 + $0x318] sm:$0xff] }
 0x149   : > { %1860 = vmatpush.bf16.msrb.mxu2 %v9540_v37  ;;  %1873 = vmatpush.bf16.msrb.mxu3 %v9548_v40  ;;  %v9567_v37 = vld [vmem:[%s12309_s3 + $0x358] sm:$0xff]  ;;  %v9574_v40 = vld [vmem:[%s12309_s3 + $0x390] sm:$0xff] }
 0x14b   : > { %1700 = vmatpush.bf16.msrb.mxu0 %v9524_v38  ;;  %1713 = vmatpush.bf16.msrb.mxu1 %v9532_v55  ;;  %v9566_v38 = vld [vmem:[%s12309_s3 + $0x350] sm:$0xff]  ;;  %v9573_v55 = vld [vmem:[%s12309_s3 + $0x388] sm:$0xff] }
 0x14c   : > { %1861 = vmatmul.bf16.vlgmr.msrb.gmra.mxu2 %v1753_v51  ;;  %1874 = vmatmul.bf16.vlgmr.msrb.gmra.mxu3 %v1754_v14  ;;  %v9580_v51 = vld [vmem:[%s12309_s3 + $0x3c0] sm:$0xff]  ;;  %v9611_v14 = vld [vmem:[%s12309_s3 + $0x4b8] sm:$0xff] }
 0x14d   : > { %2173 = vmatpush.bf16.msra.mxu2 %v9579_v49  ;;  %2186 = vmatpush.bf16.msra.mxu3 %v9587_v54  ;;  %v9582_v49 = vld [vmem:[%s12309_s3 + $0x3d0] sm:$0xff] }
 0x14e   : > { %1701 = vmatmul.bf16.vlgmr.msrb.gmra.mxu0 %v1593_v59  ;;  %1714 = vmatmul.bf16.vlgmr.msrb.gmra.mxu1 %v1594_v13  ;;  %v9558_v54 = vld [vmem:[%s12309_s3 + $0x310] sm:$0xff]  ;;  %v9556_v59 = vld [vmem:[%s12309_s3 + $0x300] sm:$0xff] }
 0x14f   : > { %2013 = vmatpush.bf16.msra.mxu0 %v9563_v60  ;;  %2026 = vmatpush.bf16.msra.mxu1 %v9571_v62  ;;  %v9581_v60 = vld [vmem:[%s12309_s3 + $0x3c8] sm:$0xff]  ;;  %v9564_v13 = vld [vmem:[%s12309_s3 + $0x340] sm:$0xff] }
 0x150   : > { %v9557_v62 = vld [vmem:[%s12309_s3 + $0x308] sm:$0xff] }
 0x151   : > { %2174 = vmatpush.bf16.msra.mxu2 %v9578_v11  ;;  %2187 = vmatpush.bf16.msra.mxu3 %v9586_v12  ;;  %v9565_v11 = vld [vmem:[%s12309_s3 + $0x348] sm:$0xff]  ;;  %v9572_v12 = vld [vmem:[%s12309_s3 + $0x380] sm:$0xff] }
 0x153   : > { %2014 = vmatpush.bf16.msra.mxu0 %v9562_v15  ;;  %2027 = vmatpush.bf16.msra.mxu1 %v9570_v4  ;;  %v9619_v15 = vld [vmem:[%s12309_s3 + $0x4f8] sm:$0xff]  ;;  %v780_v4 = vadd.f32 %v10487_v26, %v10387_v39 }
 0x154   : > { %v9603_v26 = vld [vmem:[%s12309_s3 + $0x478] sm:$0xff] }
 0x155   : > { %2175 = vmatpush.bf16.msra.mxu2 %v9577_v21  ;;  %2188 = vmatpush.bf16.msra.mxu3 %v9585_v58  ;;  %v770_v21 = vadd.f32 %v10395_v47, %v10383_v33  ;;  %v9595_v58 = vld [vmem:[%s12309_s3 + $0x438] sm:$0xff]  ;;  %v2073_v47 = vrot.slane %v10713_v31, 3  ;;  %v800_v31 = vadd.f32 %v10690_v45, %v10591_v36 }
 0x157   : > { %2015 = vmatpush.bf16.msra.mxu0 %v9561_v24  ;;  %2028 = vmatpush.bf16.msra.mxu1 %v9569_v25  ;;  %v682_v24 = vadd.f32 %v10465_v17, %v10387_v39  ;;  %v790_v25 = vadd.f32 %v10629_v6, %v10447_v10  ;;  %v9610_v39 = vld [vmem:[%s12309_s3 + $0x4b0] sm:$0xff]  ;;  %v692_v6 = vadd.f32 %v10601_v46, %v10447_v10 }
 0x158   : > { %v9618_v17 = vld [vmem:[%s12309_s3 + $0x4f0] sm:$0xff] }
 0x159   : > { %2176 = vmatpush.bf16.msra.mxu2 %v9576_v27  ;;  %2189 = vmatpush.bf16.msra.mxu3 %v9584_v5  ;;  %v2074_v27 = vrot.slane %v10716_v41, 3  ;;  %v672_v5 = vadd.f32 %v10389_v43, %v10383_v33  ;;  %v1913_v33 = vrot.slane %v10700_v20, 3  ;;  %v1914_v43 = vrot.slane %v10702_v19, 3  ;;  %v9594_v41 = vld [vmem:[%s12309_s3 + $0x430] sm:$0xff]  ;;  %v9617_v19 = vld [vmem:[%s12309_s3 + $0x4e8] sm:$0xff] }
 0x15a   : > { %v9602_v10 = vld [vmem:[%s12309_s3 + $0x470] sm:$0xff]  ;;  %v731_v46 = vadd.f32 %v10467_v18, %v682_v24  ;;  %v839_v45 = vadd.f32 %v10631_v7, %v790_v25  ;;  %v702_v20 = vadd.f32 %v10686_v16, %v10591_v36  ;;  %v741_v7 = vadd.f32 %v10609_v53, %v692_v6  ;;  %v9593_v36 = vld [vmem:[%s12309_s3 + $0x428] sm:$0xff]  ;;  %v9608_v53 = vld [vmem:[%s12309_s3 + $0x4a0] sm:$0xff] }
 0x15b   : > { %2016 = vmatpush.bf16.msra.mxu0 %v9560_v30  ;;  %2029 = vmatpush.bf16.msra.mxu1 %v9568_v28  ;;  %v829_v30 = vadd.f32 %v10495_v29, %v780_v4  ;;  %v819_v29 = vadd.f32 %v10397_v48, %v770_v21  ;;  %v9609_v48 = vld [vmem:[%s12309_s3 + $0x4a8] sm:$0xff]  ;;  %v721_v28 = vadd.f32 %v10391_v44, %v672_v5  ;;  %v9591_v4 = vld [vmem:[%s12309_s3 + $0x418] sm:$0xff]  ;;  %v9606_v21 = vld [vmem:[%s12309_s3 + $0x490] sm:$0xff] }
 0x15c   : > { %v9601_v16 = vld [vmem:[%s12309_s3 + $0x468] sm:$0xff]  ;;  %v751_v44 = vadd.f32 %v10688_v32, %v702_v20  ;;  %v9592_v32 = vld [vmem:[%s12309_s3 + $0x420] sm:$0xff]  ;;  %v9590_v24 = vld [vmem:[%s12309_s3 + $0x410] sm:$0xff] }
 0x15d   : > { %2177 = vmatpush.bf16.msra.mxu2 %v9575_v34  ;;  %2190 = vmatpush.bf16.msra.mxu3 %v9583_v35  ;;  %v867_v18 = vmax.f32 %v829_v30, 0.0  ;;  %v849_v34 = vadd.f32 %v10692_v2, %v800_v31  ;;  %v859_v35 = vmax.f32 %v819_v29, 0.0  ;;  %v9616_v2 = vld [vmem:[%s12309_s3 + $0x4e0] sm:$0xff]  ;;  %v9598_v25 = vld [vmem:[%s12309_s3 + $0x450] sm:$0xff]  ;;  %v9643_v29 = vld [vmem:[%s12309_s3 + $0x5b8] sm:$0xff] }
 0x15e   : > { %v9604_v6 = vld [vmem:[%s12309_s3 + $0x480] sm:$0xff]  ;;  %v9635_v20 = vld [vmem:[%s12309_s3 + $0x578] sm:$0xff] }
 0x15f   : > { %2017 = vmatpush.bf16.msra.mxu0 %v9559_v42  ;;  %2030 = vmatpush.bf16.msra.mxu1 %v9567_v37  ;;  %v866_v42 = vmax.f32 %v731_v46, 0.0  ;;  %v875_v37 = vmax.f32 %v839_v45, 0.0  ;;  %v9612_v31 = vld [vmem:[%s12309_s3 + $0x4c0] sm:$0xff]  ;;  %v9627_v45 = vld [vmem:[%s12309_s3 + $0x538] sm:$0xff] }
 0x160   : > { %v9596_v46 = vld [vmem:[%s12309_s3 + $0x440] sm:$0xff] }
 0x161   : > { %2178 = vmatpush.bf16.msra.mxu2 %v9574_v40  ;;  %2191 = vmatpush.bf16.msra.mxu3 %v9582_v49  ;;  %v858_v40 = vmax.f32 %v721_v28, 0.0  ;;  %v891_v49 = vmax.f32 %v859_v35, %v867_v18  ;;  %v9642_v28 = vld [vmem:[%s12309_s3 + $0x5b0] sm:$0xff]  ;;  %v9625_v35 = vld [vmem:[%s12309_s3 + $0x528] sm:$0xff] }
 0x162   : > { %v9650_v18 = vld [vmem:[%s12309_s3 + $0x5f0] sm:$0xff] }
 0x163   : > { %2018 = vmatpush.bf16.msra.mxu0 %v9558_v54  ;;  %2031 = vmatpush.bf16.msra.mxu1 %v9566_v38  ;;  %v874_v54 = vmax.f32 %v741_v7, 0.0  ;;  %v883_v38 = vmax.f32 %v849_v34, 0.0  ;;  %v9626_v7 = vld [vmem:[%s12309_s3 + $0x530] sm:$0xff] }
 0x164   : > { %v9634_v34 = vld [vmem:[%s12309_s3 + $0x570] sm:$0xff] }
 0x165   : > { %2179 = vmatpush.bf16.msra.mxu2 %v9573_v55  ;;  %2192 = vmatpush.bf16.msra.mxu3 %v9581_v60  ;;  %v9600_v55 = vld [vmem:[%s12309_s3 + $0x460] sm:$0xff]  ;;  %v890_v60 = vmax.f32 %v858_v40, %v866_v42  ;;  %v9633_v42 = vld [vmem:[%s12309_s3 + $0x568] sm:$0xff]  ;;  %v9639_v40 = vld [vmem:[%s12309_s3 + $0x598] sm:$0xff] }
 0x167   : > { %2019 = vmatpush.bf16.msra.mxu0 %v9557_v62  ;;  %2032 = vmatpush.bf16.msra.mxu1 %v9565_v11  ;;  %v899_v62 = vmax.f32 %v891_v49, %v875_v37  ;;  %v882_v11 = vmax.f32 %v751_v44, 0.0  ;;  %v9640_v37 = vld [vmem:[%s12309_s3 + $0x5a0] sm:$0xff]  ;;  %v9647_v49 = vld [vmem:[%s12309_s3 + $0x5d8] sm:$0xff] }
 0x168   : > { %v9648_v44 = vld [vmem:[%s12309_s3 + $0x5e0] sm:$0xff] }
 0x169   : > { %2180 = vmatpush.bf16.msra.mxu2 %v9572_v12  ;;  %2193 = vmatpush.bf16.msra.mxu3 %v9580_v51  ;;  %v9607_v12 = vld [vmem:[%s12309_s3 + $0x498] sm:$0xff] }
 0x16a   : > { %v9615_v51 = vld [vmem:[%s12309_s3 + $0x4d8] sm:$0xff] }
 0x16b   : > { %2020 = vmatpush.bf16.msra.mxu0 %v9556_v59  ;;  %2033 = vmatpush.bf16.msra.mxu1 %v9564_v13  ;;  %v9599_v59 = vld [vmem:[%s12309_s3 + $0x458] sm:$0xff] }
 0x16c   : > { %2181 = vmatmul.bf16.vlgmr.msra.gmra.mxu2 %v2073_v47  ;;  %2194 = vmatmul.bf16.vlgmr.msra.gmra.mxu3 %v2074_v27  ;;  %v9605_v47 = vld [vmem:[%s12309_s3 + $0x488] sm:$0xff] }
 0x16d   : > { %2500 = vmatpush.bf16.msrb.mxu2 %v9611_v14  ;;  %2513 = vmatpush.bf16.msrb.mxu3 %v9619_v15  ;;  %v898_v14 = vmax.f32 %v890_v60, %v874_v54  ;;  %v907_v15 = vmax.f32 %v899_v62, %v883_v38  ;;  %v9613_v27 = vld [vmem:[%s12309_s3 + $0x4c8] sm:$0xff]  ;;  %v9623_v54 = vld [vmem:[%s12309_s3 + $0x518] sm:$0xff]  ;;  %v9622_v60 = vld [vmem:[%s12309_s3 + $0x510] sm:$0xff] }
 0x16e   : > { %2021 = vmatmul.bf16.vlgmr.msra.gmra.mxu0 %v1913_v33  ;;  %2034 = vmatmul.bf16.vlgmr.msra.gmra.mxu1 %v1914_v43  ;;  %v9631_v38 = vld [vmem:[%s12309_s3 + $0x558] sm:$0xff]  ;;  %v9630_v62 = vld [vmem:[%s12309_s3 + $0x550] sm:$0xff] }
 0x16f   : > { %2336 = vmatpush.bf16.msrb.mxu0 %v9595_v58  ;;  %2349 = vmatpush.bf16.msrb.mxu1 %v9603_v26  ;;  %v906_v13 = vmax.f32 %v898_v14, %v882_v11  ;;  %v9614_v58 = vld [vmem:[%s12309_s3 + $0x4d0] sm:$0xff]  ;;  %v9637_v11 = vld [vmem:[%s12309_s3 + $0x588] sm:$0xff] }
 0x170   : > { %v9629_v14 = vld [vmem:[%s12309_s3 + $0x548] sm:$0xff] }
 0x171   : > { %2501 = vmatpush.bf16.msrb.mxu2 %v9610_v39  ;;  %2514 = vmatpush.bf16.msrb.mxu3 %v9618_v17  ;;  %v913_v26 = vpack.c.bf16 %v907_v15, %v906_v13  ;;  %v9589_v39 = vld [vmem:[%s12309_s3 + $0x408] sm:$0xff]  ;;  %v9636_v15 = vld [vmem:[%s12309_s3 + $0x580] sm:$0xff]  ;;  %v9683_v13 = vld [vmem:[%s12309_s3 + $0x6f8] sm:$0xff] }
 0x172   : > { %v9597_v17 = vld [vmem:[%s12309_s3 + $0x448] sm:$0xff] }
 0x173   : > { %2337 = vmatpush.bf16.msrb.mxu0 %v9594_v41  ;;  %2350 = vmatpush.bf16.msrb.mxu1 %v9602_v10  ;;  %v2234_v5 = vunpack.c.l.b16 %v913_v26  ;;  %v2235_v30 = vunpack.c.h.b16 %v913_v26  ;;  %v9651_v41 = vld [vmem:[%s12309_s3 + $0x5f8] sm:$0xff]  ;;  %v9588_v10 = vld [vmem:[%s12309_s3 + $0x400] sm:$0xff] }
 0x174   : > { %v9659_v26 = vld [vmem:[%s12309_s3 + $0x638] sm:$0xff] }
 0x175   : > { %2502 = vmatpush.bf16.msrb.mxu2 %v9609_v48  ;;  %2515 = vmatpush.bf16.msrb.mxu3 %v9617_v19  ;;  %v11030_v33 = vpack.c.b16 %v2234_v5, %v2234_v5  ;;  %v11032_v43 = vpack.c.b16 %v2235_v30, %v2235_v30  ;;  %v9674_v30 = vld [vmem:[%s12309_s3 + $0x6b0] sm:$0xff] }
 0x177   : > { %2338 = vmatpush.bf16.msrb.mxu0 %v9593_v36  ;;  %2351 = vmatpush.bf16.msrb.mxu1 %v9601_v16  ;;  %v11053_v48 = vshrl.u32 %v11030_v33, 16  ;;  %v11056_v19 = vshrl.u32 %v11032_v43, 16  ;;  %v9641_v36 = vld [vmem:[%s12309_s3 + $0x5a8] sm:$0xff] }
 0x178   : > { %v9649_v16 = vld [vmem:[%s12309_s3 + $0x5e8] sm:$0xff] }
 0x179   : > { %2503 = vmatpush.bf16.msrb.mxu2 %v9608_v53  ;;  %2516 = vmatpush.bf16.msrb.mxu3 %v9616_v2  ;;  %v9624_v53 = vld [vmem:[%s12309_s3 + $0x520] sm:$0xff]  ;;  %v2721_v5 = vrot.slane %v11056_v19, 1 }
 0x17a   : > { %v9632_v2 = vld [vmem:[%s12309_s3 + $0x560] sm:$0xff] }
 0x17b   : > { %2339 = vmatpush.bf16.msrb.mxu0 %v9592_v32  ;;  %2352 = vmatpush.bf16.msrb.mxu1 %v9600_v55  ;;  %v9638_v32 = vld [vmem:[%s12309_s3 + $0x590] sm:$0xff] }
 0x17c   : > { %v9646_v55 = vld [vmem:[%s12309_s3 + $0x5d0] sm:$0xff] }
 0x17d   : > { %2504 = vmatpush.bf16.msrb.mxu2 %v9607_v12  ;;  %2517 = vmatpush.bf16.msrb.mxu3 %v9615_v51  ;;  %v9645_v12 = vld [vmem:[%s12309_s3 + $0x5c8] sm:$0xff] }
 0x17e   : > { %v9621_v51 = vld [vmem:[%s12309_s3 + $0x508] sm:$0xff] }
 0x17f   : > { %2340 = vmatpush.bf16.msrb.mxu0 %v9591_v4  ;;  %2353 = vmatpush.bf16.msrb.mxu1 %v9599_v59  ;;  %v9644_v4 = vld [vmem:[%s12309_s3 + $0x5c0] sm:$0xff]  ;;  %v9675_v59 = vld [vmem:[%s12309_s3 + $0x6b8] sm:$0xff] }
 0x181   : > { %2505 = vmatpush.bf16.msrb.mxu2 %v9606_v21  ;;  %2518 = vmatpush.bf16.msrb.mxu3 %v9614_v58  ;;  %v9620_v21 = vld [vmem:[%s12309_s3 + $0x500] sm:$0xff] }
 0x182   : > { %v9628_v58 = vld [vmem:[%s12309_s3 + $0x540] sm:$0xff] }
 0x183   : > { %2341 = vmatpush.bf16.msrb.mxu0 %v9590_v24  ;;  %2354 = vmatpush.bf16.msrb.mxu1 %v9598_v25  ;;  %v9667_v24 = vld [vmem:[%s12309_s3 + $0x678] sm:$0xff]  ;;  %v11158_v25 = vpop.f32.mrf.mxu0 }
 0x185   : > { %2506 = vmatpush.bf16.msrb.mxu2 %v9605_v47  ;;  %2519 = vmatpush.bf16.msrb.mxu3 %v9613_v27  ;;  %v11160_v47 = vpop.f32.mrf.mxu1  ;;  %v2720_v27 = vrot.slane %v11053_v48, 1 }
 0x187   : > { %2342 = vmatpush.bf16.msrb.mxu0 %v9589_v39  ;;  %2355 = vmatpush.bf16.msrb.mxu1 %v9597_v17  ;;  %v9682_v39 = vld [vmem:[%s12309_s3 + $0x6f0] sm:$0xff]  ;;  %v2560_v17 = vrot.slane %v11030_v33, 1 }
 0x189   : > { %2507 = vmatpush.bf16.msrb.mxu2 %v9604_v6  ;;  %2520 = vmatpush.bf16.msrb.mxu3 %v9612_v31  ;;  %v2561_v6 = vrot.slane %v11032_v43, 1  ;;  %v9658_v31 = vld [vmem:[%s12309_s3 + $0x630] sm:$0xff] }
 0x18b   : > { %2343 = vmatpush.bf16.msrb.mxu0 %v9588_v10  ;;  %2356 = vmatpush.bf16.msrb.mxu1 %v9596_v46  ;;  %v11180_v10 = vpop.f32.mrf.mxu3  ;;  %v9673_v46 = vld [vmem:[%s12309_s3 + $0x6a8] sm:$0xff] }
 0x18c   : > { %2508 = vmatmul.bf16.vlgmr.msrb.gmra.mxu2 %v11053_v48  ;;  %2521 = vmatmul.bf16.vlgmr.msrb.gmra.mxu3 %v11056_v19 }
 0x18d   : > { %2820 = vmatpush.bf16.msra.mxu2 %v9643_v29  ;;  %2833 = vmatpush.bf16.msra.mxu3 %v9651_v41  ;;  %v9666_v29 = vld [vmem:[%s12309_s3 + $0x670] sm:$0xff]  ;;  %v11178_v41 = vpop.f32.mrf.mxu2 }
 0x18e   : > { %2344 = vmatmul.bf16.vlgmr.msrb.gmra.mxu0 %v11030_v33  ;;  %2357 = vmatmul.bf16.vlgmr.msrb.gmra.mxu1 %v11032_v43 }
 0x18f   : > { %2660 = vmatpush.bf16.msra.mxu0 %v9627_v45  ;;  %2673 = vmatpush.bf16.msra.mxu1 %v9635_v20  ;;  %v9681_v45 = vld [vmem:[%s12309_s3 + $0x6e8] sm:$0xff] }
 0x190   : > { %v9657_v20 = vld [vmem:[%s12309_s3 + $0x628] sm:$0xff] }
 0x191   : > { %2821 = vmatpush.bf16.msra.mxu2 %v9642_v28  ;;  %2834 = vmatpush.bf16.msra.mxu3 %v9650_v18  ;;  %v9665_v28 = vld [vmem:[%s12309_s3 + $0x668] sm:$0xff] }
 0x193   : > { %2661 = vmatpush.bf16.msra.mxu0 %v9626_v7  ;;  %2674 = vmatpush.bf16.msra.mxu1 %v9634_v34 }
 0x195   : > { %2822 = vmatpush.bf16.msra.mxu2 %v9641_v36  ;;  %2835 = vmatpush.bf16.msra.mxu3 %v9649_v16  ;;  %v9672_v36 = vld [vmem:[%s12309_s3 + $0x6a0] sm:$0xff] }
 0x196   : > { %v9680_v16 = vld [vmem:[%s12309_s3 + $0x6e0] sm:$0xff] }
 0x197   : > { %2662 = vmatpush.bf16.msra.mxu0 %v9625_v35  ;;  %2675 = vmatpush.bf16.msra.mxu1 %v9633_v42  ;;  %v9656_v35 = vld [vmem:[%s12309_s3 + $0x620] sm:$0xff] }
 0x198   : > { %v9664_v42 = vld [vmem:[%s12309_s3 + $0x660] sm:$0xff] }
 0x199   : > { %2823 = vmatpush.bf16.msra.mxu2 %v9640_v37  ;;  %2836 = vmatpush.bf16.msra.mxu3 %v9648_v44 }
 0x19b   : > { %2663 = vmatpush.bf16.msra.mxu0 %v9624_v53  ;;  %2676 = vmatpush.bf16.msra.mxu1 %v9632_v2  ;;  %v9671_v2 = vld [vmem:[%s12309_s3 + $0x698] sm:$0xff] }
 0x19d   : > { %2824 = vmatpush.bf16.msra.mxu2 %v9639_v40  ;;  %2837 = vmatpush.bf16.msra.mxu3 %v9647_v49  ;;  %v9679_v40 = vld [vmem:[%s12309_s3 + $0x6d8] sm:$0xff] }
 0x19f   : > { %2664 = vmatpush.bf16.msra.mxu0 %v9623_v54  ;;  %2677 = vmatpush.bf16.msra.mxu1 %v9631_v38  ;;  %v9655_v54 = vld [vmem:[%s12309_s3 + $0x618] sm:$0xff] }
 0x1a0   : > { %v9663_v38 = vld [vmem:[%s12309_s3 + $0x658] sm:$0xff] }
 0x1a1   : > { %2825 = vmatpush.bf16.msra.mxu2 %v9638_v32  ;;  %2838 = vmatpush.bf16.msra.mxu3 %v9646_v55 }
 0x1a3   : > { %2665 = vmatpush.bf16.msra.mxu0 %v9622_v60  ;;  %2678 = vmatpush.bf16.msra.mxu1 %v9630_v62  ;;  %v9670_v60 = vld [vmem:[%s12309_s3 + $0x690] sm:$0xff] }
 0x1a4   : > { %v9678_v62 = vld [vmem:[%s12309_s3 + $0x6d0] sm:$0xff] }
 0x1a5   : > { %2826 = vmatpush.bf16.msra.mxu2 %v9637_v11  ;;  %2839 = vmatpush.bf16.msra.mxu3 %v9645_v12  ;;  %v9654_v11 = vld [vmem:[%s12309_s3 + $0x610] sm:$0xff] }
 0x1a6   : > { %v9662_v12 = vld [vmem:[%s12309_s3 + $0x650] sm:$0xff] }
 0x1a7   : > { %2666 = vmatpush.bf16.msra.mxu0 %v9621_v51  ;;  %2679 = vmatpush.bf16.msra.mxu1 %v9629_v14 }
 0x1a9   : > { %2827 = vmatpush.bf16.msra.mxu2 %v9636_v15  ;;  %2840 = vmatpush.bf16.msra.mxu3 %v9644_v4  ;;  %v9669_v15 = vld [vmem:[%s12309_s3 + $0x688] sm:$0xff] }
 0x1aa   : > { %v9677_v4 = vld [vmem:[%s12309_s3 + $0x6c8] sm:$0xff] }
 0x1ab   : > { %2667 = vmatpush.bf16.msra.mxu0 %v9620_v21  ;;  %2680 = vmatpush.bf16.msra.mxu1 %v9628_v58  ;;  %v1099_v18 = vpop.f32.mrf.mxu0  ;;  %v1112_v7 = vpop.f32.mrf.mxu1 }
 0x1ac   : > { %2828 = vmatmul.bf16.vlgmr.msra.gmra.mxu2 %v2720_v27  ;;  %2841 = vmatmul.bf16.vlgmr.msra.gmra.mxu3 %v2721_v5  ;;  %v1113_v34 = vadd.f32 %v1112_v7, %v1099_v18  ;;  %v9676_v27 = vld [vmem:[%s12309_s3 + $0x6c0] sm:$0xff]  ;;  %v9707_v5 = vld [vmem:[%s12309_s3 + $0x7b8] sm:$0xff]  ;;  %v3041_v18 = vrot.slane %v11056_v19, 2 }
 0x1ad   : > { %3140 = vmatpush.bf16.msrb.mxu2 %v9675_v59  ;;  %3153 = vmatpush.bf16.msrb.mxu3 %v9683_v13  ;;  %v9653_v59 = vld [vmem:[%s12309_s3 + $0x608] sm:$0xff] }
 0x1ae   : > { %2668 = vmatmul.bf16.vlgmr.msra.gmra.mxu0 %v2560_v17  ;;  %2681 = vmatmul.bf16.vlgmr.msra.gmra.mxu1 %v2561_v6  ;;  %v9661_v13 = vld [vmem:[%s12309_s3 + $0x648] sm:$0xff]  ;;  %v9652_v17 = vld [vmem:[%s12309_s3 + $0x600] sm:$0xff] }
 0x1af   : > { %2980 = vmatpush.bf16.msrb.mxu0 %v9659_v26  ;;  %2993 = vmatpush.bf16.msrb.mxu1 %v9667_v24  ;;  %v1223_v37 = vpop.f32.mrf.mxu2  ;;  %v1236_v44 = vpop.f32.mrf.mxu3  ;;  %v9668_v24 = vld [vmem:[%s12309_s3 + $0x680] sm:$0xff] }
 0x1b0   : > { %v1224_v53 = vadd.f32 %v1223_v37, %v1113_v34  ;;  %v9660_v6 = vld [vmem:[%s12309_s3 + $0x640] sm:$0xff]  ;;  %v9706_v34 = vld [vmem:[%s12309_s3 + $0x7b0] sm:$0xff] }
 0x1b1   : > { %3141 = vmatpush.bf16.msrb.mxu2 %v9674_v30  ;;  %3154 = vmatpush.bf16.msrb.mxu3 %v9682_v39  ;;  %v9715_v30 = vld [vmem:[%s12309_s3 + $0x7f8] sm:$0xff] }
 0x1b2   : > { %v1237_v49 = vadd.f32 %v1236_v44, %v1224_v53  ;;  %v9690_v44 = vld [vmem:[%s12309_s3 + $0x730] sm:$0xff] }
 0x1b3   : > { %2981 = vmatpush.bf16.msrb.mxu0 %v9658_v31  ;;  %2994 = vmatpush.bf16.msrb.mxu1 %v9666_v29  ;;  %v1101_v32 = vpop.f32.mrf.mxu0  ;;  %v1114_v55 = vpop.f32.mrf.mxu1  ;;  %v9698_v53 = vld [vmem:[%s12309_s3 + $0x770] sm:$0xff] }
 0x1b4   : > { %v9697_v32 = vld [vmem:[%s12309_s3 + $0x768] sm:$0xff]  ;;  %v9704_v55 = vld [vmem:[%s12309_s3 + $0x7a0] sm:$0xff] }
 0x1b5   : > { %3142 = vmatpush.bf16.msrb.mxu2 %v9673_v46  ;;  %3155 = vmatpush.bf16.msrb.mxu3 %v9681_v45  ;;  %v9691_v45 = vld [vmem:[%s12309_s3 + $0x738] sm:$0xff] }
 0x1b7   : > { %2982 = vmatpush.bf16.msrb.mxu0 %v9657_v20  ;;  %2995 = vmatpush.bf16.msrb.mxu1 %v9665_v28  ;;  %v1225_v51 = vpop.f32.mrf.mxu2  ;;  %v1238_v14 = vpop.f32.mrf.mxu3  ;;  %v9699_v20 = vld [vmem:[%s12309_s3 + $0x778] sm:$0xff]  ;;  %v3040_v28 = vrot.slane %v11053_v48, 2 }
 0x1b8   : > { %v9696_v51 = vld [vmem:[%s12309_s3 + $0x760] sm:$0xff] }
 0x1b9   : > { %3143 = vmatpush.bf16.msrb.mxu2 %v9672_v36  ;;  %3156 = vmatpush.bf16.msrb.mxu3 %v9680_v16  ;;  %v9714_v36 = vld [vmem:[%s12309_s3 + $0x7f0] sm:$0xff]  ;;  %v2880_v16 = vrot.slane %v11030_v33, 2 }
 0x1bb   : > { %2983 = vmatpush.bf16.msrb.mxu0 %v9656_v35  ;;  %2996 = vmatpush.bf16.msrb.mxu1 %v9664_v42  ;;  %v1382_v21 = vpop.f32.mrf.mxu0  ;;  %v1395_v58 = vpop.f32.mrf.mxu1  ;;  %v2881_v35 = vrot.slane %v11032_v43, 2 }
 0x1bc   : > { %v1396_v26 = vadd.f32 %v1395_v58, %v1382_v21  ;;  %v9687_v58 = vld [vmem:[%s12309_s3 + $0x718] sm:$0xff] }
 0x1bd   : > { %3144 = vmatpush.bf16.msrb.mxu2 %v9671_v2  ;;  %3157 = vmatpush.bf16.msrb.mxu3 %v9679_v40  ;;  %v9705_v2 = vld [vmem:[%s12309_s3 + $0x7a8] sm:$0xff] }
 0x1be   : > { %v1399_v39 = vadd.f32 %v1396_v26, %v1237_v49  ;;  %v9713_v40 = vld [vmem:[%s12309_s3 + $0x7e8] sm:$0xff]  ;;  %v9695_v26 = vld [vmem:[%s12309_s3 + $0x758] sm:$0xff] }
 0x1bf   : > { %2984 = vmatpush.bf16.msrb.mxu0 %v9655_v54  ;;  %2997 = vmatpush.bf16.msrb.mxu1 %v9663_v38  ;;  %v1542_v31 = vpop.f32.mrf.mxu2  ;;  %v1555_v29 = vpop.f32.mrf.mxu3  ;;  %v9689_v38 = vld [vmem:[%s12309_s3 + $0x728] sm:$0xff] }
 0x1c0   : > { %v1556_v46 = vadd.f32 %v1555_v29, %v1542_v31  ;;  %v9694_v31 = vld [vmem:[%s12309_s3 + $0x750] sm:$0xff]  ;;  %v9701_v29 = vld [vmem:[%s12309_s3 + $0x788] sm:$0xff] }
 0x1c1   : > { %3145 = vmatpush.bf16.msrb.mxu2 %v9670_v60  ;;  %3158 = vmatpush.bf16.msrb.mxu3 %v9678_v62  ;;  %v9712_v60 = vld [vmem:[%s12309_s3 + $0x7e0] sm:$0xff] }
 0x1c2   : > { %v1559_v7 = vadd.f32 %v1556_v46, %v1399_v39  ;;  %v9709_v46 = vld [vmem:[%s12309_s3 + $0x7c8] sm:$0xff] }
 0x1c3   : > { %2985 = vmatpush.bf16.msrb.mxu0 %v9654_v11  ;;  %2998 = vmatpush.bf16.msrb.mxu1 %v9662_v12  ;;  %v1384_v42 = vpop.f32.mrf.mxu0  ;;  %v1397_v37 = vpop.f32.mrf.mxu1  ;;  %v9688_v12 = vld [vmem:[%s12309_s3 + $0x720] sm:$0xff] }
 0x1c4   : > { %v9692_v42 = vld [vmem:[%s12309_s3 + $0x740] sm:$0xff]  ;;  %v9723_v37 = vld [vmem:[%s12309_s3 + $0x838] sm:$0xff] }
 0x1c5   : > { %3146 = vmatpush.bf16.msrb.mxu2 %v9669_v15  ;;  %3159 = vmatpush.bf16.msrb.mxu3 %v9677_v4  ;;  %v9703_v15 = vld [vmem:[%s12309_s3 + $0x798] sm:$0xff] }
 0x1c6   : > { %v9711_v4 = vld [vmem:[%s12309_s3 + $0x7d8] sm:$0xff] }
 0x1c7   : > { %2986 = vmatpush.bf16.msrb.mxu0 %v9653_v59  ;;  %2999 = vmatpush.bf16.msrb.mxu1 %v9661_v13  ;;  %v1544_v49 = vpop.f32.mrf.mxu2  ;;  %v1557_v54 = vpop.f32.mrf.mxu3 }
 0x1c8   : > { %v9746_v49 = vld [vmem:[%s12309_s3 + $0x8f0] sm:$0xff]  ;;  %v3200_v54 = vrot.slane %v11030_v33, 3  ;;  %v9737_v33 = vld [vmem:[%s12309_s3 + $0x8a8] sm:$0xff] }
 0x1c9   : > { %3147 = vmatpush.bf16.msrb.mxu2 %v9668_v24  ;;  %3160 = vmatpush.bf16.msrb.mxu3 %v9676_v27  ;;  %v9702_v27 = vld [vmem:[%s12309_s3 + $0x790] sm:$0xff] }
 0x1cb   : > { %2987 = vmatpush.bf16.msrb.mxu0 %v9652_v17  ;;  %3000 = vmatpush.bf16.msrb.mxu1 %v9660_v6  ;;  %v1702_v62 = vpop.f32.mrf.mxu0  ;;  %v1715_v11 = vpop.f32.mrf.mxu1  ;;  %v9686_v6 = vld [vmem:[%s12309_s3 + $0x710] sm:$0xff] }
 0x1cc   : > { %3148 = vmatmul.bf16.vlgmr.msrb.gmra.mxu2 %v3040_v28  ;;  %3161 = vmatmul.bf16.vlgmr.msrb.gmra.mxu3 %v3041_v18  ;;  %v1716_v14 = vadd.f32 %v1715_v11, %v1702_v62  ;;  %v9685_v28 = vld [vmem:[%s12309_s3 + $0x708] sm:$0xff]  ;;  %v9744_v62 = vld [vmem:[%s12309_s3 + $0x8e0] sm:$0xff] }
 0x1cd   : > { %3460 = vmatpush.bf16.msra.mxu2 %v9707_v5  ;;  %3473 = vmatpush.bf16.msra.mxu3 %v9715_v30  ;;  %v9710_v5 = vld [vmem:[%s12309_s3 + $0x7d0] sm:$0xff]  ;;  %v9693_v18 = vld [vmem:[%s12309_s3 + $0x748] sm:$0xff] }
 0x1ce   : > { %2988 = vmatmul.bf16.vlgmr.msrb.gmra.mxu0 %v2880_v16  ;;  %3001 = vmatmul.bf16.vlgmr.msrb.gmra.mxu1 %v2881_v35  ;;  %v1719_v59 = vadd.f32 %v1716_v14, %v1559_v7  ;;  %v9700_v7 = vld [vmem:[%s12309_s3 + $0x780] sm:$0xff]  ;;  %v9747_v16 = vld [vmem:[%s12309_s3 + $0x8f8] sm:$0xff] }
 0x1cf   : > { %3300 = vmatpush.bf16.msra.mxu0 %v9691_v45  ;;  %3313 = vmatpush.bf16.msra.mxu1 %v9699_v20  ;;  %v1862_v13 = vpop.f32.mrf.mxu2  ;;  %v1875_v21 = vpop.f32.mrf.mxu3  ;;  %v9684_v35 = vld [vmem:[%s12309_s3 + $0x700] sm:$0xff] }
 0x1d0   : > { %v1876_v24 = vadd.f32 %v1875_v21, %v1862_v13  ;;  %v9720_v14 = vld [vmem:[%s12309_s3 + $0x820] sm:$0xff]  ;;  %v9743_v13 = vld [vmem:[%s12309_s3 + $0x8d8] sm:$0xff] }
 0x1d1   : > { %3461 = vmatpush.bf16.msra.mxu2 %v9706_v34  ;;  %3474 = vmatpush.bf16.msra.mxu3 %v9714_v36  ;;  %v9708_v34 = vld [vmem:[%s12309_s3 + $0x7c0] sm:$0xff]  ;;  %v9739_v36 = vld [vmem:[%s12309_s3 + $0x8b8] sm:$0xff] }
 0x1d2   : > { %v11324_v30 = vadd.f32 %v1876_v24, %v1719_v59  ;;  %v9735_v59 = vld [vmem:[%s12309_s3 + $0x898] sm:$0xff] }
 0x1d3   : > { %3301 = vmatpush.bf16.msra.mxu0 %v9690_v44  ;;  %3314 = vmatpush.bf16.msra.mxu1 %v9698_v53  ;;  %v1704_v39 = vpop.f32.mrf.mxu0  ;;  %v1717_v17 = vpop.f32.mrf.mxu1  ;;  %v9731_v44 = vld [vmem:[%s12309_s3 + $0x878] sm:$0xff]  ;;  %v3360_v53 = vrot.slane %v11053_v48, 3  ;;  %v9722_v48 = vld [vmem:[%s12309_s3 + $0x830] sm:$0xff] }
 0x1d4   : > { %v9719_v24 = vld [vmem:[%s12309_s3 + $0x818] sm:$0xff]  ;;  %v9742_v39 = vld [vmem:[%s12309_s3 + $0x8d0] sm:$0xff] }
 0x1d5   : > { %3462 = vmatpush.bf16.msra.mxu2 %v9705_v2  ;;  %3475 = vmatpush.bf16.msra.mxu3 %v9713_v40  ;;  %v3361_v2 = vrot.slane %v11056_v19, 3  ;;  %v9738_v40 = vld [vmem:[%s12309_s3 + $0x8b0] sm:$0xff] }
 0x1d6   : > { %v9730_v19 = vld [vmem:[%s12309_s3 + $0x870] sm:$0xff] }
 0x1d7   : > { %3302 = vmatpush.bf16.msra.mxu0 %v9689_v38  ;;  %3315 = vmatpush.bf16.msra.mxu1 %v9697_v32  ;;  %v1864_v45 = vpop.f32.mrf.mxu2  ;;  %v1877_v20 = vpop.f32.mrf.mxu3  ;;  %v3201_v38 = vrot.slane %v11032_v43, 3  ;;  %v9745_v43 = vld [vmem:[%s12309_s3 + $0x8e8] sm:$0xff] }
 0x1d8   : > { %v9721_v32 = vld [vmem:[%s12309_s3 + $0x828] sm:$0xff] }
 0x1d9   : > { %3463 = vmatpush.bf16.msra.mxu2 %v9704_v55  ;;  %3476 = vmatpush.bf16.msra.mxu3 %v9712_v60  ;;  %v9729_v55 = vld [vmem:[%s12309_s3 + $0x868] sm:$0xff]  ;;  %v9736_v60 = vld [vmem:[%s12309_s3 + $0x8a0] sm:$0xff] }
 0x1da   : > { %v9741_v45 = vld [vmem:[%s12309_s3 + $0x8c8] sm:$0xff] }
 0x1db   : > { %3303 = vmatpush.bf16.msra.mxu0 %v9688_v12  ;;  %3316 = vmatpush.bf16.msra.mxu1 %v9696_v51 }
 0x1dd   : > { %3464 = vmatpush.bf16.msra.mxu2 %v9703_v15  ;;  %3477 = vmatpush.bf16.msra.mxu3 %v9711_v4  ;;  %v9728_v15 = vld [vmem:[%s12309_s3 + $0x860] sm:$0xff] }
 0x1df   : > { %3304 = vmatpush.bf16.msra.mxu0 %v9687_v58  ;;  %3317 = vmatpush.bf16.msra.mxu1 %v9695_v26 }
 0x1e1   : > { %3465 = vmatpush.bf16.msra.mxu2 %v9702_v27  ;;  %3478 = vmatpush.bf16.msra.mxu3 %v9710_v5  ;;  %v9727_v27 = vld [vmem:[%s12309_s3 + $0x858] sm:$0xff] }
 0x1e3   : > { %3305 = vmatpush.bf16.msra.mxu0 %v9686_v6  ;;  %3318 = vmatpush.bf16.msra.mxu1 %v9694_v31  ;;  %v9718_v31 = vld [vmem:[%s12309_s3 + $0x810] sm:$0xff] }
 0x1e5   : > { %3466 = vmatpush.bf16.msra.mxu2 %v9701_v29  ;;  %3479 = vmatpush.bf16.msra.mxu3 %v9709_v46  ;;  %v9726_v29 = vld [vmem:[%s12309_s3 + $0x850] sm:$0xff]  ;;  %v9733_v46 = vld [vmem:[%s12309_s3 + $0x888] sm:$0xff] }
 0x1e7   : > { %3306 = vmatpush.bf16.msra.mxu0 %v9685_v28  ;;  %3319 = vmatpush.bf16.msra.mxu1 %v9693_v18  ;;  %v3521_v18 = vunpack.c.l.b16 %v10752_v8 }
 0x1e9   : > { %3467 = vmatpush.bf16.msra.mxu2 %v9700_v7  ;;  %3480 = vmatpush.bf16.msra.mxu3 %v9708_v34  ;;  %v3522_v7 = vunpack.c.h.b16 %v10752_v8  ;;  %v9717_v34 = vld [vmem:[%s12309_s3 + $0x808] sm:$0xff]  ;;  %v9740_v8 = vld [vmem:[%s12309_s3 + $0x8c0] sm:$0xff] }
 0x1eb   : > { %3307 = vmatpush.bf16.msra.mxu0 %v9684_v35  ;;  %3320 = vmatpush.bf16.msra.mxu1 %v9692_v42  ;;  %v2022_v11 = vpop.f32.mrf.mxu0  ;;  %v2035_v12 = vpop.f32.mrf.mxu1  ;;  %v11455_v35 = vpack.c.b16 %v3521_v18, %v3521_v18  ;;  %v11457_v42 = vpack.c.b16 %v3522_v7, %v3522_v7 }
 0x1ec   : > { %3468 = vmatmul.bf16.vlgmr.msra.gmra.mxu2 %v3360_v53  ;;  %3481 = vmatmul.bf16.vlgmr.msra.gmra.mxu3 %v3361_v2  ;;  %v2036_v51 = vadd.f32 %v2035_v12, %v2022_v11  ;;  %v9716_v53 = vld [vmem:[%s12309_s3 + $0x800] sm:$0xff] }
 0x1ed   : > { %3787 = vmatpush.bf16.msrb.mxu2 %v9739_v36  ;;  %3800 = vmatpush.bf16.msrb.mxu3 %v9747_v16  ;;  %v9725_v36 = vld [vmem:[%s12309_s3 + $0x848] sm:$0xff]  ;;  %v9732_v16 = vld [vmem:[%s12309_s3 + $0x880] sm:$0xff] }
 0x1ee   : > { %3308 = vmatmul.bf16.vlgmr.msra.gmra.mxu0 %v3200_v54  ;;  %3321 = vmatmul.bf16.vlgmr.msra.gmra.mxu1 %v3201_v38  ;;  %v2039_v4 = vadd.f32 %v2036_v51, %v11324_v30  ;;  %v9734_v30 = vld [vmem:[%s12309_s3 + $0x890] sm:$0xff]  ;;  %v9724_v2 = vld [vmem:[%s12309_s3 + $0x840] sm:$0xff]  ;;  %v11478_v54 = vshrl.u32 %v11455_v35, 16  ;;  %v11481_v38 = vshrl.u32 %v11457_v42, 16 }
 0x1ef   : > { %3623 = vmatpush.bf16.msrb.mxu0 %v9723_v37  ;;  %3636 = vmatpush.bf16.msrb.mxu1 %v9731_v44  ;;  %v2182_v21 = vpop.f32.mrf.mxu2  ;;  %v2195_v58 = vpop.f32.mrf.mxu3  ;;  %v9771_v37 = vld [vmem:[%s12309_s3 + $0x9b8] sm:$0xff]  ;;  %v9768_v11 = vld [vmem:[%s12309_s3 + $0x9a0] sm:$0xff] }
 0x1f0   : > { %v2196_v26 = vadd.f32 %v2195_v58, %v2182_v21  ;;  %v9779_v44 = vld [vmem:[%s12309_s3 + $0x9f8] sm:$0xff]  ;;  %v9776_v12 = vld [vmem:[%s12309_s3 + $0x9e0] sm:$0xff] }
 0x1f1   : > { %3788 = vmatpush.bf16.msrb.mxu2 %v9738_v40  ;;  %3801 = vmatpush.bf16.msrb.mxu3 %v9746_v49  ;;  %v9755_v40 = vld [vmem:[%s12309_s3 + $0x938] sm:$0xff] }
 0x1f2   : > { %v11421_v5 = vadd.f32 %v2196_v26, %v2039_v4  ;;  %v9763_v49 = vld [vmem:[%s12309_s3 + $0x978] sm:$0xff]  ;;  %v9752_v4 = vld [vmem:[%s12309_s3 + $0x920] sm:$0xff] }
 0x1f3   : > { %3624 = vmatpush.bf16.msrb.mxu0 %v9722_v48  ;;  %3637 = vmatpush.bf16.msrb.mxu1 %v9730_v19  ;;  %v2024_v17 = vpop.f32.mrf.mxu0  ;;  %v2037_v6 = vpop.f32.mrf.mxu1  ;;  %v9770_v48 = vld [vmem:[%s12309_s3 + $0x9b0] sm:$0xff]  ;;  %v9767_v21 = vld [vmem:[%s12309_s3 + $0x998] sm:$0xff] }
 0x1f4   : > { %v9778_v19 = vld [vmem:[%s12309_s3 + $0x9f0] sm:$0xff]  ;;  %v9775_v58 = vld [vmem:[%s12309_s3 + $0x9d8] sm:$0xff] }
 0x1f5   : > { %3789 = vmatpush.bf16.msrb.mxu2 %v9737_v33  ;;  %3802 = vmatpush.bf16.msrb.mxu3 %v9745_v43  ;;  %v9754_v33 = vld [vmem:[%s12309_s3 + $0x930] sm:$0xff] }
 0x1f6   : > { %v9762_v43 = vld [vmem:[%s12309_s3 + $0x970] sm:$0xff] }
 0x1f7   : > { %3625 = vmatpush.bf16.msrb.mxu0 %v9721_v32  ;;  %3638 = vmatpush.bf16.msrb.mxu1 %v9729_v55  ;;  %v2184_v20 = vpop.f32.mrf.mxu2  ;;  %v2197_v28 = vpop.f32.mrf.mxu3  ;;  %v9769_v32 = vld [vmem:[%s12309_s3 + $0x9a8] sm:$0xff]  ;;  %v9766_v17 = vld [vmem:[%s12309_s3 + $0x990] sm:$0xff] }
 0x1f8   : > { %v9777_v55 = vld [vmem:[%s12309_s3 + $0x9e8] sm:$0xff]  ;;  %v9774_v6 = vld [vmem:[%s12309_s3 + $0x9d0] sm:$0xff] }
 0x1f9   : > { %3790 = vmatpush.bf16.msrb.mxu2 %v9736_v60  ;;  %3803 = vmatpush.bf16.msrb.mxu3 %v9744_v62  ;;  %v9753_v60 = vld [vmem:[%s12309_s3 + $0x928] sm:$0xff] }
 0x1fa   : > { %v9761_v62 = vld [vmem:[%s12309_s3 + $0x968] sm:$0xff] }
 0x1fb   : > { %3626 = vmatpush.bf16.msrb.mxu0 %v9720_v14  ;;  %3639 = vmatpush.bf16.msrb.mxu1 %v9728_v15  ;;  %v9765_v20 = vld [vmem:[%s12309_s3 + $0x988] sm:$0xff] }
 0x1fc   : > { %v9773_v28 = vld [vmem:[%s12309_s3 + $0x9c8] sm:$0xff] }
 0x1fd   : > { %3791 = vmatpush.bf16.msrb.mxu2 %v9735_v59  ;;  %3804 = vmatpush.bf16.msrb.mxu3 %v9743_v13  ;;  %v9760_v59 = vld [vmem:[%s12309_s3 + $0x960] sm:$0xff] }
 0x1ff   : > { %3627 = vmatpush.bf16.msrb.mxu0 %v9719_v24  ;;  %3640 = vmatpush.bf16.msrb.mxu1 %v9727_v27 }
 0x201   : > { %3792 = vmatpush.bf16.msrb.mxu2 %v9734_v30  ;;  %3805 = vmatpush.bf16.msrb.mxu3 %v9742_v39  ;;  %v9751_v30 = vld [vmem:[%s12309_s3 + $0x918] sm:$0xff] }
 0x203   : > { %3628 = vmatpush.bf16.msrb.mxu0 %v9718_v31  ;;  %3641 = vmatpush.bf16.msrb.mxu1 %v9726_v29 }
 0x205   : > { %3793 = vmatpush.bf16.msrb.mxu2 %v9733_v46  ;;  %3806 = vmatpush.bf16.msrb.mxu3 %v9741_v45  ;;  %v9750_v46 = vld [vmem:[%s12309_s3 + $0x910] sm:$0xff] }
 0x206   : > { %v9758_v45 = vld [vmem:[%s12309_s3 + $0x950] sm:$0xff] }
 0x207   : > { %3629 = vmatpush.bf16.msrb.mxu0 %v9717_v34  ;;  %3642 = vmatpush.bf16.msrb.mxu1 %v9725_v36  ;;  %v9749_v34 = vld [vmem:[%s12309_s3 + $0x908] sm:$0xff] }
 0x208   : > { %v9757_v36 = vld [vmem:[%s12309_s3 + $0x948] sm:$0xff] }
 0x209   : > { %3794 = vmatpush.bf16.msrb.mxu2 %v9732_v16  ;;  %3807 = vmatpush.bf16.msrb.mxu3 %v9740_v8  ;;  %v9764_v16 = vld [vmem:[%s12309_s3 + $0x980] sm:$0xff] }
 0x20a   : > { %v9772_v8 = vld [vmem:[%s12309_s3 + $0x9c0] sm:$0xff] }
 0x20b   : > { %3630 = vmatpush.bf16.msrb.mxu0 %v9716_v53  ;;  %3643 = vmatpush.bf16.msrb.mxu1 %v9724_v2  ;;  %v2345_v51 = vpop.f32.mrf.mxu0  ;;  %v2358_v14 = vpop.f32.mrf.mxu1  ;;  %v9748_v53 = vld [vmem:[%s12309_s3 + $0x900] sm:$0xff] }
 0x20c   : > { %3795 = vmatmul.bf16.vlgmr.msrb.gmra.mxu2 %v11478_v54  ;;  %3808 = vmatmul.bf16.vlgmr.msrb.gmra.mxu3 %v11481_v38  ;;  %v2359_v15 = vadd.f32 %v2358_v14, %v2345_v51  ;;  %v9756_v2 = vld [vmem:[%s12309_s3 + $0x940] sm:$0xff]  ;;  %v9785_v51 = vld [vmem:[%s12309_s3 + $0xa28] sm:$0xff] }
 0x20d   : > { %4107 = vmatpush.bf16.msra.mxu2 %v9771_v37  ;;  %4120 = vmatpush.bf16.msra.mxu3 %v9779_v44  ;;  %v9803_v37 = vld [vmem:[%s12309_s3 + $0xab8] sm:$0xff]  ;;  %v9793_v14 = vld [vmem:[%s12309_s3 + $0xa68] sm:$0xff] }
 0x20e   : > { %3631 = vmatmul.bf16.vlgmr.msrb.gmra.mxu0 %v11455_v35  ;;  %3644 = vmatmul.bf16.vlgmr.msrb.gmra.mxu1 %v11457_v42  ;;  %v2362_v13 = vadd.f32 %v2359_v15, %v11421_v5  ;;  %v9759_v5 = vld [vmem:[%s12309_s3 + $0x958] sm:$0xff]  ;;  %v9800_v15 = vld [vmem:[%s12309_s3 + $0xaa0] sm:$0xff] }
 0x20f   : > { %3947 = vmatpush.bf16.msra.mxu0 %v9755_v40  ;;  %3960 = vmatpush.bf16.msra.mxu1 %v9763_v49  ;;  %v2509_v26 = vpop.f32.mrf.mxu2  ;;  %v2522_v24 = vpop.f32.mrf.mxu3  ;;  %v9811_v44 = vld [vmem:[%s12309_s3 + $0xaf8] sm:$0xff] }
 0x210   : > { %v2523_v27 = vadd.f32 %v2522_v24, %v2509_v26  ;;  %v9787_v40 = vld [vmem:[%s12309_s3 + $0xa38] sm:$0xff]  ;;  %v9792_v26 = vld [vmem:[%s12309_s3 + $0xa60] sm:$0xff] }
 0x211   : > { %4108 = vmatpush.bf16.msra.mxu2 %v9770_v48  ;;  %4121 = vmatpush.bf16.msra.mxu3 %v9778_v19  ;;  %v9795_v49 = vld [vmem:[%s12309_s3 + $0xa78] sm:$0xff]  ;;  %v4007_v48 = vrot.slane %v11478_v54, 1  ;;  %v4008_v19 = vrot.slane %v11481_v38, 1 }
 0x212   : > { %v11536_v39 = vadd.f32 %v2523_v27, %v2362_v13  ;;  %v9799_v27 = vld [vmem:[%s12309_s3 + $0xa98] sm:$0xff] }
 0x213   : > { %3948 = vmatpush.bf16.msra.mxu0 %v9754_v33  ;;  %3961 = vmatpush.bf16.msra.mxu1 %v9762_v43  ;;  %v2347_v31 = vpop.f32.mrf.mxu0  ;;  %v2360_v29 = vpop.f32.mrf.mxu1  ;;  %v9802_v33 = vld [vmem:[%s12309_s3 + $0xab0] sm:$0xff] }
 0x214   : > { %v9810_v43 = vld [vmem:[%s12309_s3 + $0xaf0] sm:$0xff]  ;;  %v9783_v31 = vld [vmem:[%s12309_s3 + $0xa18] sm:$0xff] }
 0x215   : > { %4109 = vmatpush.bf16.msra.mxu2 %v9769_v32  ;;  %4122 = vmatpush.bf16.msra.mxu3 %v9777_v55  ;;  %v3847_v32 = vrot.slane %v11455_v35, 1  ;;  %v3848_v55 = vrot.slane %v11457_v42, 1 }
 0x217   : > { %3949 = vmatpush.bf16.msra.mxu0 %v9753_v60  ;;  %3962 = vmatpush.bf16.msra.mxu1 %v9761_v62  ;;  %v2511_v18 = vpop.f32.mrf.mxu2  ;;  %v2524_v7 = vpop.f32.mrf.mxu3  ;;  %v9786_v60 = vld [vmem:[%s12309_s3 + $0xa30] sm:$0xff] }
 0x218   : > { %v9794_v62 = vld [vmem:[%s12309_s3 + $0xa70] sm:$0xff] }
 0x219   : > { %4110 = vmatpush.bf16.msra.mxu2 %v9768_v11  ;;  %4123 = vmatpush.bf16.msra.mxu3 %v9776_v12  ;;  %v9801_v11 = vld [vmem:[%s12309_s3 + $0xaa8] sm:$0xff]  ;;  %v9782_v18 = vld [vmem:[%s12309_s3 + $0xa10] sm:$0xff] }
 0x21a   : > { %v9809_v12 = vld [vmem:[%s12309_s3 + $0xae8] sm:$0xff]  ;;  %v9790_v7 = vld [vmem:[%s12309_s3 + $0xa50] sm:$0xff] }
 0x21b   : > { %3950 = vmatpush.bf16.msra.mxu0 %v9752_v4  ;;  %3963 = vmatpush.bf16.msra.mxu1 %v9760_v59  ;;  %v9808_v4 = vld [vmem:[%s12309_s3 + $0xae0] sm:$0xff] }
 0x21d   : > { %4111 = vmatpush.bf16.msra.mxu2 %v9767_v21  ;;  %4124 = vmatpush.bf16.msra.mxu3 %v9775_v58  ;;  %v9784_v58 = vld [vmem:[%s12309_s3 + $0xa20] sm:$0xff] }
 0x21f   : > { %3951 = vmatpush.bf16.msra.mxu0 %v9751_v30  ;;  %3964 = vmatpush.bf16.msra.mxu1 %v9759_v5  ;;  %v9807_v30 = vld [vmem:[%s12309_s3 + $0xad8] sm:$0xff] }
 0x221   : > { %4112 = vmatpush.bf16.msra.mxu2 %v9766_v17  ;;  %4125 = vmatpush.bf16.msra.mxu3 %v9774_v6 }
 0x223   : > { %3952 = vmatpush.bf16.msra.mxu0 %v9750_v46  ;;  %3965 = vmatpush.bf16.msra.mxu1 %v9758_v45  ;;  %v9798_v46 = vld [vmem:[%s12309_s3 + $0xa90] sm:$0xff] }
 0x224   : > { %v9806_v45 = vld [vmem:[%s12309_s3 + $0xad0] sm:$0xff] }
 0x225   : > { %4113 = vmatpush.bf16.msra.mxu2 %v9765_v20  ;;  %4126 = vmatpush.bf16.msra.mxu3 %v9773_v28 }
 0x227   : > { %3953 = vmatpush.bf16.msra.mxu0 %v9749_v34  ;;  %3966 = vmatpush.bf16.msra.mxu1 %v9757_v36  ;;  %v9797_v34 = vld [vmem:[%s12309_s3 + $0xa88] sm:$0xff] }
 0x228   : > { %v9805_v36 = vld [vmem:[%s12309_s3 + $0xac8] sm:$0xff] }
 0x229   : > { %4114 = vmatpush.bf16.msra.mxu2 %v9764_v16  ;;  %4127 = vmatpush.bf16.msra.mxu3 %v9772_v8 }
 0x22b   : > { %3954 = vmatpush.bf16.msra.mxu0 %v9748_v53  ;;  %3967 = vmatpush.bf16.msra.mxu1 %v9756_v2  ;;  %v2669_v59 = vpop.f32.mrf.mxu0  ;;  %v2682_v13 = vpop.f32.mrf.mxu1  ;;  %v9796_v53 = vld [vmem:[%s12309_s3 + $0xa80] sm:$0xff] }
 0x22c   : > { %4115 = vmatmul.bf16.vlgmr.msra.gmra.mxu2 %v4007_v48  ;;  %4128 = vmatmul.bf16.vlgmr.msra.gmra.mxu3 %v4008_v19  ;;  %v2683_v21 = vadd.f32 %v2682_v13, %v2669_v59  ;;  %v9804_v2 = vld [vmem:[%s12309_s3 + $0xac0] sm:$0xff]  ;;  %v9817_v59 = vld [vmem:[%s12309_s3 + $0xb28] sm:$0xff] }
 0x22d   : > { %4427 = vmatpush.bf16.msrb.mxu2 %v9803_v37  ;;  %4440 = vmatpush.bf16.msrb.mxu3 %v9811_v44  ;;  %v9781_v37 = vld [vmem:[%s12309_s3 + $0xa08] sm:$0xff]  ;;  %v9780_v48 = vld [vmem:[%s12309_s3 + $0xa00] sm:$0xff] }
 0x22e   : > { %3955 = vmatmul.bf16.vlgmr.msra.gmra.mxu0 %v3847_v32  ;;  %3968 = vmatmul.bf16.vlgmr.msra.gmra.mxu1 %v3848_v55  ;;  %v2686_v24 = vadd.f32 %v2683_v21, %v11536_v39  ;;  %v9791_v39 = vld [vmem:[%s12309_s3 + $0xa58] sm:$0xff]  ;;  %v9789_v44 = vld [vmem:[%s12309_s3 + $0xa48] sm:$0xff]  ;;  %v9788_v19 = vld [vmem:[%s12309_s3 + $0xa40] sm:$0xff]  ;;  %v4327_v32 = vrot.slane %v11478_v54, 2  ;;  %v4328_v55 = vrot.slane %v11481_v38, 2 }
 0x22f   : > { %4267 = vmatpush.bf16.msrb.mxu0 %v9787_v40  ;;  %4280 = vmatpush.bf16.msrb.mxu1 %v9795_v49  ;;  %v2829_v5 = vpop.f32.mrf.mxu2  ;;  %v2842_v17 = vpop.f32.mrf.mxu3  ;;  %v9835_v40 = vld [vmem:[%s12309_s3 + $0xbb8] sm:$0xff]  ;;  %v9825_v13 = vld [vmem:[%s12309_s3 + $0xb68] sm:$0xff]  ;;  %v9832_v21 = vld [vmem:[%s12309_s3 + $0xba0] sm:$0xff] }
 0x230   : > { %v2843_v6 = vadd.f32 %v2842_v17, %v2829_v5  ;;  %v9843_v49 = vld [vmem:[%s12309_s3 + $0xbf8] sm:$0xff]  ;;  %v9824_v5 = vld [vmem:[%s12309_s3 + $0xb60] sm:$0xff] }
 0x231   : > { %4428 = vmatpush.bf16.msrb.mxu2 %v9802_v33  ;;  %4441 = vmatpush.bf16.msrb.mxu3 %v9810_v43  ;;  %v9819_v33 = vld [vmem:[%s12309_s3 + $0xb38] sm:$0xff] }
 0x232   : > { %v11639_v29 = vadd.f32 %v2843_v6, %v2686_v24  ;;  %v9827_v43 = vld [vmem:[%s12309_s3 + $0xb78] sm:$0xff] }
 0x233   : > { %4268 = vmatpush.bf16.msrb.mxu0 %v9786_v60  ;;  %4281 = vmatpush.bf16.msrb.mxu1 %v9794_v62  ;;  %v2671_v20 = vpop.f32.mrf.mxu0  ;;  %v2684_v28 = vpop.f32.mrf.mxu1  ;;  %v9834_v60 = vld [vmem:[%s12309_s3 + $0xbb0] sm:$0xff]  ;;  %v9831_v6 = vld [vmem:[%s12309_s3 + $0xb98] sm:$0xff] }
 0x234   : > { %v9842_v62 = vld [vmem:[%s12309_s3 + $0xbf0] sm:$0xff]  ;;  %v9815_v20 = vld [vmem:[%s12309_s3 + $0xb18] sm:$0xff] }
 0x235   : > { %4429 = vmatpush.bf16.msrb.mxu2 %v9801_v11  ;;  %4442 = vmatpush.bf16.msrb.mxu3 %v9809_v12  ;;  %v4167_v11 = vrot.slane %v11455_v35, 2  ;;  %v4168_v12 = vrot.slane %v11457_v42, 2 }
 0x237   : > { %4269 = vmatpush.bf16.msrb.mxu0 %v9785_v51  ;;  %4282 = vmatpush.bf16.msrb.mxu1 %v9793_v14  ;;  %v2831_v16 = vpop.f32.mrf.mxu2  ;;  %v2844_v8 = vpop.f32.mrf.mxu3  ;;  %v9818_v51 = vld [vmem:[%s12309_s3 + $0xb30] sm:$0xff] }
 0x238   : > { %v9826_v14 = vld [vmem:[%s12309_s3 + $0xb70] sm:$0xff] }
 0x239   : > { %4430 = vmatpush.bf16.msrb.mxu2 %v9800_v15  ;;  %4443 = vmatpush.bf16.msrb.mxu3 %v9808_v4  ;;  %v9833_v15 = vld [vmem:[%s12309_s3 + $0xba8] sm:$0xff]  ;;  %v9814_v16 = vld [vmem:[%s12309_s3 + $0xb10] sm:$0xff] }
 0x23a   : > { %v9841_v4 = vld [vmem:[%s12309_s3 + $0xbe8] sm:$0xff]  ;;  %v9822_v8 = vld [vmem:[%s12309_s3 + $0xb50] sm:$0xff] }
 0x23b   : > { %4270 = vmatpush.bf16.msrb.mxu0 %v9784_v58  ;;  %4283 = vmatpush.bf16.msrb.mxu1 %v9792_v26  ;;  %v9840_v58 = vld [vmem:[%s12309_s3 + $0xbe0] sm:$0xff] }
 0x23d   : > { %4431 = vmatpush.bf16.msrb.mxu2 %v9799_v27  ;;  %4444 = vmatpush.bf16.msrb.mxu3 %v9807_v30  ;;  %v9816_v30 = vld [vmem:[%s12309_s3 + $0xb20] sm:$0xff] }
 0x23f   : > { %4271 = vmatpush.bf16.msrb.mxu0 %v9783_v31  ;;  %4284 = vmatpush.bf16.msrb.mxu1 %v9791_v39  ;;  %v9839_v31 = vld [vmem:[%s12309_s3 + $0xbd8] sm:$0xff] }
 0x241   : > { %4432 = vmatpush.bf16.msrb.mxu2 %v9798_v46  ;;  %4445 = vmatpush.bf16.msrb.mxu3 %v9806_v45 }
 0x243   : > { %4272 = vmatpush.bf16.msrb.mxu0 %v9782_v18  ;;  %4285 = vmatpush.bf16.msrb.mxu1 %v9790_v7  ;;  %v9830_v18 = vld [vmem:[%s12309_s3 + $0xb90] sm:$0xff] }
 0x244   : > { %v9838_v7 = vld [vmem:[%s12309_s3 + $0xbd0] sm:$0xff] }
 0x245   : > { %4433 = vmatpush.bf16.msrb.mxu2 %v9797_v34  ;;  %4446 = vmatpush.bf16.msrb.mxu3 %v9805_v36 }
 0x247   : > { %4273 = vmatpush.bf16.msrb.mxu0 %v9781_v37  ;;  %4286 = vmatpush.bf16.msrb.mxu1 %v9789_v44  ;;  %v9829_v37 = vld [vmem:[%s12309_s3 + $0xb88] sm:$0xff] }
 0x248   : > { %v9837_v44 = vld [vmem:[%s12309_s3 + $0xbc8] sm:$0xff] }
 0x249   : > { %4434 = vmatpush.bf16.msrb.mxu2 %v9796_v53  ;;  %4447 = vmatpush.bf16.msrb.mxu3 %v9804_v2 }
 0x24b   : > { %4274 = vmatpush.bf16.msrb.mxu0 %v9780_v48  ;;  %4287 = vmatpush.bf16.msrb.mxu1 %v9788_v19  ;;  %v2989_v26 = vpop.f32.mrf.mxu0  ;;  %v3002_v24 = vpop.f32.mrf.mxu1  ;;  %v9821_v48 = vld [vmem:[%s12309_s3 + $0xb48] sm:$0xff]  ;;  %v9828_v19 = vld [vmem:[%s12309_s3 + $0xb80] sm:$0xff] }
 0x24c   : > { %4435 = vmatmul.bf16.vlgmr.msrb.gmra.mxu2 %v4327_v32  ;;  %4448 = vmatmul.bf16.vlgmr.msrb.gmra.mxu3 %v4328_v55  ;;  %v3003_v27 = vadd.f32 %v3002_v24, %v2989_v26  ;;  %v9867_v32 = vld [vmem:[%s12309_s3 + $0xcb8] sm:$0xff]  ;;  %v9866_v26 = vld [vmem:[%s12309_s3 + $0xcb0] sm:$0xff] }
 0x24d   : > { %4747 = vmatpush.bf16.msra.mxu2 %v9835_v40  ;;  %4760 = vmatpush.bf16.msra.mxu3 %v9843_v49  ;;  %v358_v40 = vpop.permute.xlu0 %357  ;;  %v9813_v49 = vld [vmem:[%s12309_s3 + $0xb08] sm:$0xff]  ;;  %v9875_v55 = vld [vmem:[%s12309_s3 + $0xcf8] sm:$0xff]  ;;  %v9850_v24 = vld [vmem:[%s12309_s3 + $0xc30] sm:$0xff] }
 0x24e   : > { %4275 = vmatmul.bf16.vlgmr.msrb.gmra.mxu0 %v4167_v11  ;;  %4288 = vmatmul.bf16.vlgmr.msrb.gmra.mxu1 %v4168_v12  ;;  %v3006_v17 = vadd.f32 %v3003_v27, %v11639_v29  ;;  %v9823_v29 = vld [vmem:[%s12309_s3 + $0xb58] sm:$0xff]  ;;  %v9820_v11 = vld [vmem:[%s12309_s3 + $0xb40] sm:$0xff]  ;;  %v775_v12 = vadd.f32 %v10421_v0, %v358_v40  ;;  %v4648_v0 = vrot.slane %v11481_v38, 3 }
 0x24f   : > { %4587 = vmatpush.bf16.msra.mxu0 %v9819_v33  ;;  %4600 = vmatpush.bf16.msra.mxu1 %v9827_v43  ;;  %v3149_v39 = vpop.f32.mrf.mxu2  ;;  %v3162_v46 = vpop.f32.mrf.mxu3  ;;  %v9836_v33 = vld [vmem:[%s12309_s3 + $0xbc0] sm:$0xff] }
 0x250   : > { %v3163_v45 = vadd.f32 %v3162_v46, %v3149_v39  ;;  %v378_v43 = vpop.permute.xlu1 %377  ;;  %v824_v38 = vadd.f32 %v10429_v3, %v775_v12 }
 0x251   : > { %4748 = vmatpush.bf16.msra.mxu2 %v9834_v60  ;;  %4761 = vmatpush.bf16.msra.mxu3 %v9842_v62  ;;  %v785_v60 = vadd.f32 %v10565_v22, %v378_v43  ;;  %v9812_v62 = vld [vmem:[%s12309_s3 + $0xb00] sm:$0xff]  ;;  %v9859_v22 = vld [vmem:[%s12309_s3 + $0xc78] sm:$0xff] }
 0x252   : > { %v11742_v28 = vadd.f32 %v3163_v45, %v3006_v17  ;;  %v863_v17 = vmax.f32 %v824_v38, 0.0  ;;  %v9907_v38 = vld [vmem:[%s12309_s3 + $0xdf8] sm:$0xff] }
 0x253   : > { %4588 = vmatpush.bf16.msra.mxu0 %v9818_v51  ;;  %4601 = vmatpush.bf16.msra.mxu1 %v9826_v14  ;;  %v2991_v34 = vpop.f32.mrf.mxu0  ;;  %v3004_v36 = vpop.f32.mrf.mxu1  ;;  %v9851_v14 = vld [vmem:[%s12309_s3 + $0xc38] sm:$0xff] }
 0x254   : > { %v398_v51 = vpop.permute.xlu2 %397  ;;  %v9856_v36 = vld [vmem:[%s12309_s3 + $0xc60] sm:$0xff] }
 0x255   : > { %4749 = vmatpush.bf16.msra.mxu2 %v9833_v15  ;;  %4762 = vmatpush.bf16.msra.mxu3 %v9841_v4  ;;  %v687_v15 = vadd.f32 %v10526_v61, %v378_v43  ;;  %v795_v4 = vadd.f32 %v10671_v63, %v398_v51  ;;  %v9874_v61 = vld [vmem:[%s12309_s3 + $0xcf0] sm:$0xff]  ;;  %v697_v63 = vadd.f32 %v10660_v50, %v398_v51  ;;  %v9855_v43 = vld [vmem:[%s12309_s3 + $0xc58] sm:$0xff] }
 0x256   : > { %v9858_v50 = vld [vmem:[%s12309_s3 + $0xc70] sm:$0xff] }
 0x257   : > { %4589 = vmatpush.bf16.msra.mxu0 %v9817_v59  ;;  %4602 = vmatpush.bf16.msra.mxu1 %v9825_v13  ;;  %v3151_v53 = vpop.f32.mrf.mxu2  ;;  %v3164_v2 = vpop.f32.mrf.mxu3  ;;  %v4647_v59 = vrot.slane %v11478_v54, 3  ;;  %v677_v13 = vadd.f32 %v10401_v56, %v358_v40  ;;  %v4487_v56 = vrot.slane %v11455_v35, 3  ;;  %v844_v27 = vadd.f32 %v10676_v9, %v795_v4  ;;  %v9869_v4 = vld [vmem:[%s12309_s3 + $0xcc8] sm:$0xff] }
 0x258   : > { %v9863_v53 = vld [vmem:[%s12309_s3 + $0xc98] sm:$0xff] }
 0x259   : > { %4750 = vmatpush.bf16.msra.mxu2 %v9832_v21  ;;  %4763 = vmatpush.bf16.msra.mxu3 %v9840_v58  ;;  %v834_v21 = vadd.f32 %v10567_v23, %v785_v60  ;;  %v418_v58 = vpop.permute.xlu0 %417  ;;  %v4488_v23 = vrot.slane %v11457_v42, 3  ;;  %v726_v3 = vadd.f32 %v10403_v57, %v677_v13  ;;  %v9865_v42 = vld [vmem:[%s12309_s3 + $0xca8] sm:$0xff]  ;;  %v9871_v2 = vld [vmem:[%s12309_s3 + $0xcd8] sm:$0xff]  ;;  %v9862_v60 = vld [vmem:[%s12309_s3 + $0xc90] sm:$0xff] }
 0x25a   : > { %v805_v54 = vadd.f32 %v11178_v41, %v418_v58  ;;  %v736_v41 = vadd.f32 %v10534_v1, %v687_v15  ;;  %v707_v35 = vadd.f32 %v11158_v25, %v418_v58  ;;  %v746_v1 = vadd.f32 %v10662_v52, %v697_v63  ;;  %v9849_v57 = vld [vmem:[%s12309_s3 + $0xc28] sm:$0xff]  ;;  %v9864_v52 = vld [vmem:[%s12309_s3 + $0xca0] sm:$0xff] }
 0x25b   : > { %4590 = vmatpush.bf16.msra.mxu0 %v9816_v30  ;;  %4603 = vmatpush.bf16.msra.mxu1 %v9824_v5  ;;  %v9873_v30 = vld [vmem:[%s12309_s3 + $0xce8] sm:$0xff]  ;;  %v871_v5 = vmax.f32 %v834_v21, 0.0  ;;  %v862_v46 = vmax.f32 %v726_v3, 0.0  ;;  %v9868_v63 = vld [vmem:[%s12309_s3 + $0xcc0] sm:$0xff] }
 0x25c   : > { %v854_v9 = vadd.f32 %v11180_v10, %v805_v54  ;;  %v9857_v25 = vld [vmem:[%s12309_s3 + $0xc68] sm:$0xff]  ;;  %v756_v39 = vadd.f32 %v11160_v47, %v707_v35  ;;  %v9872_v10 = vld [vmem:[%s12309_s3 + $0xce0] sm:$0xff] }
 0x25d   : > { %4751 = vmatpush.bf16.msra.mxu2 %v9831_v6  ;;  %4764 = vmatpush.bf16.msra.mxu3 %v9839_v31  ;;  %v870_v6 = vmax.f32 %v736_v41, 0.0  ;;  %v879_v31 = vmax.f32 %v844_v27, 0.0  ;;  %v9848_v47 = vld [vmem:[%s12309_s3 + $0xc20] sm:$0xff]  ;;  %v9861_v15 = vld [vmem:[%s12309_s3 + $0xc88] sm:$0xff]  ;;  %v9883_v41 = vld [vmem:[%s12309_s3 + $0xd38] sm:$0xff] }
 0x25e   : > { %v9845_v58 = vld [vmem:[%s12309_s3 + $0xc08] sm:$0xff]  ;;  %v9891_v27 = vld [vmem:[%s12309_s3 + $0xd78] sm:$0xff] }
 0x25f   : > { %4591 = vmatpush.bf16.msra.mxu0 %v9815_v20  ;;  %4604 = vmatpush.bf16.msra.mxu1 %v9823_v29  ;;  %v895_v29 = vmax.f32 %v863_v17, %v871_v5  ;;  %v9882_v5 = vld [vmem:[%s12309_s3 + $0xd30] sm:$0xff]  ;;  %v9889_v17 = vld [vmem:[%s12309_s3 + $0xd68] sm:$0xff] }
 0x261   : > { %4752 = vmatpush.bf16.msra.mxu2 %v9830_v18  ;;  %4765 = vmatpush.bf16.msra.mxu3 %v9838_v7  ;;  %v878_v18 = vmax.f32 %v746_v1, 0.0  ;;  %v887_v7 = vmax.f32 %v854_v9, 0.0  ;;  %v9890_v1 = vld [vmem:[%s12309_s3 + $0xd70] sm:$0xff]  ;;  %v9897_v9 = vld [vmem:[%s12309_s3 + $0xda8] sm:$0xff] }
 0x263   : > { %4592 = vmatpush.bf16.msra.mxu0 %v9814_v16  ;;  %4605 = vmatpush.bf16.msra.mxu1 %v9822_v8  ;;  %v894_v16 = vmax.f32 %v862_v46, %v870_v6  ;;  %v903_v8 = vmax.f32 %v895_v29, %v879_v31  ;;  %v9896_v6 = vld [vmem:[%s12309_s3 + $0xda0] sm:$0xff]  ;;  %v9895_v29 = vld [vmem:[%s12309_s3 + $0xd98] sm:$0xff] }
 0x264   : > { %v9904_v31 = vld [vmem:[%s12309_s3 + $0xde0] sm:$0xff] }
 0x265   : > { %4753 = vmatpush.bf16.msra.mxu2 %v9829_v37  ;;  %4766 = vmatpush.bf16.msra.mxu3 %v9837_v44  ;;  %v886_v37 = vmax.f32 %v756_v39, 0.0 }
 0x267   : > { %4593 = vmatpush.bf16.msra.mxu0 %v9813_v49  ;;  %4606 = vmatpush.bf16.msra.mxu1 %v9821_v48  ;;  %v902_v48 = vmax.f32 %v894_v16, %v878_v18  ;;  %v9903_v18 = vld [vmem:[%s12309_s3 + $0xdd8] sm:$0xff] }
 0x268   : > { %v9887_v16 = vld [vmem:[%s12309_s3 + $0xd58] sm:$0xff] }
 0x269   : > { %4754 = vmatpush.bf16.msra.mxu2 %v9828_v19  ;;  %4767 = vmatpush.bf16.msra.mxu3 %v9836_v33  ;;  %v911_v19 = vmax.f32 %v903_v8, %v887_v7 }
 0x26b   : > { %4594 = vmatpush.bf16.msra.mxu0 %v9812_v62  ;;  %4607 = vmatpush.bf16.msra.mxu1 %v9820_v11  ;;  %v3309_v45 = vpop.f32.mrf.mxu0  ;;  %v3322_v20 = vpop.f32.mrf.mxu1  ;;  %v9870_v62 = vld [vmem:[%s12309_s3 + $0xcd0] sm:$0xff] }
 0x26c   : > { %4755 = vmatmul.bf16.vlgmr.msra.gmra.mxu2 %v4647_v59  ;;  %4768 = vmatmul.bf16.vlgmr.msra.gmra.mxu3 %v4648_v0  ;;  %v3323_v34 = vadd.f32 %v3322_v20, %v3309_v45  ;;  %v9888_v45 = vld [vmem:[%s12309_s3 + $0xd60] sm:$0xff] }
 0x26d   : > { %5074 = vmatpush.bf16.msrb.mxu2 %v9867_v32  ;;  %5087 = vmatpush.bf16.msrb.mxu3 %v9875_v55  ;;  %v910_v32 = vmax.f32 %v902_v48, %v886_v37  ;;  %v9894_v37 = vld [vmem:[%s12309_s3 + $0xd90] sm:$0xff]  ;;  %v9893_v48 = vld [vmem:[%s12309_s3 + $0xd88] sm:$0xff] }
 0x26e   : > { %4595 = vmatmul.bf16.vlgmr.msra.gmra.mxu0 %v4487_v56  ;;  %4608 = vmatmul.bf16.vlgmr.msra.gmra.mxu1 %v4488_v23  ;;  %v3326_v44 = vadd.f32 %v3323_v34, %v11742_v28  ;;  %v9847_v28 = vld [vmem:[%s12309_s3 + $0xc18] sm:$0xff] }
 0x26f   : > { %4910 = vmatpush.bf16.msrb.mxu0 %v9851_v14  ;;  %4923 = vmatpush.bf16.msrb.mxu1 %v9859_v22  ;;  %v3469_v40 = vpop.f32.mrf.mxu2  ;;  %v3482_v49 = vpop.f32.mrf.mxu3  ;;  %v915_v51 = vpack.c.bf16 %v911_v19, %v910_v32  ;;  %v9846_v14 = vld [vmem:[%s12309_s3 + $0xc10] sm:$0xff]  ;;  %v9899_v23 = vld [vmem:[%s12309_s3 + $0xdb8] sm:$0xff]  ;;  %v9901_v19 = vld [vmem:[%s12309_s3 + $0xdc8] sm:$0xff] }
 0x270   : > { %v3483_v33 = vadd.f32 %v3482_v49, %v3469_v40  ;;  %v9854_v22 = vld [vmem:[%s12309_s3 + $0xc50] sm:$0xff]  ;;  %v9885_v32 = vld [vmem:[%s12309_s3 + $0xd48] sm:$0xff] }
 0x271   : > { %5075 = vmatpush.bf16.msrb.mxu2 %v9866_v26  ;;  %5088 = vmatpush.bf16.msrb.mxu3 %v9874_v61  ;;  %v4808_v13 = vunpack.c.l.b16 %v915_v51  ;;  %v4809_v21 = vunpack.c.h.b16 %v915_v51  ;;  %v9853_v26 = vld [vmem:[%s12309_s3 + $0xc48] sm:$0xff]  ;;  %v9860_v61 = vld [vmem:[%s12309_s3 + $0xc80] sm:$0xff]  ;;  %v9878_v40 = vld [vmem:[%s12309_s3 + $0xd10] sm:$0xff] }
 0x272   : > { %v11861_v55 = vadd.f32 %v3483_v33, %v3326_v44  ;;  %v9902_v44 = vld [vmem:[%s12309_s3 + $0xdd0] sm:$0xff]  ;;  %v9884_v51 = vld [vmem:[%s12309_s3 + $0xd40] sm:$0xff] }
 0x273   : > { %4911 = vmatpush.bf16.msrb.mxu0 %v9850_v24  ;;  %4924 = vmatpush.bf16.msrb.mxu1 %v9858_v50  ;;  %v3311_v11 = vpop.f32.mrf.mxu0  ;;  %v3324_v12 = vpop.f32.mrf.mxu1  ;;  %v11893_v54 = vpack.c.b16 %v4808_v13, %v4808_v13  ;;  %v11895_v56 = vpack.c.b16 %v4809_v21, %v4809_v21  ;;  %v9844_v24 = vld [vmem:[%s12309_s3 + $0xc00] sm:$0xff]  ;;  %v9886_v49 = vld [vmem:[%s12309_s3 + $0xd50] sm:$0xff] }
 0x274   : > { %v9852_v50 = vld [vmem:[%s12309_s3 + $0xc40] sm:$0xff]  ;;  %v9939_v11 = vld [vmem:[%s12309_s3 + $0xef8] sm:$0xff] }
 0x275   : > { %5076 = vmatpush.bf16.msrb.mxu2 %v9865_v42  ;;  %5089 = vmatpush.bf16.msrb.mxu3 %v9873_v30  ;;  %v11916_v35 = vshrl.u32 %v11893_v54, 16  ;;  %v11919_v3 = vshrl.u32 %v11895_v56, 16  ;;  %v9898_v42 = vld [vmem:[%s12309_s3 + $0xdb0] sm:$0xff]  ;;  %v9876_v12 = vld [vmem:[%s12309_s3 + $0xd00] sm:$0xff]  ;;  %v5134_v13 = vrot.slane %v11893_v54, 1  ;;  %v5135_v21 = vrot.slane %v11895_v56, 1 }
 0x276   : > { %v9906_v30 = vld [vmem:[%s12309_s3 + $0xdf0] sm:$0xff] }
 0x277   : > { %4912 = vmatpush.bf16.msrb.mxu0 %v9849_v57  ;;  %4925 = vmatpush.bf16.msrb.mxu1 %v9857_v25  ;;  %v3471_v59 = vpop.f32.mrf.mxu2  ;;  %v3484_v0 = vpop.f32.mrf.mxu3  ;;  %v9905_v57 = vld [vmem:[%s12309_s3 + $0xde8] sm:$0xff] }
 0x278   : > { %v9881_v25 = vld [vmem:[%s12309_s3 + $0xd28] sm:$0xff]  ;;  %v9930_v59 = vld [vmem:[%s12309_s3 + $0xeb0] sm:$0xff] }
 0x279   : > { %5077 = vmatpush.bf16.msrb.mxu2 %v9864_v52  ;;  %5090 = vmatpush.bf16.msrb.mxu3 %v9872_v10  ;;  %v9880_v10 = vld [vmem:[%s12309_s3 + $0xd20] sm:$0xff]  ;;  %v9938_v0 = vld [vmem:[%s12309_s3 + $0xef0] sm:$0xff] }
 0x27b   : > { %4913 = vmatpush.bf16.msrb.mxu0 %v9848_v47  ;;  %4926 = vmatpush.bf16.msrb.mxu1 %v9856_v36  ;;  %v9879_v36 = vld [vmem:[%s12309_s3 + $0xd18] sm:$0xff] }
 0x27d   : > { %5078 = vmatpush.bf16.msrb.mxu2 %v9863_v53  ;;  %5091 = vmatpush.bf16.msrb.mxu3 %v9871_v2 }
 0x27f   : > { %4914 = vmatpush.bf16.msrb.mxu0 %v9847_v28  ;;  %4927 = vmatpush.bf16.msrb.mxu1 %v9855_v43  ;;  %v9877_v43 = vld [vmem:[%s12309_s3 + $0xd08] sm:$0xff] }
 0x281   : > { %5079 = vmatpush.bf16.msrb.mxu2 %v9862_v60  ;;  %5092 = vmatpush.bf16.msrb.mxu3 %v9870_v62  ;;  %v9900_v60 = vld [vmem:[%s12309_s3 + $0xdc0] sm:$0xff]  ;;  %v9931_v62 = vld [vmem:[%s12309_s3 + $0xeb8] sm:$0xff] }
 0x283   : > { %4915 = vmatpush.bf16.msrb.mxu0 %v9846_v14  ;;  %4928 = vmatpush.bf16.msrb.mxu1 %v9854_v22  ;;  %v9915_v14 = vld [vmem:[%s12309_s3 + $0xe38] sm:$0xff] }
 0x284   : > { %v9923_v22 = vld [vmem:[%s12309_s3 + $0xe78] sm:$0xff] }
 0x285   : > { %5080 = vmatpush.bf16.msrb.mxu2 %v9861_v15  ;;  %5093 = vmatpush.bf16.msrb.mxu3 %v9869_v4  ;;  %v5294_v15 = vrot.slane %v11916_v35, 1  ;;  %v5295_v4 = vrot.slane %v11919_v3, 1 }
 0x287   : > { %4916 = vmatpush.bf16.msrb.mxu0 %v9845_v58  ;;  %4929 = vmatpush.bf16.msrb.mxu1 %v9853_v26  ;;  %v9914_v58 = vld [vmem:[%s12309_s3 + $0xe30] sm:$0xff] }
 0x288   : > { %v9922_v26 = vld [vmem:[%s12309_s3 + $0xe70] sm:$0xff] }
 0x289   : > { %5081 = vmatpush.bf16.msrb.mxu2 %v9860_v61  ;;  %5094 = vmatpush.bf16.msrb.mxu3 %v9868_v63  ;;  %v9929_v61 = vld [vmem:[%s12309_s3 + $0xea8] sm:$0xff] }
 0x28a   : > { %v9937_v63 = vld [vmem:[%s12309_s3 + $0xee8] sm:$0xff] }
 0x28b   : > { %4917 = vmatpush.bf16.msrb.mxu0 %v9844_v24  ;;  %4930 = vmatpush.bf16.msrb.mxu1 %v9852_v50  ;;  %v3632_v39 = vpop.f32.mrf.mxu0  ;;  %v3645_v46 = vpop.f32.mrf.mxu1  ;;  %v9928_v24 = vld [vmem:[%s12309_s3 + $0xea0] sm:$0xff] }
 0x28c   : > { %5082 = vmatmul.bf16.vlgmr.msrb.gmra.mxu2 %v11916_v35  ;;  %5095 = vmatmul.bf16.vlgmr.msrb.gmra.mxu3 %v11919_v3  ;;  %v3646_v52 = vadd.f32 %v3645_v46, %v3632_v39  ;;  %v9936_v50 = vld [vmem:[%s12309_s3 + $0xee0] sm:$0xff]  ;;  %v9919_v39 = vld [vmem:[%s12309_s3 + $0xe58] sm:$0xff] }
 0x28d   : > { %5394 = vmatpush.bf16.msra.mxu2 %v9899_v23  ;;  %5407 = vmatpush.bf16.msra.mxu3 %v9907_v38  ;;  %v9913_v23 = vld [vmem:[%s12309_s3 + $0xe28] sm:$0xff] }
 0x28e   : > { %4918 = vmatmul.bf16.vlgmr.msrb.gmra.mxu0 %v11893_v54  ;;  %4931 = vmatmul.bf16.vlgmr.msrb.gmra.mxu1 %v11895_v56  ;;  %v3649_v20 = vadd.f32 %v3646_v52, %v11861_v55  ;;  %v9892_v55 = vld [vmem:[%s12309_s3 + $0xd80] sm:$0xff]  ;;  %v9921_v38 = vld [vmem:[%s12309_s3 + $0xe68] sm:$0xff]  ;;  %v9926_v52 = vld [vmem:[%s12309_s3 + $0xe90] sm:$0xff] }
 0x28f   : > { %5234 = vmatpush.bf16.msra.mxu0 %v9883_v41  ;;  %5247 = vmatpush.bf16.msra.mxu1 %v9891_v27  ;;  %v3796_v7 = vpop.f32.mrf.mxu2  ;;  %v3809_v34 = vpop.f32.mrf.mxu3 }
 0x290   : > { %v3810_v47 = vadd.f32 %v3809_v34, %v3796_v7  ;;  %v9925_v7 = vld [vmem:[%s12309_s3 + $0xe88] sm:$0xff] }
 0x291   : > { %5395 = vmatpush.bf16.msra.mxu2 %v9898_v42  ;;  %5408 = vmatpush.bf16.msra.mxu3 %v9906_v30  ;;  %v9912_v30 = vld [vmem:[%s12309_s3 + $0xe20] sm:$0xff]  ;;  %v9933_v34 = vld [vmem:[%s12309_s3 + $0xec8] sm:$0xff] }
 0x292   : > { %v11974_v8 = vadd.f32 %v3810_v47, %v3649_v20 }
 0x293   : > { %5235 = vmatpush.bf16.msra.mxu0 %v9882_v5  ;;  %5248 = vmatpush.bf16.msra.mxu1 %v9890_v1  ;;  %v3634_v53 = vpop.f32.mrf.mxu0  ;;  %v3647_v2 = vpop.f32.mrf.mxu1  ;;  %v9920_v5 = vld [vmem:[%s12309_s3 + $0xe60] sm:$0xff] }
 0x294   : > { %v9963_v53 = vld [vmem:[%s12309_s3 + $0xfb8] sm:$0xff] }
 0x295   : > { %5396 = vmatpush.bf16.msra.mxu2 %v9897_v9  ;;  %5409 = vmatpush.bf16.msra.mxu3 %v9905_v57  ;;  %v9927_v9 = vld [vmem:[%s12309_s3 + $0xe98] sm:$0xff] }
 0x296   : > { %v9935_v57 = vld [vmem:[%s12309_s3 + $0xed8] sm:$0xff] }
 0x297   : > { %5236 = vmatpush.bf16.msra.mxu0 %v9881_v25  ;;  %5249 = vmatpush.bf16.msra.mxu1 %v9889_v17  ;;  %v3798_v33 = vpop.f32.mrf.mxu2  ;;  %v3811_v28 = vpop.f32.mrf.mxu3  ;;  %v9971_v2 = vld [vmem:[%s12309_s3 + $0xff8] sm:$0xff] }
 0x298   : > { %v5614_v33 = vrot.slane %v11916_v35, 2  ;;  %v5615_v28 = vrot.slane %v11919_v3, 2 }
 0x299   : > { %5397 = vmatpush.bf16.msra.mxu2 %v9896_v6  ;;  %5410 = vmatpush.bf16.msra.mxu3 %v9904_v31  ;;  %v9911_v31 = vld [vmem:[%s12309_s3 + $0xe18] sm:$0xff] }
 0x29b   : > { %5237 = vmatpush.bf16.msra.mxu0 %v9880_v10  ;;  %5250 = vmatpush.bf16.msra.mxu1 %v9888_v45  ;;  %v9934_v10 = vld [vmem:[%s12309_s3 + $0xed0] sm:$0xff] }
 0x29d   : > { %5398 = vmatpush.bf16.msra.mxu2 %v9895_v29  ;;  %5411 = vmatpush.bf16.msra.mxu3 %v9903_v18  ;;  %v9910_v29 = vld [vmem:[%s12309_s3 + $0xe10] sm:$0xff] }
 0x29e   : > { %v9918_v18 = vld [vmem:[%s12309_s3 + $0xe50] sm:$0xff] }
 0x29f   : > { %5238 = vmatpush.bf16.msra.mxu0 %v9879_v36  ;;  %5251 = vmatpush.bf16.msra.mxu1 %v9887_v16  ;;  %v9909_v16 = vld [vmem:[%s12309_s3 + $0xe08] sm:$0xff] }
 0x2a1   : > { %5399 = vmatpush.bf16.msra.mxu2 %v9894_v37  ;;  %5412 = vmatpush.bf16.msra.mxu3 %v9902_v44  ;;  %v9924_v37 = vld [vmem:[%s12309_s3 + $0xe80] sm:$0xff] }
 0x2a2   : > { %v9932_v44 = vld [vmem:[%s12309_s3 + $0xec0] sm:$0xff] }
 0x2a3   : > { %5239 = vmatpush.bf16.msra.mxu0 %v9878_v40  ;;  %5252 = vmatpush.bf16.msra.mxu1 %v9886_v49  ;;  %v9908_v40 = vld [vmem:[%s12309_s3 + $0xe00] sm:$0xff] }
 0x2a4   : > { %v9916_v49 = vld [vmem:[%s12309_s3 + $0xe40] sm:$0xff] }
 0x2a5   : > { %5400 = vmatpush.bf16.msra.mxu2 %v9893_v48  ;;  %5413 = vmatpush.bf16.msra.mxu3 %v9901_v19  ;;  %v9947_v48 = vld [vmem:[%s12309_s3 + $0xf38] sm:$0xff] }
 0x2a6   : > { %v9955_v19 = vld [vmem:[%s12309_s3 + $0xf78] sm:$0xff] }
 0x2a7   : > { %5240 = vmatpush.bf16.msra.mxu0 %v9877_v43  ;;  %5253 = vmatpush.bf16.msra.mxu1 %v9885_v32  ;;  %v9962_v43 = vld [vmem:[%s12309_s3 + $0xfb0] sm:$0xff] }
 0x2a8   : > { %v9970_v32 = vld [vmem:[%s12309_s3 + $0xff0] sm:$0xff] }
 0x2a9   : > { %5401 = vmatpush.bf16.msra.mxu2 %v9892_v55  ;;  %5414 = vmatpush.bf16.msra.mxu3 %v9900_v60  ;;  %v5454_v55 = vrot.slane %v11893_v54, 2  ;;  %v5455_v60 = vrot.slane %v11895_v56, 2 }
 0x2ab   : > { %5241 = vmatpush.bf16.msra.mxu0 %v9876_v12  ;;  %5254 = vmatpush.bf16.msra.mxu1 %v9884_v51  ;;  %v3956_v41 = vpop.f32.mrf.mxu0  ;;  %v3969_v27 = vpop.f32.mrf.mxu1  ;;  %v9961_v12 = vld [vmem:[%s12309_s3 + $0xfa8] sm:$0xff] }
 0x2ac   : > { %5402 = vmatmul.bf16.vlgmr.msra.gmra.mxu2 %v5294_v15  ;;  %5415 = vmatmul.bf16.vlgmr.msra.gmra.mxu3 %v5295_v4  ;;  %v3970_v42 = vadd.f32 %v3969_v27, %v3956_v41  ;;  %v9969_v51 = vld [vmem:[%s12309_s3 + $0xfe8] sm:$0xff]  ;;  %v9960_v15 = vld [vmem:[%s12309_s3 + $0xfa0] sm:$0xff]  ;;  %v9951_v41 = vld [vmem:[%s12309_s3 + $0xf58] sm:$0xff] }
 0x2ad   : > { %5714 = vmatpush.bf16.msrb.mxu2 %v9931_v62  ;;  %5727 = vmatpush.bf16.msrb.mxu3 %v9939_v11  ;;  %v9946_v62 = vld [vmem:[%s12309_s3 + $0xf30] sm:$0xff]  ;;  %v9968_v4 = vld [vmem:[%s12309_s3 + $0xfe0] sm:$0xff] }
 0x2ae   : > { %5242 = vmatmul.bf16.vlgmr.msra.gmra.mxu0 %v5134_v13  ;;  %5255 = vmatmul.bf16.vlgmr.msra.gmra.mxu1 %v5135_v21  ;;  %v3973_v1 = vadd.f32 %v3970_v42, %v11974_v8  ;;  %v9917_v8 = vld [vmem:[%s12309_s3 + $0xe48] sm:$0xff]  ;;  %v9954_v11 = vld [vmem:[%s12309_s3 + $0xf70] sm:$0xff]  ;;  %v9944_v21 = vld [vmem:[%s12309_s3 + $0xf20] sm:$0xff] }
 0x2af   : > { %5554 = vmatpush.bf16.msrb.mxu0 %v9915_v14  ;;  %5567 = vmatpush.bf16.msrb.mxu1 %v9923_v22  ;;  %v4116_v25 = vpop.f32.mrf.mxu2  ;;  %v4129_v17 = vpop.f32.mrf.mxu3  ;;  %v9945_v14 = vld [vmem:[%s12309_s3 + $0xf28] sm:$0xff]  ;;  %v9958_v42 = vld [vmem:[%s12309_s3 + $0xf90] sm:$0xff] }
 0x2b0   : > { %v4130_v6 = vadd.f32 %v4129_v17, %v4116_v25  ;;  %v9953_v22 = vld [vmem:[%s12309_s3 + $0xf68] sm:$0xff] }
 0x2b1   : > { %5715 = vmatpush.bf16.msrb.mxu2 %v9930_v59  ;;  %5728 = vmatpush.bf16.msrb.mxu3 %v9938_v0  ;;  %v9957_v25 = vld [vmem:[%s12309_s3 + $0xf88] sm:$0xff] }
 0x2b2   : > { %v12077_v46 = vadd.f32 %v4130_v6, %v3973_v1  ;;  %v9965_v17 = vld [vmem:[%s12309_s3 + $0xfc8] sm:$0xff] }
 0x2b3   : > { %5555 = vmatpush.bf16.msrb.mxu0 %v9914_v58  ;;  %5568 = vmatpush.bf16.msrb.mxu1 %v9922_v26  ;;  %v3958_v45 = vpop.f32.mrf.mxu0  ;;  %v3971_v20 = vpop.f32.mrf.mxu1  ;;  %v9952_v58 = vld [vmem:[%s12309_s3 + $0xf60] sm:$0xff] }
 0x2b4   : > { %v9940_v45 = vld [vmem:[%s12309_s3 + $0xf00] sm:$0xff] }
 0x2b5   : > { %5716 = vmatpush.bf16.msrb.mxu2 %v9929_v61  ;;  %5729 = vmatpush.bf16.msrb.mxu3 %v9937_v63  ;;  %v9959_v61 = vld [vmem:[%s12309_s3 + $0xf98] sm:$0xff]  ;;  %v9948_v20 = vld [vmem:[%s12309_s3 + $0xf40] sm:$0xff] }
 0x2b6   : > { %v9967_v63 = vld [vmem:[%s12309_s3 + $0xfd8] sm:$0xff] }
 0x2b7   : > { %5556 = vmatpush.bf16.msrb.mxu0 %v9913_v23  ;;  %5569 = vmatpush.bf16.msrb.mxu1 %v9921_v38  ;;  %v4118_v47 = vpop.f32.mrf.mxu2  ;;  %v4131_v36 = vpop.f32.mrf.mxu3 }
 0x2b9   : > { %5717 = vmatpush.bf16.msrb.mxu2 %v9928_v24  ;;  %5730 = vmatpush.bf16.msrb.mxu3 %v9936_v50  ;;  %v9943_v50 = vld [vmem:[%s12309_s3 + $0xf18] sm:$0xff] }
 0x2bb   : > { %5557 = vmatpush.bf16.msrb.mxu0 %v9912_v30  ;;  %5570 = vmatpush.bf16.msrb.mxu1 %v9920_v5  ;;  %v9966_v30 = vld [vmem:[%s12309_s3 + $0xfd0] sm:$0xff] }
 0x2bd   : > { %5718 = vmatpush.bf16.msrb.mxu2 %v9927_v9  ;;  %5731 = vmatpush.bf16.msrb.mxu3 %v9935_v57  ;;  %v9942_v9 = vld [vmem:[%s12309_s3 + $0xf10] sm:$0xff] }
 0x2be   : > { %v9950_v57 = vld [vmem:[%s12309_s3 + $0xf50] sm:$0xff] }
 0x2bf   : > { %5558 = vmatpush.bf16.msrb.mxu0 %v9911_v31  ;;  %5571 = vmatpush.bf16.msrb.mxu1 %v9919_v39  ;;  %v9941_v39 = vld [vmem:[%s12309_s3 + $0xf08] sm:$0xff] }
 0x2c1   : > { %5719 = vmatpush.bf16.msrb.mxu2 %v9926_v52  ;;  %5732 = vmatpush.bf16.msrb.mxu3 %v9934_v10  ;;  %v9956_v52 = vld [vmem:[%s12309_s3 + $0xf80] sm:$0xff] }
 0x2c2   : > { %v9964_v10 = vld [vmem:[%s12309_s3 + $0xfc0] sm:$0xff] }
 0x2c3   : > { %5559 = vmatpush.bf16.msrb.mxu0 %v9910_v29  ;;  %5572 = vmatpush.bf16.msrb.mxu1 %v9918_v18  ;;  %v5934_v29 = vrot.slane %v11916_v35, 3  ;;  %v5935_v18 = vrot.slane %v11919_v3, 3 }
 0x2c5   : > { %5720 = vmatpush.bf16.msrb.mxu2 %v9925_v7  ;;  %5733 = vmatpush.bf16.msrb.mxu3 %v9933_v34  ;;  %v5774_v7 = vrot.slane %v11893_v54, 3  ;;  %v5775_v34 = vrot.slane %v11895_v56, 3 }
 0x2c7   : > { %5560 = vmatpush.bf16.msrb.mxu0 %v9909_v16  ;;  %5573 = vmatpush.bf16.msrb.mxu1 %v9917_v8 }
 0x2c9   : > { %5721 = vmatpush.bf16.msrb.mxu2 %v9924_v37  ;;  %5734 = vmatpush.bf16.msrb.mxu3 %v9932_v44 }
 0x2cb   : > { %5561 = vmatpush.bf16.msrb.mxu0 %v9908_v40  ;;  %5574 = vmatpush.bf16.msrb.mxu1 %v9916_v49  ;;  %v4276_v59 = vpop.f32.mrf.mxu0  ;;  %v4289_v0 = vpop.f32.mrf.mxu1 }
 0x2cc   : > { %5722 = vmatmul.bf16.vlgmr.msrb.gmra.mxu2 %v5614_v33  ;;  %5735 = vmatmul.bf16.vlgmr.msrb.gmra.mxu3 %v5615_v28  ;;  %v4290_v13 = vadd.f32 %v4289_v0, %v4276_v59  ;;  %v6078_v0 = vld [vmem:[%s12311_s5 + $0x70] sm:$0xff] }
 0x2cd   : > { %6034 = vmatpush.bf16.msra.mxu2 %v9963_v53  ;;  %6047 = vmatpush.bf16.msra.mxu3 %v9971_v2 }
 0x2ce   : > { %5562 = vmatmul.bf16.vlgmr.msrb.gmra.mxu0 %v5454_v55  ;;  %5575 = vmatmul.bf16.vlgmr.msrb.gmra.mxu1 %v5455_v60  ;;  %v4293_v26 = vadd.f32 %v4290_v13, %v12077_v46  ;;  %v9949_v46 = vld [vmem:[%s12309_s3 + $0xf48] sm:$0xff] }
 0x2cf   : > { %5874 = vmatpush.bf16.msra.mxu0 %v9947_v48  ;;  %5887 = vmatpush.bf16.msra.mxu1 %v9955_v19  ;;  %v4436_v23 = vpop.f32.mrf.mxu2  ;;  %v4449_v38 = vpop.f32.mrf.mxu3  ;;  %v6077_v13 = vld [vmem:[%s12311_s5 + $0x68] sm:$0xff] }
 0x2d0   : > { %v4450_v24 = vadd.f32 %v4449_v38, %v4436_v23  ;;  %v6073_v23 = vld [vmem:[%s12311_s5 + $0x48] sm:$0xff]  ;;  %v6072_v38 = vld [vmem:[%s12311_s5 + $0x40] sm:$0xff] }
 0x2d1   : > { %6035 = vmatpush.bf16.msra.mxu2 %v9962_v43  ;;  %6048 = vmatpush.bf16.msra.mxu3 %v9970_v32 }
 0x2d2   : > { %v4453_v27 = vadd.f32 %v4450_v24, %v4293_v26  ;;  %v6076_v26 = vld [vmem:[%s12311_s5 + $0x60] sm:$0xff]  ;;  %v6071_v24 = vld [vmem:[%s12311_s5 + $0x38] sm:$0xff] }
 0x2d3   : > { %5875 = vmatpush.bf16.msra.mxu0 %v9946_v62  ;;  %5888 = vmatpush.bf16.msra.mxu1 %v9954_v11  ;;  %v4278_v5 = vpop.f32.mrf.mxu0  ;;  %v4291_v1 = vpop.f32.mrf.mxu1 }
 0x2d4   : > { %v6067_v5 = vld [vmem:[%s12311_s5 + $0x18] sm:$0xff] }
 0x2d5   : > { %6036 = vmatpush.bf16.msra.mxu2 %v9961_v12  ;;  %6049 = vmatpush.bf16.msra.mxu3 %v9969_v51 }
 0x2d7   : > { %5876 = vmatpush.bf16.msra.mxu0 %v9945_v14  ;;  %5889 = vmatpush.bf16.msra.mxu1 %v9953_v22  ;;  %v4438_v6 = vpop.f32.mrf.mxu2  ;;  %v4451_v31 = vpop.f32.mrf.mxu3 }
 0x2d8   : > { %v6064_v31 = vld [vmem:[%s12311_s5] sm:$0xff] }
 0x2d9   : > { %6037 = vmatpush.bf16.msra.mxu2 %v9960_v15  ;;  %6050 = vmatpush.bf16.msra.mxu3 %v9968_v4  ;;  %v6079_v15 = vld [vmem:[%s12311_s5 + $0x78] sm:$0xff] }
 0x2db   : > { %5877 = vmatpush.bf16.msra.mxu0 %v9944_v21  ;;  %5890 = vmatpush.bf16.msra.mxu1 %v9952_v58 }
 0x2dd   : > { %6038 = vmatpush.bf16.msra.mxu2 %v9959_v61  ;;  %6051 = vmatpush.bf16.msra.mxu3 %v9967_v63  ;;  %v6075_v61 = vld [vmem:[%s12311_s5 + $0x58] sm:$0xff]  ;;  %v6074_v63 = vld [vmem:[%s12311_s5 + $0x50] sm:$0xff] }
 0x2df   : > { %5878 = vmatpush.bf16.msra.mxu0 %v9943_v50  ;;  %5891 = vmatpush.bf16.msra.mxu1 %v9951_v41  ;;  %v6070_v50 = vld [vmem:[%s12311_s5 + $0x30] sm:$0xff]  ;;  %v6069_v41 = vld [vmem:[%s12311_s5 + $0x28] sm:$0xff] }
 0x2e1   : > { %6039 = vmatpush.bf16.msra.mxu2 %v9958_v42  ;;  %6052 = vmatpush.bf16.msra.mxu3 %v9966_v30  ;;  %v6068_v30 = vld [vmem:[%s12311_s5 + $0x20] sm:$0xff] }
 0x2e3   : > { %5879 = vmatpush.bf16.msra.mxu0 %v9942_v9  ;;  %5892 = vmatpush.bf16.msra.mxu1 %v9950_v57  ;;  %v6066_v57 = vld [vmem:[%s12311_s5 + $0x10] sm:$0xff] }
 0x2e5   : > { %6040 = vmatpush.bf16.msra.mxu2 %v9957_v25  ;;  %6053 = vmatpush.bf16.msra.mxu3 %v9965_v17  ;;  %v6065_v25 = vld [vmem:[%s12311_s5 + $0x8] sm:$0xff] }
 0x2e7   : > { %5880 = vmatpush.bf16.msra.mxu0 %v9941_v39  ;;  %5893 = vmatpush.bf16.msra.mxu1 %v9949_v46 }
 0x2e9   : > { %6041 = vmatpush.bf16.msra.mxu2 %v9956_v52  ;;  %6054 = vmatpush.bf16.msra.mxu3 %v9964_v10 }
 0x2eb   : > { %5881 = vmatpush.bf16.msra.mxu0 %v9940_v45  ;;  %5894 = vmatpush.bf16.msra.mxu1 %v9948_v20  ;;  %v4596_v47 = vpop.f32.mrf.mxu0  ;;  %v4609_v36 = vpop.f32.mrf.mxu1 }
 0x2ec   : > { %6042 = vmatmul.bf16.vlgmr.msra.gmra.mxu2 %v5934_v29  ;;  %6055 = vmatmul.bf16.vlgmr.msra.gmra.mxu3 %v5935_v18  ;;  %v4610_v16 = vadd.f32 %v4609_v36, %v4596_v47 }
 0x2ee   : > { %5882 = vmatmul.bf16.vlgmr.msra.gmra.mxu0 %v5774_v7  ;;  %5895 = vmatmul.bf16.vlgmr.msra.gmra.mxu1 %v5775_v34  ;;  %v4613_v8 = vadd.f32 %v4610_v16, %v4453_v27 }
 0x2ef   : > { %v4756_v37 = vpop.f32.mrf.mxu2  ;;  %v4769_v44 = vpop.f32.mrf.mxu3  ;;  %6081 = vmatpush.msrb.mxu0 %v6079_v15 }
 0x2f0   : > { %v4770_v53 = vadd.f32 %v4769_v44, %v4756_v37 }
 0x2f1   : > { %6082 = vmatpush.msrb.mxu0 %v6078_v0 }
 0x2f2   : > { %v4773_v35 = vadd.f32 %v4770_v53, %v4613_v8 }
 0x2f3   : > { %v4598_v2 = vpop.f32.mrf.mxu0  ;;  %v4611_v3 = vpop.f32.mrf.mxu1  ;;  %6083 = vmatpush.msrb.mxu0 %v6077_v13 }
 0x2f5   : > { %6084 = vmatpush.msrb.mxu0 %v6076_v26 }
 0x2f7   : > { %v4758_v40 = vpop.f32.mrf.mxu2  ;;  %v4771_v49 = vpop.f32.mrf.mxu3  ;;  %6085 = vmatpush.msrb.mxu0 %v6075_v61 }
 0x2f9   : > { %6086 = vmatpush.msrb.mxu0 %v6074_v63 }
 0x2fb   : > { %6087 = vmatpush.msrb.mxu0 %v6073_v23 }
 0x2fd   : > { %6088 = vmatpush.msrb.mxu0 %v6072_v38 }
 0x2ff   : > { %6089 = vmatpush.msrb.mxu0 %v6071_v24 }
 0x301   : > { %6090 = vmatpush.msrb.mxu0 %v6070_v50 }
 0x303   : > { %6091 = vmatpush.msrb.mxu0 %v6069_v41 }
 0x305   : > { %6092 = vmatpush.msrb.mxu0 %v6068_v30 }
 0x307   : > { %6093 = vmatpush.msrb.mxu0 %v6067_v5 }
 0x309   : > { %6094 = vmatpush.msrb.mxu0 %v6066_v57 }
 0x30b   : > { %v4919_v48 = vpop.f32.mrf.mxu0  ;;  %v4932_v19 = vpop.f32.mrf.mxu1  ;;  %6095 = vmatpush.msrb.mxu0 %v6065_v25 }
 0x30c   : > { %v4933_v33 = vadd.f32 %v4932_v19, %v4919_v48 }
 0x30d   : > { %6096 = vmatpush.msrb.mxu0 %v6064_v31 }
 0x30e   : > { %v4936_v54 = vadd.f32 %v4933_v33, %v4773_v35  ;;  %v6061_v35 = vld [vmem:[%s12310_s4] sm:$0x1] }
 0x30f   : > { %v5083_v28 = vpop.f32.mrf.mxu2  ;;  %v5096_v56 = vpop.f32.mrf.mxu3 }
 0x310   : > { %v5097_v43 = vadd.f32 %v5096_v56, %v5083_v28 }
 0x312   : > { %v5100_v32 = vadd.f32 %v5097_v43, %v4936_v54  ;;  %v6080_v54 = vld [vmem:[%s12312_s6] sm:$0x1] }
 0x313   : > { %v4921_v55 = vpop.f32.mrf.mxu0  ;;  %v4934_v60 = vpop.f32.mrf.mxu1 }
 0x317   : > { %v5085_v62 = vpop.f32.mrf.mxu2  ;;  %v5098_v11 = vpop.f32.mrf.mxu3 }
 0x32b   : > { %v5243_v12 = vpop.f32.mrf.mxu0  ;;  %v5256_v51 = vpop.f32.mrf.mxu1 }
 0x32c   : > { %v5257_v52 = vadd.f32 %v5256_v51, %v5243_v12 }
 0x32e   : > { %v5260_v45 = vadd.f32 %v5257_v52, %v5100_v32 }
 0x32f   : > { %v5403_v14 = vpop.f32.mrf.mxu2  ;;  %v5416_v22 = vpop.f32.mrf.mxu3 }
 0x330   : > { %v5417_v10 = vadd.f32 %v5416_v22, %v5403_v14 }
 0x332   : > { %v5420_v29 = vadd.f32 %v5417_v10, %v5260_v45 }
 0x333   : > { %v5245_v4 = vpop.f32.mrf.mxu0  ;;  %v5258_v59 = vpop.f32.mrf.mxu1 }
 0x337   : > { %v5405_v21 = vpop.f32.mrf.mxu2  ;;  %v5418_v58 = vpop.f32.mrf.mxu3 }
 0x34b   : > { %v5563_v27 = vpop.f32.mrf.mxu0  ;;  %v5576_v42 = vpop.f32.mrf.mxu1 }
 0x34c   : > { %v5577_v20 = vadd.f32 %v5576_v42, %v5563_v27 }
 0x34e   : > { %v5580_v47 = vadd.f32 %v5577_v20, %v5420_v29 }
 0x34f   : > { %v5723_v1 = vpop.f32.mrf.mxu2  ;;  %v5736_v9 = vpop.f32.mrf.mxu3 }
 0x350   : > { %v5737_v18 = vadd.f32 %v5736_v9, %v5723_v1 }
 0x352   : > { %v5740_v16 = vadd.f32 %v5737_v18, %v5580_v47 }
 0x353   : > { %v5565_v17 = vpop.f32.mrf.mxu0  ;;  %v5578_v6 = vpop.f32.mrf.mxu1 }
 0x357   : > { %v5725_v39 = vpop.f32.mrf.mxu2  ;;  %v5738_v46 = vpop.f32.mrf.mxu3 }
 0x36b   : > { %v5883_v7 = vpop.f32.mrf.mxu0  ;;  %v5896_v34 = vpop.f32.mrf.mxu1 }
 0x36c   : > { %v5897_v36 = vadd.f32 %v5896_v34, %v5883_v7 }
 0x36e   : > { %v5900_v44 = vadd.f32 %v5897_v36, %v5740_v16 }
 0x36f   : > { %v6043_v8 = vpop.f32.mrf.mxu2  ;;  %v6056_v37 = vpop.f32.mrf.mxu3 }
 0x370   : > { %v6057_v53 = vadd.f32 %v6056_v37, %v6043_v8 }
 0x372   : > { %v6060_v2 = vadd.f32 %v6057_v53, %v5900_v44 }
 0x373   : > { %v5885_v3 = vpop.f32.mrf.mxu0  ;;  %v5898_v40 = vpop.f32.mrf.mxu1 }
 0x374   : > { %v6062_v49 = vadd.f32 %v6061_v35, %v6060_v2 }
 0x376   : > { %v6063_v48 = vmax.f32 %v6062_v49, 0.0 }
 0x377   : > { %v6045_v19 = vpop.f32.mrf.mxu2  ;;  %v6058_v33 = vpop.f32.mrf.mxu3 }
 0x378   : > { %6097 = vmatmul.f32.vlgmr.msrb.gmra.mxu0 %v6063_v48 }
 0x3f5   : > { %v6098_v28 = vpop.f32.mrf.mxu0 }
 0x3f6   : > { %v6099_v56 = vadd.f32 %v6098_v28, %v6080_v54 }
 0x3f8   : > { %6102 = vst.msk [vmem:[%s270_s16] sm:$0x1] %vm6101_vm0, %v6099_v56 }
 0x3f9   : > { %10042 = shalt.err (!%p10039_p3)
}
 0x3fa   : > { %9972 = dma.vmem_to_hbm [thread:$0]  (%p10158_p5), %s6115_s17, 16, %s6117_s18, %s6104_s19  }
 0x3fb PF: > { %p9978_p4 = scmp.ge.s32.totalorder %s10077_s27, 2  ;;  %s6128_s29 = sand.u32 1, %s10065_s24  }
 0x3fc   : > { %s6129_s13 = scalar_lea.sflag [#allocation3], %s6128_s29 }
 0x3fd   : > { %p9975_p7 = pnand %p9978_p4, %p10162_p6 }
 0x3ff   : > { %p9976_p8 = pneg %p9975_p7 }
 0x401   : > { %10060 = dma.done.wait (%p9976_p8), %s6129_s13, 16  }
 0x402   : > { %10062 = vsyncadd (%p9976_p8), %s6129_s13, 4294967280  ;;  %p17_p9 = scmp.ge.s32.totalorder %s10145_s30, 4   ;;  %s12316_s24 = smov %s10069_s25 }
 0x403   : > { %s12317_s25 = smov %s10073_s26  ;;  %s12318_s26 = smov %s10156_s10 }
 0x404   : > { %s12319_s27 = smov %s10145_s30  ;;  %19 = sbr.rel (!%p17_p9) target bundleno = 3 (0x3), region = 114 }
 0x409   :  { %6134 = vsyncpa [#allocation3], 1 }
 0x40a   :  { %6136 = vsyncpa [#allocation3 + $0x1], 1 }

</bundles_post_ra>
